<compile_context>
chip_gen: v6e
topology: v6e:2x2x1
jax: 0.10.0
libtpu: 0.0.40
codegen_flags: <defaults>
</compile_context>

<pallas_src>
import jax
import jax.numpy as jnp
from jax.experimental import pallas as pl
from jax.experimental.pallas import tpu as pltpu

BERT_HIDDEN = 64          # small stand-in for the 1024 of bert-large
HEAD_HIDDEN = 1024        # hardcoded in the PyTorch module
OUT_DIM = 3
OUT_PAD = 128             # lane-dense padded output width
BN_EPS = 1e-5


def head_mlp_kernel(x_ref,
                    w1_ref, b1_ref,
                    w2_ref, b2_ref,
                    w3_ref, b3_ref,
                    w4_ref, b4_ref,
                    o_ref):
    f32 = jnp.float32
    bf16 = jnp.bfloat16
    # BN + Dropout already folded / identity; weights are bf16, accum f32.
    h = x_ref[...]                                                     # (B, 3H) f32
    h = jnp.dot(h.astype(bf16), w1_ref[...], preferred_element_type=f32) + b1_ref[...]
    h = jnp.maximum(h, 0.0)
    h = jnp.dot(h.astype(bf16), w2_ref[...], preferred_element_type=f32) + b2_ref[...]
    h = jnp.maximum(h, 0.0)
    h = jnp.dot(h.astype(bf16), w3_ref[...], preferred_element_type=f32) + b3_ref[...]
    h = jnp.maximum(h, 0.0)
    o_ref[...] = (jnp.dot(h.astype(bf16), w4_ref[...], preferred_element_type=f32)
                  + b4_ref[...])                                       # (B, 128)


def head_forward(bert_outputs, offsets, folded):
    """bert_outputs: (B, S, H) f32, offsets: (B, 3) int32, folded: bf16/f32 params."""
    B, S, H = bert_outputs.shape
    assert H == BERT_HIDDEN

    # Gather the 3 offset positions per example and flatten (glue, plain JAX).
    gathered = jnp.take_along_axis(
        bert_outputs, offsets[:, :, None].astype(jnp.int32), axis=1
    )                                            # (B, 3, H)
    x = gathered.reshape(B, 3 * H)               # (B, 3H)

    operands = [
        x,
        folded["w1"], folded["b1"],
        folded["w2"], folded["b2"],
        folded["w3"], folded["b3"],
        folded["w4"], folded["b4"],
    ]
    # Single invocation, whole arrays resident in VMEM, no pipelining machinery.
    vmem_spec = pl.BlockSpec(memory_space=pltpu.MemorySpace.VMEM)

    out = pl.pallas_call(
        head_mlp_kernel,
        out_shape=jax.ShapeDtypeStruct((B, OUT_PAD), jnp.float32),
        in_specs=[vmem_spec] * len(operands),
        out_specs=vmem_spec,
        compiler_params=pltpu.CompilerParams(
            vmem_limit_bytes=32 * 1024 * 1024,   # ~5 MiB actual footprint; fits v7x
        ),
    )(*operands)
    return out[:, :OUT_DIM]


# ----------------------------- parameter setup ------------------------------

def init_params(key):
    """Raw f32 parameters mirroring the PyTorch __init__ (eval mode)."""
    def kaiming(key, fan_in, fan_out):
        # torch kaiming_normal_ on weight (out, in): std = sqrt(2/fan_in).
        # Stored transposed (in, out) so the kernel does x @ W directly.
        std = (2.0 / fan_in) ** 0.5
        return std * jax.random.normal(key, (fan_in, fan_out), jnp.float32)

    def bn(n):
        # gamma=1, beta=0, running_mean=0, running_var=1
        return {
            "gamma": jnp.ones((n,), jnp.float32),
            "beta": jnp.zeros((n,), jnp.float32),
            "mean": jnp.zeros((n,), jnp.float32),
            "var": jnp.ones((n,), jnp.float32),
        }

    k1, k2, k3, k4 = jax.random.split(key, 4)
    d_in = BERT_HIDDEN * 3
    return {
        "bn0": bn(d_in),
        "w1": kaiming(k1, d_in, HEAD_HIDDEN), "b1": jnp.zeros((HEAD_HIDDEN,), jnp.float32),
        "bn1": bn(HEAD_HIDDEN),
        "w2": kaiming(k2, HEAD_HIDDEN, HEAD_HIDDEN), "b2": jnp.zeros((HEAD_HIDDEN,), jnp.float32),
        "bn2": bn(HEAD_HIDDEN),
        "w3": kaiming(k3, HEAD_HIDDEN, HEAD_HIDDEN), "b3": jnp.zeros((HEAD_HIDDEN,), jnp.float32),
        "bn3": bn(HEAD_HIDDEN),
        "w4": kaiming(k4, HEAD_HIDDEN, OUT_DIM), "b4": jnp.zeros((OUT_DIM,), jnp.float32),
    }


def fold_params(p):
    """Fold eval-mode BN into the following Linear; cast weights to bf16."""
    def fold(bn, w, b):
        # BN(eval): y = (x - mean) * gamma / sqrt(var+eps) + beta; then y @ w + b
        scale = bn["gamma"] / jnp.sqrt(bn["var"] + BN_EPS)              # (in,)
        shift = bn["beta"] - bn["mean"] * scale                         # (in,)
        w_f = scale[:, None] * w                                        # (in, out)
        b_f = b + shift @ w                                             # (out,)
        return w_f, b_f

    w1, b1 = fold(p["bn0"], p["w1"], p["b1"])
    w2, b2 = fold(p["bn1"], p["w2"], p["b2"])
    w3, b3 = fold(p["bn2"], p["w3"], p["b3"])
    w4, b4 = fold(p["bn3"], p["w4"], p["b4"])

    # Pad the final projection to a lane-dense 128-wide output.
    w4 = jnp.pad(w4, ((0, 0), (0, OUT_PAD - OUT_DIM)))
    b4 = jnp.pad(b4, (0, OUT_PAD - OUT_DIM))

    def as_w(w):  # bf16 weights (halves HBM->VMEM bytes; native MXU width)
        return w.astype(jnp.bfloat16)

    def as_b(b):  # f32 biases, broadcastable row
        return b.reshape(1, -1).astype(jnp.float32)

    return {
        "w1": as_w(w1), "b1": as_b(b1),
        "w2": as_w(w2), "b2": as_b(b2),
        "w3": as_w(w3), "b3": as_b(b3),
        "w4": as_w(w4), "b4": as_b(b4),
    }


# ------------------------------- reference ----------------------------------

def head_forward_ref(bert_outputs, offsets, p):
    """Pure-JAX f32 reference with explicit (unfolded) eval-mode BN."""
    B, S, H = bert_outputs.shape
    g = jnp.take_along_axis(bert_outputs, offsets[:, :, None].astype(jnp.int32), 1)
    h = g.reshape(B, 3 * H)

    def bn_apply(bn, x):
        scale = bn["gamma"] / jnp.sqrt(bn["var"] + BN_EPS)
        return (x - bn["mean"]) * scale + bn["beta"]

    h = bn_apply(p["bn0"], h)
    h = jnp.maximum(h @ p["w1"] + p["b1"], 0.0)
    h = bn_apply(p["bn1"], h)
    h = jnp.maximum(h @ p["w2"] + p["b2"], 0.0)
    h = bn_apply(p["bn2"], h)
    h = jnp.maximum(h @ p["w3"] + p["b3"], 0.0)
    h = bn_apply(p["bn3"], h)
    return h @ p["w4"] + p["b4"]


if __name__ == "__main__":
    key = jax.random.PRNGKey(0)
    k_param, k_x, k_off = jax.random.split(key, 3)

    B, S, H = 4, 8, BERT_HIDDEN
    bert_outputs = jax.random.normal(k_x, (B, S, H), jnp.float32)
    offsets = jax.random.randint(k_off, (B, 3), 0, S, jnp.int32)

    params = init_params(k_param)
    folded = fold_params(params)

    out = head_forward(bert_outputs, offsets, folded)
    out = jax.block_until_ready(out)

    ref = head_forward_ref(bert_outputs, offsets, params)
    assert out.shape == (B, OUT_DIM)
    # bf16 weights -> loosened tolerance vs the f32 reference.
    assert jnp.allclose(out, ref, atol=5e-2, rtol=5e-2), "mismatch vs reference"

    print("KERNEL_OK")
</pallas_src>

<mosaic_0001>
module attributes {stable_mosaic.version = 11 : i64} {
  func.func @head_mlp_kernel(%arg0: memref<4x192xf32, #tpu.memory_space<vmem>>, %arg1: memref<192x1024xbf16, #tpu.memory_space<vmem>>, %arg2: memref<1x1024xf32, #tpu.memory_space<vmem>>, %arg3: memref<1024x1024xbf16, #tpu.memory_space<vmem>>, %arg4: memref<1x1024xf32, #tpu.memory_space<vmem>>, %arg5: memref<1024x1024xbf16, #tpu.memory_space<vmem>>, %arg6: memref<1x1024xf32, #tpu.memory_space<vmem>>, %arg7: memref<1024x128xbf16, #tpu.memory_space<vmem>>, %arg8: memref<1x128xf32, #tpu.memory_space<vmem>>, %arg9: memref<4x128xf32, #tpu.memory_space<vmem>>) attributes {dimension_semantics = [], scalar_prefetch = 0 : i64, scratch_operands = 0 : i64, tpu.core_type = #tpu.core_type<tc>} {
    %c0 = arith.constant 0 : index
    %c0_0 = arith.constant 0 : index
    %0 = vector.load %arg0[%c0, %c0_0] : memref<4x192xf32, #tpu.memory_space<vmem>>, vector<4x192xf32>
    %1 = arith.truncf %0 : vector<4x192xf32> to vector<4x192xbf16>
    %c0_1 = arith.constant 0 : index
    %c0_2 = arith.constant 0 : index
    %2 = vector.load %arg1[%c0_1, %c0_2] : memref<192x1024xbf16, #tpu.memory_space<vmem>>, vector<192x1024xbf16>
    %cst = arith.constant dense<0.000000e+00> : vector<4x1024xf32>
    %3 = tpu.matmul %1, %2, %cst {dimension_numbers = #tpu.dot_dimension_numbers<[1], [0], [0], [1], [0, 0, 1, 1], [], []>} : vector<4x192xbf16>, vector<192x1024xbf16>, vector<4x1024xf32> -> vector<4x1024xf32>
    %c0_3 = arith.constant 0 : index
    %c0_4 = arith.constant 0 : index
    %4 = vector.load %arg2[%c0_3, %c0_4] : memref<1x1024xf32, #tpu.memory_space<vmem>>, vector<1x1024xf32>
    %5 = vector.broadcast %4 : vector<1x1024xf32> to vector<4x1024xf32>
    %6 = arith.addf %3, %5 : vector<4x1024xf32>
    %cst_5 = arith.constant 0.000000e+00 : f32
    %7 = vector.broadcast %cst_5 : f32 to vector<4x1024xf32>
    %8 = arith.maximumf %6, %7 : vector<4x1024xf32>
    %9 = arith.truncf %8 : vector<4x1024xf32> to vector<4x1024xbf16>
    %c0_6 = arith.constant 0 : index
    %c0_7 = arith.constant 0 : index
    %10 = vector.load %arg3[%c0_6, %c0_7] : memref<1024x1024xbf16, #tpu.memory_space<vmem>>, vector<1024x1024xbf16>
    %cst_8 = arith.constant dense<0.000000e+00> : vector<4x1024xf32>
    %11 = tpu.matmul %9, %10, %cst_8 {dimension_numbers = #tpu.dot_dimension_numbers<[1], [0], [0], [1], [0, 0, 1, 1], [], []>} : vector<4x1024xbf16>, vector<1024x1024xbf16>, vector<4x1024xf32> -> vector<4x1024xf32>
    %c0_9 = arith.constant 0 : index
    %c0_10 = arith.constant 0 : index
    %12 = vector.load %arg4[%c0_9, %c0_10] : memref<1x1024xf32, #tpu.memory_space<vmem>>, vector<1x1024xf32>
    %13 = vector.broadcast %12 : vector<1x1024xf32> to vector<4x1024xf32>
    %14 = arith.addf %11, %13 : vector<4x1024xf32>
    %cst_11 = arith.constant 0.000000e+00 : f32
    %15 = vector.broadcast %cst_11 : f32 to vector<4x1024xf32>
    %16 = arith.maximumf %14, %15 : vector<4x1024xf32>
    %17 = arith.truncf %16 : vector<4x1024xf32> to vector<4x1024xbf16>
    %c0_12 = arith.constant 0 : index
    %c0_13 = arith.constant 0 : index
    %18 = vector.load %arg5[%c0_12, %c0_13] : memref<1024x1024xbf16, #tpu.memory_space<vmem>>, vector<1024x1024xbf16>
    %cst_14 = arith.constant dense<0.000000e+00> : vector<4x1024xf32>
    %19 = tpu.matmul %17, %18, %cst_14 {dimension_numbers = #tpu.dot_dimension_numbers<[1], [0], [0], [1], [0, 0, 1, 1], [], []>} : vector<4x1024xbf16>, vector<1024x1024xbf16>, vector<4x1024xf32> -> vector<4x1024xf32>
    %c0_15 = arith.constant 0 : index
    %c0_16 = arith.constant 0 : index
    %20 = vector.load %arg6[%c0_15, %c0_16] : memref<1x1024xf32, #tpu.memory_space<vmem>>, vector<1x1024xf32>
    %21 = vector.broadcast %20 : vector<1x1024xf32> to vector<4x1024xf32>
    %22 = arith.addf %19, %21 : vector<4x1024xf32>
    %cst_17 = arith.constant 0.000000e+00 : f32
    %23 = vector.broadcast %cst_17 : f32 to vector<4x1024xf32>
    %24 = arith.maximumf %22, %23 : vector<4x1024xf32>
    %25 = arith.truncf %24 : vector<4x1024xf32> to vector<4x1024xbf16>
    %c0_18 = arith.constant 0 : index
    %c0_19 = arith.constant 0 : index
    %26 = vector.load %arg7[%c0_18, %c0_19] : memref<1024x128xbf16, #tpu.memory_space<vmem>>, vector<1024x128xbf16>
    %cst_20 = arith.constant dense<0.000000e+00> : vector<4x128xf32>
    %27 = tpu.matmul %25, %26, %cst_20 {dimension_numbers = #tpu.dot_dimension_numbers<[1], [0], [0], [1], [0, 0, 1, 1], [], []>} : vector<4x1024xbf16>, vector<1024x128xbf16>, vector<4x128xf32> -> vector<4x128xf32>
    %c0_21 = arith.constant 0 : index
    %c0_22 = arith.constant 0 : index
    %28 = vector.load %arg8[%c0_21, %c0_22] : memref<1x128xf32, #tpu.memory_space<vmem>>, vector<1x128xf32>
    %29 = vector.broadcast %28 : vector<1x128xf32> to vector<4x128xf32>
    %30 = arith.addf %27, %29 : vector<4x128xf32>
    %c0_23 = arith.constant 0 : index
    %c0_24 = arith.constant 0 : index
    %31 = vector.load %arg9[%c0_23, %c0_24] : memref<4x128xf32, #tpu.memory_space<vmem>>, vector<4x128xf32>
    tpu.vector_store %arg9[%c0_23, %c0_24], %30 {strides = array<i32>} : memref<4x128xf32, #tpu.memory_space<vmem>>, vector<4x128xf32>,
    return
  }
}

</mosaic_0001>

<bundles_post_ra>
// kernel: tpu_custom_call.1
= control target key start
LH: loop header
LB: loop body
LE: loop exit
PB: predicated region body
PF: predicated region fallthrough
CT: control target
= control target key end

     0   :  { %14 = vsyncpa [#allocation3], 0  ;;  %s11221_s0 = inlined_call_operand.hbm [shape: f32[4,192], index: 0, kind: input, shape index: {}]   ;;  %s11222_s1 = inlined_call_operand.hbm [shape: bf16[192,1024], index: 1, kind: input, shape index: {}]   ;;  %s11223_s2 = inlined_call_operand.hbm [shape: f32[1,1024], index: 2, kind: input, shape index: {}]   ;;  %s11224_s3 = inlined_call_operand.hbm [shape: bf16[1024,1024], index: 3, kind: input, shape index: {}]   ;;  %s11225_s4 = inlined_call_operand.hbm [shape: f32[1,1024], index: 4, kind: input, shape index: {}]   ;;  %s11226_s5 = inlined_call_operand.hbm [shape: bf16[1024,1024], index: 5, kind: input, shape index: {}]   ;;  %s11227_s6 = inlined_call_operand.hbm [shape: f32[1,1024], index: 6, kind: input, shape index: {}]   ;;  %s11228_s7 = inlined_call_operand.hbm [shape: bf16[1024,128], index: 7, kind: input, shape index: {}]   ;;  %s11229_s8 = inlined_call_operand.hbm [shape: f32[1,128], index: 8, kind: input, shape index: {}]   ;;  %s11230_s9 = inlined_call_operand.hbm [shape: f32[4,128], index: 9, kind: output, shape index: {}]  }
   0x1   :  { %15 = vsyncpa [#allocation6], 0 }
   0x2   :  { %16 = vsyncpa [#allocation9], 0 }
   0x3   :  { %17 = vsyncpa [#allocation12], 0 }
   0x4   :  { %18 = vsyncpa [#allocation15], 0 }
   0x5   :  { %19 = vsyncpa [#allocation4], 0  ;;  %s10796_s30 = smov [#allocation5]  }
   0x6   :  { %s35_s10 = sshll.u32 %s10796_s30, 4  ;;  %s36_s10 = int_to_ptr.vmem [resolvable:$true] %s35_s10 }
   0x7   :  { %s10592_s11 = scalar_lea.vmem %s36_s10, 12288  ;;  %p10597_p1 = scmp.lt.s32.totalorder %s36_s10, %s36_s10 }
   0x8   :  { %p10593_p0 = scmp.ne.s32.totalorder %s36_s10, %s10592_s11  ;;  %p10598_p2 = scmp.lt.s32.totalorder %s10592_s11, %s10592_s11 }
   0xa   :  { %p10599_p3 = por %p10598_p2, %p10597_p1 }
   0xc   :  { %p10600_p4 = pnand %p10599_p3, %p10593_p0 }
   0xe   :  { %10603 = shalt.err (!%p10600_p4)
}
   0xf   :  { %s10797_s12 = smov 512   ;;  %s10798_s13 = smov 32  }
  0x10   :  { %41 = dma.hbm_to_vmem [thread:$0]  %s11222_s1, 12288, %s36_s10, [#allocation6], %s10797_s12, %s10797_s12, %s10798_s13  }
  0x11   :  { %s10799_s16 = smov [#allocation8]   ;;  %s10800_s18 = smov [#allocation11]  }
  0x12   :  { %s57_s17 = sshll.u32 %s10799_s16, 4  ;;  %s79_s19 = sshll.u32 %s10800_s18, 4  ;;  %s58_s17 = int_to_ptr.vmem [resolvable:$true] %s57_s17  ;;  %s80_s19 = int_to_ptr.vmem [resolvable:$true] %s79_s19 }
  0x13   :  { %s10612_s20 = scalar_lea.vmem %s58_s17, 65536  ;;  %p10617_p6 = scmp.lt.s32.totalorder %s58_s17, %s58_s17 }
  0x14   :  { %p10613_p5 = scmp.ne.s32.totalorder %s58_s17, %s10612_s20  ;;  %p10618_p7 = scmp.lt.s32.totalorder %s10612_s20, %s10612_s20 }
  0x16   :  { %p10619_p8 = por %p10618_p7, %p10617_p6 }
  0x18   :  { %p10620_p9 = pnand %p10619_p8, %p10613_p5 }
  0x1a   :  { %10623 = shalt.err (!%p10620_p9)
}
  0x1b   :  { %63 = dma.hbm_to_vmem [thread:$0]  %s11224_s3, 65536, %s58_s17, [#allocation9], %s10797_s12, %s10797_s12, %s10798_s13  }
  0x1c   :  { %s10632_s23 = scalar_lea.vmem %s80_s19, 65536  ;;  %p10637_p11 = scmp.lt.s32.totalorder %s80_s19, %s80_s19 }
  0x1d   :  { %p10633_p10 = scmp.ne.s32.totalorder %s80_s19, %s10632_s23  ;;  %p10638_p12 = scmp.lt.s32.totalorder %s10632_s23, %s10632_s23 }
  0x1f   :  { %p10639_p13 = por %p10638_p12, %p10637_p11 }
  0x21   :  { %p10640_p0 = pnand %p10639_p13, %p10633_p10 }
  0x23   :  { %10643 = shalt.err (!%p10640_p0)
}
  0x24   :  { %85 = dma.hbm_to_vmem [thread:$0]  %s11226_s5, 65536, %s80_s19, [#allocation12], %s10797_s12, %s10797_s12, %s10798_s13  }
  0x25   :  { %s10801_s25 = smov [#allocation14]  }
  0x26   :  { %s101_s26 = sshll.u32 %s10801_s25, 4  ;;  %s102_s26 = int_to_ptr.vmem [resolvable:$true] %s101_s26 }
  0x27   :  { %s10652_s27 = scalar_lea.vmem %s102_s26, 8192  ;;  %p10657_p2 = scmp.lt.s32.totalorder %s102_s26, %s102_s26 }
  0x28   :  { %p10653_p1 = scmp.ne.s32.totalorder %s102_s26, %s10652_s27  ;;  %p10658_p3 = scmp.lt.s32.totalorder %s10652_s27, %s10652_s27 }
  0x2a   :  { %p10659_p4 = por %p10658_p3, %p10657_p2 }
  0x2c   :  { %p10660_p5 = pnand %p10659_p4, %p10653_p1 }
  0x2e   :  { %10663 = shalt.err (!%p10660_p5)
}
  0x2f   :  { %s10802_s3 = smov 64   ;;  %s10803_s28 = smov 4  }
  0x30   :  { %107 = dma.hbm_to_vmem [thread:$0]  %s11228_s7, 8192, %s102_s26, [#allocation15], %s10802_s3, %s10802_s3, %s10803_s28  }
  0x31   :  { %s10804_s10 = smov [#allocation2]   ;;  %s10805_s14 = smov [#allocation7]  }
  0x32   :  { %s26_s11 = sshll.u32 %s10804_s10, 4  ;;  %s48_s5 = sshll.u32 %s10805_s14, 4  ;;  %s27_s11 = int_to_ptr.vmem [resolvable:$true] %s26_s11  ;;  %s49_s5 = int_to_ptr.vmem [resolvable:$true] %s48_s5 }
  0x33   :  { %s10672_s12 = scalar_lea.vmem %s27_s11, 128  ;;  %p10677_p7 = scmp.lt.s32.totalorder %s27_s11, %s27_s11 }
  0x34   :  { %p10673_p6 = scmp.ne.s32.totalorder %s27_s11, %s10672_s12  ;;  %p10678_p8 = scmp.lt.s32.totalorder %s10672_s12, %s10672_s12 }
  0x36   :  { %p10679_p9 = por %p10678_p8, %p10677_p7 }
  0x38   :  { %p10680_p10 = pnand %p10679_p9, %p10673_p6 }
  0x3a   :  { %10683 = shalt.err (!%p10680_p10)
}
  0x3b   :  { %29 = dma.hbm_to_vmem [thread:$0]  %s11221_s0, 128, %s27_s11, [#allocation3]  }
  0x3c   :  { %s10692_s16 = scalar_lea.vmem %s49_s5, 128  ;;  %p10697_p12 = scmp.lt.s32.totalorder %s49_s5, %s49_s5 }
  0x3d   :  { %p10693_p11 = scmp.ne.s32.totalorder %s49_s5, %s10692_s16  ;;  %p10698_p13 = scmp.lt.s32.totalorder %s10692_s16, %s10692_s16 }
  0x3f   :  { %p10699_p0 = por %p10698_p13, %p10697_p12 }
  0x41   :  { %p10700_p1 = pnand %p10699_p0, %p10693_p11 }
  0x43   :  { %10703 = shalt.err (!%p10700_p1)
}
  0x44   :  { %51 = dma.hbm_to_vmem [thread:$0]  %s11223_s2, 128, %s49_s5, [#allocation6]  }
  0x45   :  { %s10806_s18 = smov [#allocation10]   ;;  %s10807_s20 = smov [#allocation13]  }
  0x46   :  { %s70_s19 = sshll.u32 %s10806_s18, 4  ;;  %s92_s21 = sshll.u32 %s10807_s20, 4  ;;  %s71_s19 = int_to_ptr.vmem [resolvable:$true] %s70_s19  ;;  %s93_s21 = int_to_ptr.vmem [resolvable:$true] %s92_s21 }
  0x47   :  { %s10712_s22 = scalar_lea.vmem %s71_s19, 128  ;;  %p10717_p3 = scmp.lt.s32.totalorder %s71_s19, %s71_s19 }
  0x48   :  { %p10713_p2 = scmp.ne.s32.totalorder %s71_s19, %s10712_s22  ;;  %p10718_p4 = scmp.lt.s32.totalorder %s10712_s22, %s10712_s22 }
  0x4a   :  { %p10719_p5 = por %p10718_p4, %p10717_p3 }
  0x4c   :  { %p10720_p6 = pnand %p10719_p5, %p10713_p2 }
  0x4e   :  { %10723 = shalt.err (!%p10720_p6)
}
  0x4f   :  { %73 = dma.hbm_to_vmem [thread:$0]  %s11225_s4, 128, %s71_s19, [#allocation9]  }
  0x50   :  { %s10732_s1 = scalar_lea.vmem %s93_s21, 128  ;;  %p10737_p8 = scmp.lt.s32.totalorder %s93_s21, %s93_s21 }
  0x51   :  { %p10733_p7 = scmp.ne.s32.totalorder %s93_s21, %s10732_s1  ;;  %p10738_p9 = scmp.lt.s32.totalorder %s10732_s1, %s10732_s1 }
  0x53   :  { %p10739_p10 = por %p10738_p9, %p10737_p8 }
  0x55   :  { %p10740_p11 = pnand %p10739_p10, %p10733_p7 }
  0x57   :  { %10743 = shalt.err (!%p10740_p11)
}
  0x58   :  { %95 = dma.hbm_to_vmem [thread:$0]  %s11227_s6, 128, %s93_s21, [#allocation12]  }
  0x59   :  { %s10808_s25 = smov [#allocation16]  }
  0x5a   :  { %s114_s26 = sshll.u32 %s10808_s25, 4  ;;  %s115_s26 = int_to_ptr.vmem [resolvable:$true] %s114_s26 }
  0x5b   :  { %s10752_s27 = scalar_lea.vmem %s115_s26, 16  ;;  %s10756_s3 = scalar_lea.vmem %s115_s26, 32 }
  0x5c   :  { %p10753_p12 = scmp.ne.s32.totalorder %s115_s26, %s10752_s27  ;;  %p10757_p13 = scmp.lt.s32.totalorder %s115_s26, %s115_s26 }
  0x5d   :  { %p10758_p0 = scmp.lt.s32.totalorder %s10756_s3, %s10752_s27 }
  0x5f   :  { %p10759_p1 = por %p10758_p0, %p10757_p13 }
  0x61   :  { %p10760_p2 = pnand %p10759_p1, %p10753_p12 }
  0x63   :  { %10763 = shalt.err (!%p10760_p2)
}
  0x64   :  { %117 = dma.hbm_to_vmem [thread:$0]  %s11229_s8, 16, %s115_s26, [#allocation15]  }
  0x65   :  { %10784 = dma.done.wait [#allocation3], 128  }
  0x66   :  { %10785 = vsyncadd [#allocation3], 4294967168 }
  0x67   :  { %10786 = dma.done.wait [#allocation6], 12416  }
  0x68   :  { %10787 = vsyncadd [#allocation6], 4294954880 }
  0x69   :  { %10788 = dma.done.wait [#allocation9], 65664  }
  0x6a   :  { %10789 = vsyncadd [#allocation9], 4294901632 }
  0x6b   :  { %10790 = dma.done.wait [#allocation12], 65664  }
  0x6c   :  { %10791 = vsyncadd [#allocation12], 4294901632 }
  0x6d   :  { %10792 = dma.done.wait [#allocation15], 8208  }
  0x6e   :  { %10793 = vsyncadd [#allocation15], 4294959088  ;;  %v208_v0 = vld [vmem:[#allocation5 + $0x1c0] sm:$0xff]  ;;  %v209_v2 = vld [vmem:[#allocation5 + $0x1c8] sm:$0xff]  ;;  %vm770_vm0 = vcmask 523264   ;;  %s10809_s6 = smov [#allocation17]  }
  0x6f   :  { %v212_v1 = vld [vmem:[#allocation5 + $0x1e0] sm:$0xff]  ;;  %v213_v4 = vld [vmem:[#allocation5 + $0x1e8] sm:$0xff]  ;;  %v10887_v43 = vld [vmem:[#allocation2] sm:$0xff]  ;;  %s9212_s8 = sshll.u32 %s10809_s6, 4  ;;  %s9213_s8 = int_to_ptr.vmem [resolvable:$true] %s9212_s8 }
  0x70   :  { %v9282_v3 = vcombine.high %v208_v0, %v212_v1  ;;  %v9281_v5 = vcombine.low %v208_v0, %v212_v1  ;;  %v200_v6 = vld [vmem:[#allocation5 + $0x180] sm:$0xff]  ;;  %v9284_v8 = vcombine.high %v209_v2, %v213_v4  ;;  %v9283_v9 = vcombine.low %v209_v2, %v213_v4  ;;  %v201_v11 = vld [vmem:[#allocation5 + $0x188] sm:$0xff]  ;;  %s10764_s29 = scalar_lea.vmem %s9213_s8, 64  ;;  %p10769_p4 = scmp.lt.s32.totalorder %s9213_s8, %s9213_s8 }
  0x71   :  { %v204_v7 = vld [vmem:[#allocation5 + $0x1a0] sm:$0xff]  ;;  %v205_v12 = vld [vmem:[#allocation5 + $0x1a8] sm:$0xff]  ;;  %v148_v46 = vcombine.high %v10887_v43, %v10887_v43  ;;  %p10765_p3 = scmp.ne.s32.totalorder %s9213_s8, %s10764_s29  ;;  %p10770_p5 = scmp.lt.s32.totalorder %s10764_s29, %s10764_s29 }
  0x72   :  { %v9274_v10 = vcombine.high %v200_v6, %v204_v7  ;;  %v192_v13 = vld [vmem:[#allocation5 + $0x140] sm:$0xff]  ;;  %774 = vmatprep.subr.bf16.mxu0 %v9282_v3  ;;  %v9276_v14 = vcombine.high %v201_v11, %v205_v12  ;;  %v193_v16 = vld [vmem:[#allocation5 + $0x148] sm:$0xff]  ;;  %815 = vmatprep.subr.bf16.mxu1 %v9284_v8  ;;  %v9273_v18 = vcombine.low %v200_v6, %v204_v7 }
  0x73   :  { %v196_v15 = vld [vmem:[#allocation5 + $0x160] sm:$0xff]  ;;  %v197_v17 = vld [vmem:[#allocation5 + $0x168] sm:$0xff]  ;;  %775 = vmatpush1.bf16.msra.mxu0 %v9281_v5  ;;  %816 = vmatpush1.bf16.msra.mxu1 %v9283_v9  ;;  %v9275_v19 = vcombine.low %v201_v11, %v205_v12  ;;  %v10891_v52 = vpack.c.bf16 %v148_v46, %v148_v46  ;;  %v207_v46 = vld [vmem:[#allocation5 + $0x1b8] sm:$0xff]  ;;  %p10771_p6 = por %p10770_p5, %p10769_p4 }
  0x74   :  { %776 = vmatprep.subr.bf16.mxu0 %v9274_v10  ;;  %v9266_v20 = vcombine.high %v192_v13, %v196_v15  ;;  %817 = vmatprep.subr.bf16.mxu1 %v9276_v14  ;;  %v9268_v21 = vcombine.high %v193_v16, %v197_v17  ;;  %v184_v22 = vld [vmem:[#allocation5 + $0x100] sm:$0xff]  ;;  %v185_v24 = vld [vmem:[#allocation5 + $0x108] sm:$0xff]  ;;  %v9265_v26 = vcombine.low %v192_v13, %v196_v15 }
  0x75   :  { %v188_v23 = vld [vmem:[#allocation5 + $0x120] sm:$0xff]  ;;  %v189_v25 = vld [vmem:[#allocation5 + $0x128] sm:$0xff]  ;;  %v9267_v27 = vcombine.low %v193_v16, %v197_v17  ;;  %9321 = vmatprep.mubr.msk.bf16.mxu0 %vm770_vm0, %v10891_v52  ;;  %9322 = vmatprep.mubr.msk.bf16.mxu1 %vm770_vm0, %v10891_v52  ;;  %p10772_p7 = pnand %p10771_p6, %p10765_p3 }
  0x76   :  { %v9258_v28 = vcombine.high %v184_v22, %v188_v23  ;;  %v9260_v29 = vcombine.high %v185_v24, %v189_v25  ;;  %v176_v30 = vld [vmem:[#allocation5 + $0xc0] sm:$0xff]  ;;  %v177_v32 = vld [vmem:[#allocation5 + $0xc8] sm:$0xff]  ;;  %v9257_v34 = vcombine.low %v184_v22, %v188_v23  ;;  %v9259_v35 = vcombine.low %v185_v24, %v189_v25 }
  0x77   :  { %777 = vmatpush1.bf16.msra.mxu0 %v9273_v18  ;;  %818 = vmatpush1.bf16.msra.mxu1 %v9275_v19  ;;  %v180_v31 = vld [vmem:[#allocation5 + $0xe0] sm:$0xff]  ;;  %v181_v33 = vld [vmem:[#allocation5 + $0xe8] sm:$0xff] }
  0x78   :  { %778 = vmatprep.subr.bf16.mxu0 %v9266_v20  ;;  %819 = vmatprep.subr.bf16.mxu1 %v9268_v21  ;;  %v9250_v36 = vcombine.high %v176_v30, %v180_v31  ;;  %v9252_v37 = vcombine.high %v177_v32, %v181_v33  ;;  %v168_v38 = vld [vmem:[#allocation5 + $0x80] sm:$0xff]  ;;  %v169_v40 = vld [vmem:[#allocation5 + $0x88] sm:$0xff]  ;;  %v9249_v42 = vcombine.low %v176_v30, %v180_v31 }
  0x79   :  { %v172_v39 = vld [vmem:[#allocation5 + $0xa0] sm:$0xff]  ;;  %v173_v41 = vld [vmem:[#allocation5 + $0xa8] sm:$0xff]  ;;  %v9251_v44 = vcombine.low %v177_v32, %v181_v33  ;;  %v210_v33 = vld [vmem:[#allocation5 + $0x1d0] sm:$0xff] }
  0x7a   :  { %v9242_v45 = vcombine.high %v168_v38, %v172_v39  ;;  %v9244_v47 = vcombine.high %v169_v40, %v173_v41  ;;  %v160_v48 = vld [vmem:[#allocation5 + $0x40] sm:$0xff]  ;;  %v161_v50 = vld [vmem:[#allocation5 + $0x48] sm:$0xff]  ;;  %v9241_v53 = vcombine.low %v168_v38, %v172_v39  ;;  %v9243_v54 = vcombine.low %v169_v40, %v173_v41  ;;  %v202_v41 = vld [vmem:[#allocation5 + $0x190] sm:$0xff] }
  0x7b   :  { %779 = vmatpush1.bf16.msra.mxu0 %v9265_v26  ;;  %820 = vmatpush1.bf16.msra.mxu1 %v9267_v27  ;;  %v164_v49 = vld [vmem:[#allocation5 + $0x60] sm:$0xff]  ;;  %v165_v51 = vld [vmem:[#allocation5 + $0x68] sm:$0xff] }
  0x7c   :  { %780 = vmatprep.subr.bf16.mxu0 %v9258_v28  ;;  %821 = vmatprep.subr.bf16.mxu1 %v9260_v29  ;;  %v9234_v55 = vcombine.high %v160_v48, %v164_v49  ;;  %v9236_v56 = vcombine.high %v161_v50, %v165_v51  ;;  %v152_v57 = vld [vmem:[#allocation5] sm:$0xff]  ;;  %v153_v59 = vld [vmem:[#allocation5 + $0x8] sm:$0xff]  ;;  %v9233_v61 = vcombine.low %v160_v48, %v164_v49 }
  0x7d   :  { %v156_v58 = vld [vmem:[#allocation5 + $0x20] sm:$0xff]  ;;  %v157_v60 = vld [vmem:[#allocation5 + $0x28] sm:$0xff]  ;;  %v9235_v62 = vcombine.low %v161_v50, %v165_v51  ;;  %v194_v51 = vld [vmem:[#allocation5 + $0x150] sm:$0xff] }
  0x7e   :  { %v9226_v63 = vcombine.high %v152_v57, %v156_v58  ;;  %v9228_v0 = vcombine.high %v153_v59, %v157_v60  ;;  %v240_v1 = vld [vmem:[#allocation5 + $0x2c0] sm:$0xff]  ;;  %v241_v3 = vld [vmem:[#allocation5 + $0x2c8] sm:$0xff]  ;;  %v9225_v5 = vcombine.low %v152_v57, %v156_v58  ;;  %v9227_v6 = vcombine.low %v153_v59, %v157_v60  ;;  %v190_v57 = vld [vmem:[#allocation5 + $0x130] sm:$0xff] }
  0x7f   :  { %781 = vmatpush1.bf16.msra.mxu0 %v9257_v34  ;;  %822 = vmatpush1.bf16.msra.mxu1 %v9259_v35  ;;  %v244_v2 = vld [vmem:[#allocation5 + $0x2e0] sm:$0xff]  ;;  %v245_v4 = vld [vmem:[#allocation5 + $0x2e8] sm:$0xff]  ;;  %v214_v34 = vld [vmem:[#allocation5 + $0x1f0] sm:$0xff] }
  0x80   :  { %782 = vmatprep.subr.bf16.mxu0 %v9250_v36  ;;  %823 = vmatprep.subr.bf16.mxu1 %v9252_v37  ;;  %v9314_v7 = vcombine.high %v240_v1, %v244_v2  ;;  %v9316_v8 = vcombine.high %v241_v3, %v245_v4  ;;  %v232_v9 = vld [vmem:[#allocation5 + $0x280] sm:$0xff]  ;;  %v233_v11 = vld [vmem:[#allocation5 + $0x288] sm:$0xff]  ;;  %v9313_v13 = vcombine.low %v240_v1, %v244_v2  ;;  %v211_v35 = vld [vmem:[#allocation5 + $0x1d8] sm:$0xff] }
  0x81   :  { %v236_v10 = vld [vmem:[#allocation5 + $0x2a0] sm:$0xff]  ;;  %v237_v12 = vld [vmem:[#allocation5 + $0x2a8] sm:$0xff]  ;;  %v9315_v14 = vcombine.low %v241_v3, %v245_v4  ;;  %v215_v36 = vld [vmem:[#allocation5 + $0x1f8] sm:$0xff]  ;;  %v9286_v39 = vcombine.high %v210_v33, %v214_v34 }
  0x82   :  { %v9306_v15 = vcombine.high %v232_v9, %v236_v10  ;;  %v9308_v16 = vcombine.high %v233_v11, %v237_v12  ;;  %v224_v17 = vld [vmem:[#allocation5 + $0x240] sm:$0xff]  ;;  %v225_v19 = vld [vmem:[#allocation5 + $0x248] sm:$0xff]  ;;  %v9305_v21 = vcombine.low %v232_v9, %v236_v10  ;;  %v9307_v22 = vcombine.low %v233_v11, %v237_v12  ;;  %v187_v60 = vld [vmem:[#allocation5 + $0x118] sm:$0xff] }
  0x83   :  { %783 = vmatpush1.bf16.msra.mxu0 %v9249_v42  ;;  %824 = vmatpush1.bf16.msra.mxu1 %v9251_v44  ;;  %v228_v18 = vld [vmem:[#allocation5 + $0x260] sm:$0xff]  ;;  %v229_v20 = vld [vmem:[#allocation5 + $0x268] sm:$0xff]  ;;  %v9288_v40 = vcombine.high %v211_v35, %v215_v36  ;;  %v206_v42 = vld [vmem:[#allocation5 + $0x1b0] sm:$0xff]  ;;  %v10899_v44 = vpack.c.bf16 %v10887_v43, %v10887_v43  ;;  %v9287_v48 = vcombine.low %v211_v35, %v215_v36 }
  0x84   :  { %784 = vmatprep.subr.bf16.mxu0 %v9242_v45  ;;  %825 = vmatprep.subr.bf16.mxu1 %v9244_v47  ;;  %v9298_v23 = vcombine.high %v224_v17, %v228_v18  ;;  %v9300_v24 = vcombine.high %v225_v19, %v229_v20  ;;  %v216_v25 = vld [vmem:[#allocation5 + $0x200] sm:$0xff]  ;;  %v217_v27 = vld [vmem:[#allocation5 + $0x208] sm:$0xff]  ;;  %v9297_v29 = vcombine.low %v224_v17, %v228_v18  ;;  %v203_v45 = vld [vmem:[#allocation5 + $0x198] sm:$0xff] }
  0x85   :  { %v220_v26 = vld [vmem:[#allocation5 + $0x220] sm:$0xff]  ;;  %v221_v28 = vld [vmem:[#allocation5 + $0x228] sm:$0xff]  ;;  %v9299_v30 = vcombine.low %v225_v19, %v229_v20  ;;  %v9285_v47 = vcombine.low %v210_v33, %v214_v34  ;;  %v9278_v49 = vcombine.high %v202_v41, %v206_v42  ;;  %v9280_v50 = vcombine.high %v203_v45, %v207_v46  ;;  %v182_v1 = vld [vmem:[#allocation5 + $0xf0] sm:$0xff] }
  0x86   :  { %v9290_v31 = vcombine.high %v216_v25, %v220_v26  ;;  %v9292_v32 = vcombine.high %v217_v27, %v221_v28  ;;  %v9289_v37 = vcombine.low %v216_v25, %v220_v26  ;;  %v9291_v38 = vcombine.low %v217_v27, %v221_v28  ;;  %v179_v4 = vld [vmem:[#allocation5 + $0xd8] sm:$0xff]  ;;  %v174_v9 = vld [vmem:[#allocation5 + $0xb0] sm:$0xff] }
  0x87   :  { %785 = vmatpush1.bf16.msra.mxu0 %v9241_v53  ;;  %826 = vmatpush1.bf16.msra.mxu1 %v9243_v54  ;;  %v198_v53 = vld [vmem:[#allocation5 + $0x170] sm:$0xff]  ;;  %v195_v54 = vld [vmem:[#allocation5 + $0x158] sm:$0xff]  ;;  %v9277_v43 = vcombine.low %v202_v41, %v206_v42  ;;  %v9279_v58 = vcombine.low %v203_v45, %v207_v46 }
  0x88   :  { %786 = vmatprep.subr.bf16.mxu0 %v9234_v55  ;;  %827 = vmatprep.subr.bf16.mxu1 %v9236_v56  ;;  %v199_v55 = vld [vmem:[#allocation5 + $0x178] sm:$0xff]  ;;  %v186_v56 = vld [vmem:[#allocation5 + $0x110] sm:$0xff]  ;;  %v9270_v59 = vcombine.high %v194_v51, %v198_v53 }
  0x89   :  { %v9271_v2 = vcombine.low %v195_v54, %v199_v55  ;;  %v9262_v3 = vcombine.high %v186_v56, %v190_v57  ;;  %v171_v11 = vld [vmem:[#allocation5 + $0x98] sm:$0xff] }
  0x8a   :  { %v175_v12 = vld [vmem:[#allocation5 + $0xb8] sm:$0xff] }
  0x8b   :  { %787 = vmatpush1.bf16.msra.mxu0 %v9233_v61  ;;  %828 = vmatpush1.bf16.msra.mxu1 %v9235_v62  ;;  %v191_v61 = vld [vmem:[#allocation5 + $0x138] sm:$0xff]  ;;  %v9272_v62 = vcombine.high %v195_v54, %v199_v55  ;;  %v9247_v25 = vcombine.low %v171_v11, %v175_v12 }
  0x8c   :  { %788 = vmatprep.subr.bf16.mxu0 %v9226_v63  ;;  %829 = vmatprep.subr.bf16.mxu1 %v9228_v0  ;;  %v9269_v63 = vcombine.low %v194_v51, %v198_v53  ;;  %v178_v0 = vld [vmem:[#allocation5 + $0xd0] sm:$0xff]  ;;  %v9263_v10 = vcombine.low %v187_v60, %v191_v61  ;;  %v163_v19 = vld [vmem:[#allocation5 + $0x58] sm:$0xff] }
  0x8d   :  { %v167_v20 = vld [vmem:[#allocation5 + $0x78] sm:$0xff] }
  0x8e   :  { %v155_v27 = vld [vmem:[#allocation5 + $0x18] sm:$0xff]  ;;  %v9239_v33 = vcombine.low %v163_v19, %v167_v20 }
  0x8f   :  { %789 = vmatpush1.bf16.msra.mxu0 %v9225_v5  ;;  %830 = vmatpush1.bf16.msra.mxu1 %v9227_v6  ;;  %v183_v5 = vld [vmem:[#allocation5 + $0xf8] sm:$0xff]  ;;  %v9264_v6 = vcombine.high %v187_v60, %v191_v61 }
  0x90   :  { %798 = vmatprep.subr.bf16.mxu0 %v9314_v7  ;;  %839 = vmatprep.subr.bf16.mxu1 %v9316_v8  ;;  %v9261_v7 = vcombine.low %v186_v56, %v190_v57  ;;  %v170_v8 = vld [vmem:[#allocation5 + $0x90] sm:$0xff]  ;;  %v9255_v17 = vcombine.low %v179_v4, %v183_v5  ;;  %v159_v28 = vld [vmem:[#allocation5 + $0x38] sm:$0xff] }
  0x91   :  { %v9246_v18 = vcombine.high %v170_v8, %v174_v9  ;;  %v243_v35 = vld [vmem:[#allocation5 + $0x2d8] sm:$0xff]  ;;  %v9231_v41 = vcombine.low %v155_v27, %v159_v28  ;;  %v218_v57 = vld [vmem:[#allocation5 + $0x210] sm:$0xff] }
  0x92   :  { %v247_v36 = vld [vmem:[#allocation5 + $0x2f8] sm:$0xff] }
  0x93   :  { %799 = vmatpush2.bf16.msra.mxu0 %v9313_v13  ;;  %840 = vmatpush2.bf16.msra.mxu1 %v9315_v14  ;;  %v9256_v13 = vcombine.high %v179_v4, %v183_v5  ;;  %v9253_v14 = vcombine.low %v178_v0, %v182_v1  ;;  %v235_v45 = vld [vmem:[#allocation5 + $0x298] sm:$0xff]  ;;  %v9319_v51 = vcombine.low %v243_v35, %v247_v36  ;;  %v1138_v5 = vld [vmem:[#allocation8 + $0x5c0] sm:$0xff] }
  0x94   :  { %800 = vmatprep.subr.bf16.mxu0 %v9306_v15  ;;  %841 = vmatprep.subr.bf16.mxu1 %v9308_v16  ;;  %v162_v15 = vld [vmem:[#allocation5 + $0x50] sm:$0xff]  ;;  %v239_v46 = vld [vmem:[#allocation5 + $0x2b8] sm:$0xff] }
  0x95   :  { %v166_v16 = vld [vmem:[#allocation5 + $0x70] sm:$0xff]  ;;  %v227_v54 = vld [vmem:[#allocation5 + $0x258] sm:$0xff] }
  0x96   :  { %v9238_v26 = vcombine.high %v162_v15, %v166_v16  ;;  %v231_v55 = vld [vmem:[#allocation5 + $0x278] sm:$0xff] }
  0x97   :  { %801 = vmatpush2.bf16.msra.mxu0 %v9305_v21  ;;  %842 = vmatpush2.bf16.msra.mxu1 %v9307_v22  ;;  %v9248_v21 = vcombine.high %v171_v11, %v175_v12  ;;  %v9245_v22 = vcombine.low %v170_v8, %v174_v9  ;;  %v219_v61 = vld [vmem:[#allocation5 + $0x218] sm:$0xff]  ;;  %v1002_v11 = vld [vmem:[#allocation8 + $0x180] sm:$0xff] }
  0x98   :  { %802 = vmatprep.subr.bf16.mxu0 %v9298_v23  ;;  %843 = vmatprep.subr.bf16.mxu1 %v9300_v24  ;;  %v154_v23 = vld [vmem:[#allocation5 + $0x10] sm:$0xff]  ;;  %v1006_v12 = vld [vmem:[#allocation8 + $0x1a0] sm:$0xff] }
  0x99   :  { %v158_v24 = vld [vmem:[#allocation5 + $0x30] sm:$0xff] }
  0x9a   :  { %v9230_v34 = vcombine.high %v154_v23, %v158_v24 }
  0x9b   :  { %803 = vmatpush2.bf16.msra.mxu0 %v9297_v29  ;;  %844 = vmatpush2.bf16.msra.mxu1 %v9299_v30  ;;  %v9240_v29 = vcombine.high %v163_v19, %v167_v20  ;;  %v9237_v30 = vcombine.low %v162_v15, %v166_v16  ;;  %v994_v19 = vld [vmem:[#allocation8 + $0x140] sm:$0xff] }
  0x9c   :  { %804 = vmatprep.subr.bf16.mxu0 %v9290_v31  ;;  %845 = vmatprep.subr.bf16.mxu1 %v9292_v32  ;;  %v242_v31 = vld [vmem:[#allocation5 + $0x2d0] sm:$0xff]  ;;  %v998_v20 = vld [vmem:[#allocation8 + $0x160] sm:$0xff] }
  0x9d   :  { %v246_v32 = vld [vmem:[#allocation5 + $0x2f0] sm:$0xff] }
  0x9e   :  { %v9318_v42 = vcombine.high %v242_v31, %v246_v32 }
  0x9f   :  { %805 = vmatpush2.bf16.msra.mxu0 %v9289_v37  ;;  %846 = vmatpush2.bf16.msra.mxu1 %v9291_v38  ;;  %v9232_v37 = vcombine.high %v155_v27, %v159_v28  ;;  %v9229_v38 = vcombine.low %v154_v23, %v158_v24  ;;  %v9373_v23 = vcombine.low %v1002_v11, %v1006_v12  ;;  %v986_v27 = vld [vmem:[#allocation8 + $0x100] sm:$0xff] }
  0xa0   :  { %856 = vmatprep.subr.bf16.mxu0 %v9286_v39  ;;  %897 = vmatprep.subr.bf16.mxu1 %v9288_v40  ;;  %v234_v39 = vld [vmem:[#allocation5 + $0x290] sm:$0xff]  ;;  %v990_v28 = vld [vmem:[#allocation8 + $0x120] sm:$0xff] }
  0xa1   :  { %v238_v40 = vld [vmem:[#allocation5 + $0x2b0] sm:$0xff] }
  0xa2   :  { %807 = vmatmul.mubr.bf16.vlgmr.msra.gmra.mxu0 %v10899_v44  ;;  %848 = vmatmul.mubr.bf16.vlgmr.msra.gmra.mxu1 %v10899_v44  ;;  %v9310_v53 = vcombine.high %v234_v39, %v238_v40  ;;  %v9309_v56 = vcombine.low %v234_v39, %v238_v40 }
  0xa3   :  { %857 = vmatpush1.bf16.msra.mxu0 %v9285_v47  ;;  %898 = vmatpush1.bf16.msra.mxu1 %v9287_v48  ;;  %v9320_v47 = vcombine.high %v243_v35, %v247_v36  ;;  %v9317_v48 = vcombine.low %v242_v31, %v246_v32  ;;  %v9365_v31 = vcombine.low %v994_v19, %v998_v20  ;;  %v982_v35 = vld [vmem:[#allocation8 + $0xe0] sm:$0xff] }
  0xa4   :  { %858 = vmatprep.subr.bf16.mxu0 %v9278_v49  ;;  %899 = vmatprep.subr.bf16.mxu1 %v9280_v50  ;;  %v226_v49 = vld [vmem:[#allocation5 + $0x250] sm:$0xff]  ;;  %v1106_v36 = vld [vmem:[#allocation8 + $0x4c0] sm:$0xff] }
  0xa5   :  { %9323 = vmatprep.mubr.msk.bf16.mxu0 %vm770_vm0, %v10891_v52  ;;  %9324 = vmatprep.mubr.msk.bf16.mxu1 %vm770_vm0, %v10891_v52  ;;  %v9254_v52 = vcombine.high %v178_v0, %v182_v1  ;;  %v230_v50 = vld [vmem:[#allocation5 + $0x270] sm:$0xff]  ;;  %v1010_v1 = vld [vmem:[#allocation8 + $0x1c0] sm:$0xff] }
  0xa6   :  { %v9302_v60 = vcombine.high %v226_v49, %v230_v50  ;;  %v9301_v0 = vcombine.low %v226_v49, %v230_v50 }
  0xa7   :  { %859 = vmatpush1.bf16.msra.mxu0 %v9277_v43  ;;  %900 = vmatpush1.bf16.msra.mxu1 %v9279_v58  ;;  %v9312_v43 = vcombine.high %v235_v45, %v239_v46  ;;  %v222_v58 = vld [vmem:[#allocation5 + $0x230] sm:$0xff] }
  0xa8   :  { %860 = vmatprep.subr.bf16.mxu0 %v9270_v59  ;;  %901 = vmatprep.subr.bf16.mxu1 %v9272_v62  ;;  %v9311_v59 = vcombine.low %v235_v45, %v239_v46  ;;  %v223_v62 = vld [vmem:[#allocation5 + $0x238] sm:$0xff]  ;;  %v9294_v4 = vcombine.high %v218_v57, %v222_v58  ;;  %v9293_v8 = vcombine.low %v218_v57, %v222_v58  ;;  %v974_v45 = vld [vmem:[#allocation8 + $0xa0] sm:$0xff] }
  0xa9   :  { %v9295_v9 = vcombine.low %v219_v61, %v223_v62  ;;  %v1098_v46 = vld [vmem:[#allocation8 + $0x480] sm:$0xff] }
  0xab   :  { %861 = vmatpush1.bf16.msra.mxu0 %v9269_v63  ;;  %902 = vmatpush1.bf16.msra.mxu1 %v9271_v2  ;;  %v9304_v63 = vcombine.high %v227_v54, %v231_v55  ;;  %v1014_v2 = vld [vmem:[#allocation8 + $0x1e0] sm:$0xff] }
  0xac   :  { %862 = vmatprep.subr.bf16.mxu0 %v9262_v3  ;;  %903 = vmatprep.subr.bf16.mxu1 %v9264_v6  ;;  %v9303_v3 = vcombine.low %v227_v54, %v231_v55  ;;  %v1142_v6 = vld [vmem:[#allocation8 + $0x5e0] sm:$0xff]  ;;  %v9381_v15 = vcombine.low %v1010_v1, %v1014_v2 }
  0xad   :  { %v9509_v16 = vcombine.low %v1138_v5, %v1142_v6  ;;  %v966_v54 = vld [vmem:[#allocation8 + $0x60] sm:$0xff] }
  0xae   :  { %v1090_v55 = vld [vmem:[#allocation8 + $0x440] sm:$0xff] }
  0xaf   :  { %863 = vmatpush1.bf16.msra.mxu0 %v9261_v7  ;;  %904 = vmatpush1.bf16.msra.mxu1 %v9263_v10  ;;  %v9296_v7 = vcombine.high %v219_v61, %v223_v62  ;;  %v9382_v10 = vcombine.high %v1010_v1, %v1014_v2  ;;  %v958_v61 = vld [vmem:[#allocation8 + $0x20] sm:$0xff] }
  0xb0   :  { %864 = vmatprep.subr.bf16.mxu0 %v9254_v52  ;;  %905 = vmatprep.subr.bf16.mxu1 %v9256_v13  ;;  %v9510_v52 = vcombine.high %v1138_v5, %v1142_v6  ;;  %v1130_v13 = vld [vmem:[#allocation8 + $0x580] sm:$0xff] }
  0xb1   :  { %v1082_v62 = vld [vmem:[#allocation8 + $0x400] sm:$0xff] }
  0xb2   :  { %v10909_v6 = vld [vmem:[#allocation8 + $0x9c0] sm:$0xff] }
  0xb3   :  { %865 = vmatpush1.bf16.msra.mxu0 %v9253_v14  ;;  %906 = vmatpush1.bf16.msra.mxu1 %v9255_v17  ;;  %v1134_v14 = vld [vmem:[#allocation8 + $0x5a0] sm:$0xff]  ;;  %v9374_v17 = vcombine.high %v1002_v11, %v1006_v12 }
  0xb4   :  { %866 = vmatprep.subr.bf16.mxu0 %v9246_v18  ;;  %907 = vmatprep.subr.bf16.mxu1 %v9248_v21  ;;  %v9502_v18 = vcombine.high %v1130_v13, %v1134_v14  ;;  %v1122_v21 = vld [vmem:[#allocation8 + $0x540] sm:$0xff]  ;;  %v9501_v24 = vcombine.low %v1130_v13, %v1134_v14 }
  0xb7   :  { %867 = vmatpush1.bf16.msra.mxu0 %v9245_v22  ;;  %908 = vmatpush1.bf16.msra.mxu1 %v9247_v25  ;;  %v1126_v22 = vld [vmem:[#allocation8 + $0x560] sm:$0xff]  ;;  %v9366_v25 = vcombine.high %v994_v19, %v998_v20 }
  0xb8   :  { %868 = vmatprep.subr.bf16.mxu0 %v9238_v26  ;;  %909 = vmatprep.subr.bf16.mxu1 %v9240_v29  ;;  %v9494_v26 = vcombine.high %v1122_v21, %v1126_v22  ;;  %v1114_v29 = vld [vmem:[#allocation8 + $0x500] sm:$0xff]  ;;  %v9493_v32 = vcombine.low %v1122_v21, %v1126_v22 }
  0xb9   :  { %v1194_v19 = vld [vmem:[#allocation8 + $0x780] sm:$0xff] }
  0xba   :  { %v1198_v20 = vld [vmem:[#allocation8 + $0x7a0] sm:$0xff] }
  0xbb   :  { %869 = vmatpush1.bf16.msra.mxu0 %v9237_v30  ;;  %910 = vmatpush1.bf16.msra.mxu1 %v9239_v33  ;;  %v1118_v30 = vld [vmem:[#allocation8 + $0x520] sm:$0xff]  ;;  %v9358_v33 = vcombine.high %v986_v27, %v990_v28 }
  0xbc   :  { %870 = vmatprep.subr.bf16.mxu0 %v9230_v34  ;;  %911 = vmatprep.subr.bf16.mxu1 %v9232_v37  ;;  %v978_v34 = vld [vmem:[#allocation8 + $0xc0] sm:$0xff]  ;;  %v9485_v39 = vcombine.low %v1114_v29, %v1118_v30 }
  0xbd   :  { %v1110_v37 = vld [vmem:[#allocation8 + $0x4e0] sm:$0xff]  ;;  %v9350_v40 = vcombine.high %v978_v34, %v982_v35 }
  0xbe   :  { %v9477_v49 = vcombine.low %v1106_v36, %v1110_v37 }
  0xbf   :  { %871 = vmatpush1.bf16.msra.mxu0 %v9229_v38  ;;  %912 = vmatpush1.bf16.msra.mxu1 %v9231_v41  ;;  %v9357_v38 = vcombine.low %v986_v27, %v990_v28  ;;  %v9478_v41 = vcombine.high %v1106_v36, %v1110_v37  ;;  %v1186_v27 = vld [vmem:[#allocation8 + $0x740] sm:$0xff] }
  0xc0   :  { %880 = vmatprep.subr.bf16.mxu0 %v9318_v42  ;;  %921 = vmatprep.subr.bf16.mxu1 %v9320_v47  ;;  %v970_v42 = vld [vmem:[#allocation8 + $0x80] sm:$0xff] }
  0xc1   :  { %v1102_v47 = vld [vmem:[#allocation8 + $0x4a0] sm:$0xff]  ;;  %v9342_v50 = vcombine.high %v970_v42, %v974_v45 }
  0xc2   :  { %v9469_v57 = vcombine.low %v1098_v46, %v1102_v47  ;;  %v1190_v28 = vld [vmem:[#allocation8 + $0x760] sm:$0xff] }
  0xc3   :  { %881 = vmatpush2.bf16.msra.mxu0 %v9317_v48  ;;  %922 = vmatpush2.bf16.msra.mxu1 %v9319_v51  ;;  %v9349_v48 = vcombine.low %v978_v34, %v982_v35  ;;  %v9470_v51 = vcombine.high %v1098_v46, %v1102_v47  ;;  %v1178_v34 = vld [vmem:[#allocation8 + $0x700] sm:$0xff]  ;;  %v9557_v37 = vcombine.low %v1186_v27, %v1190_v28 }
  0xc4   :  { %882 = vmatprep.subr.bf16.mxu0 %v9310_v53  ;;  %923 = vmatprep.subr.bf16.mxu1 %v9312_v43  ;;  %v962_v53 = vld [vmem:[#allocation8 + $0x40] sm:$0xff] }
  0xc5   :  { %v1094_v43 = vld [vmem:[#allocation8 + $0x460] sm:$0xff]  ;;  %v9334_v58 = vcombine.high %v962_v53, %v966_v54 }
  0xc6   :  { %v9461_v1 = vcombine.low %v1090_v55, %v1094_v43  ;;  %v1182_v35 = vld [vmem:[#allocation8 + $0x720] sm:$0xff] }
  0xc7   :  { %883 = vmatpush2.bf16.msra.mxu0 %v9309_v56  ;;  %924 = vmatpush2.bf16.msra.mxu1 %v9311_v59  ;;  %v9341_v56 = vcombine.low %v970_v42, %v974_v45  ;;  %v9462_v59 = vcombine.high %v1090_v55, %v1094_v43  ;;  %v1170_v42 = vld [vmem:[#allocation8 + $0x6c0] sm:$0xff]  ;;  %v9549_v47 = vcombine.low %v1178_v34, %v1182_v35 }
  0xc8   :  { %884 = vmatprep.subr.bf16.mxu0 %v9302_v60  ;;  %925 = vmatprep.subr.bf16.mxu1 %v9304_v63  ;;  %v954_v60 = vld [vmem:[#allocation8] sm:$0xff] }
  0xc9   :  { %v1086_v63 = vld [vmem:[#allocation8 + $0x420] sm:$0xff]  ;;  %v9326_v2 = vcombine.high %v954_v60, %v958_v61  ;;  %v9325_v11 = vcombine.low %v954_v60, %v958_v61 }
  0xca   :  { %v9454_v5 = vcombine.high %v1082_v62, %v1086_v63  ;;  %v9453_v14 = vcombine.low %v1082_v62, %v1086_v63  ;;  %v1174_v45 = vld [vmem:[#allocation8 + $0x6e0] sm:$0xff] }
  0xcb   :  { %885 = vmatpush2.bf16.msra.mxu0 %v9301_v0  ;;  %926 = vmatpush2.bf16.msra.mxu1 %v9303_v3  ;;  %v9333_v0 = vcombine.low %v962_v53, %v966_v54  ;;  %v1074_v3 = vld [vmem:[#allocation8 + $0x3c0] sm:$0xff]  ;;  %v9541_v43 = vcombine.low %v1170_v42, %v1174_v45 }
  0xcc   :  { %886 = vmatprep.subr.bf16.mxu0 %v9294_v4  ;;  %927 = vmatprep.subr.bf16.mxu1 %v9296_v7  ;;  %v1078_v4 = vld [vmem:[#allocation8 + $0x3e0] sm:$0xff] }
  0xcd   :  { %v10911_v7 = vld [vmem:[#allocation8 + $0x9e0] sm:$0xff]  ;;  %v9445_v21 = vcombine.low %v1074_v3, %v1078_v4 }
  0xce   :  { %v9637_v12 = vcombine.low %v10909_v6, %v10911_v7  ;;  %v1162_v53 = vld [vmem:[#allocation8 + $0x680] sm:$0xff] }
  0xcf   :  { %887 = vmatpush2.bf16.msra.mxu0 %v9293_v8  ;;  %928 = vmatpush2.bf16.msra.mxu1 %v9295_v9  ;;  %v10913_v8 = vld [vmem:[#allocation8 + $0xdc0] sm:$0xff] }
  0xd0   :  { %4068 = vmatprep.subr.bf16.mxu0 %v9382_v10  ;;  %4109 = vmatprep.subr.bf16.mxu1 %v9510_v52  ;;  %v1202_v9 = vld [vmem:[#allocation8 + $0x7c0] sm:$0xff] }
  0xd1   :  { %v1206_v10 = vld [vmem:[#allocation8 + $0x7e0] sm:$0xff] }
  0xd2   :  { %889 = vmatmul.mubr.bf16.vlgmr.msra.gmra.mxu0 %v10899_v44  ;;  %930 = vmatmul.mubr.bf16.vlgmr.msra.gmra.mxu1 %v10899_v44  ;;  %v9486_v44 = vcombine.high %v1114_v29, %v1118_v30  ;;  %v10915_v52 = vld [vmem:[#allocation8 + $0xde0] sm:$0xff]  ;;  %v9573_v22 = vcombine.low %v1202_v9, %v1206_v10  ;;  %v9565_v30 = vcombine.low %v1194_v19, %v1198_v20 }
  0xd3   :  { %4069 = vmatpush1.bf16.msra.mxu0 %v9381_v15  ;;  %4110 = vmatpush1.bf16.msra.mxu1 %v9509_v16  ;;  %v9765_v13 = vcombine.low %v10913_v8, %v10915_v52  ;;  %v9446_v15 = vcombine.high %v1074_v3, %v1078_v4  ;;  %v9574_v16 = vcombine.high %v1202_v9, %v1206_v10  ;;  %v1166_v54 = vld [vmem:[#allocation8 + $0x6a0] sm:$0xff] }
  0xd4   :  { %4070 = vmatprep.subr.bf16.mxu0 %v9374_v17  ;;  %4111 = vmatprep.subr.bf16.mxu1 %v9502_v18  ;;  %v1066_v17 = vld [vmem:[#allocation8 + $0x380] sm:$0xff]  ;;  %v9533_v63 = vcombine.low %v1162_v53, %v1166_v54 }
  0xd5   :  { %v1070_v18 = vld [vmem:[#allocation8 + $0x3a0] sm:$0xff] }
  0xd6   :  { %v9437_v29 = vcombine.low %v1066_v17, %v1070_v18  ;;  %v1154_v60 = vld [vmem:[#allocation8 + $0x640] sm:$0xff] }
  0xd7   :  { %4071 = vmatpush1.bf16.msra.mxu0 %v9373_v23  ;;  %4112 = vmatpush1.bf16.msra.mxu1 %v9501_v24  ;;  %v9438_v23 = vcombine.high %v1066_v17, %v1070_v18  ;;  %v9566_v24 = vcombine.high %v1194_v19, %v1198_v20  ;;  %v1158_v61 = vld [vmem:[#allocation8 + $0x660] sm:$0xff]  ;;  %v9638_v17 = vcombine.high %v10909_v6, %v10911_v7  ;;  %v250_v19 = vlaneseq }
  0xd8   :  { %4072 = vmatprep.subr.bf16.mxu0 %v9366_v25  ;;  %4113 = vmatprep.subr.bf16.mxu1 %v9494_v26  ;;  %v1058_v25 = vld [vmem:[#allocation8 + $0x340] sm:$0xff]  ;;  %v9525_v10 = vcombine.low %v1154_v60, %v1158_v61  ;;  %v9766_v18 = vcombine.high %v10913_v8, %v10915_v52 }
  0xd9   :  { %v1062_v26 = vld [vmem:[#allocation8 + $0x360] sm:$0xff]  ;;  %v10925_v20 = vshrl.u32 %v250_v19, 7 }
  0xda   :  { %v9429_v36 = vcombine.low %v1058_v25, %v1062_v26  ;;  %v1022_v3 = vld [vmem:[#allocation8 + $0x220] sm:$0xff] }
  0xdb   :  { %4073 = vmatpush1.bf16.msra.mxu0 %v9365_v31  ;;  %4114 = vmatpush1.bf16.msra.mxu1 %v9493_v32  ;;  %v9430_v31 = vcombine.high %v1058_v25, %v1062_v26  ;;  %v9558_v32 = vcombine.high %v1186_v27, %v1190_v28  ;;  %v1146_v4 = vld [vmem:[#allocation8 + $0x600] sm:$0xff]  ;;  %v10939_v25 = vsub.s32 3, %v10925_v20 }
  0xdc   :  { %4074 = vmatprep.subr.bf16.mxu0 %v9358_v33  ;;  %4115 = vmatprep.subr.bf16.mxu1 %v9486_v44  ;;  %v1050_v33 = vld [vmem:[#allocation8 + $0x300] sm:$0xff] }
  0xdd   :  { %v1054_v44 = vld [vmem:[#allocation8 + $0x320] sm:$0xff] }
  0xde   :  { %v9421_v46 = vcombine.low %v1050_v33, %v1054_v44  ;;  %v1238_v8 = vld [vmem:[#allocation8 + $0x8e0] sm:$0xff] }
  0xdf   :  { %4075 = vmatpush1.bf16.msra.mxu0 %v9357_v38  ;;  %4116 = vmatpush1.bf16.msra.mxu1 %v9485_v39  ;;  %v9422_v38 = vcombine.high %v1050_v33, %v1054_v44  ;;  %v9550_v39 = vcombine.high %v1178_v34, %v1182_v35  ;;  %v1362_v52 = vld [vmem:[#allocation8 + $0xcc0] sm:$0xff] }
  0xe0   :  { %4076 = vmatprep.subr.bf16.mxu0 %v9350_v40  ;;  %4117 = vmatprep.subr.bf16.mxu1 %v9478_v41  ;;  %v1042_v40 = vld [vmem:[#allocation8 + $0x2c0] sm:$0xff] }
  0xe1   :  { %v1046_v41 = vld [vmem:[#allocation8 + $0x2e0] sm:$0xff] }
  0xe2   :  { %v9413_v55 = vcombine.low %v1042_v40, %v1046_v41  ;;  %v1358_v19 = vld [vmem:[#allocation8 + $0xca0] sm:$0xff] }
  0xe3   :  { %4077 = vmatpush1.bf16.msra.mxu0 %v9349_v48  ;;  %4118 = vmatpush1.bf16.msra.mxu1 %v9477_v49  ;;  %v9414_v48 = vcombine.high %v1042_v40, %v1046_v41  ;;  %v9542_v49 = vcombine.high %v1170_v42, %v1174_v45  ;;  %v1258_v42 = vld [vmem:[#allocation8 + $0x980] sm:$0xff] }
  0xe4   :  { %4078 = vmatprep.subr.bf16.mxu0 %v9342_v50  ;;  %4119 = vmatprep.subr.bf16.mxu1 %v9470_v51  ;;  %v1034_v50 = vld [vmem:[#allocation8 + $0x280] sm:$0xff] }
  0xe5   :  { %v1038_v51 = vld [vmem:[#allocation8 + $0x2a0] sm:$0xff] }
  0xe6   :  { %v9405_v62 = vcombine.low %v1034_v50, %v1038_v51  ;;  %v1262_v45 = vld [vmem:[#allocation8 + $0x9a0] sm:$0xff] }
  0xe7   :  { %4079 = vmatpush1.bf16.msra.mxu0 %v9341_v56  ;;  %4120 = vmatpush1.bf16.msra.mxu1 %v9469_v57  ;;  %v9406_v56 = vcombine.high %v1034_v50, %v1038_v51  ;;  %v9534_v57 = vcombine.high %v1162_v53, %v1166_v54 }
  0xe8   :  { %4080 = vmatprep.subr.bf16.mxu0 %v9334_v58  ;;  %4121 = vmatprep.subr.bf16.mxu1 %v9462_v59  ;;  %v1026_v58 = vld [vmem:[#allocation8 + $0x240] sm:$0xff] }
  0xe9   :  { %v1030_v59 = vld [vmem:[#allocation8 + $0x260] sm:$0xff] }
  0xea   :  { %v9397_v9 = vcombine.low %v1026_v58, %v1030_v59 }
  0xeb   :  { %4081 = vmatpush1.bf16.msra.mxu0 %v9333_v0  ;;  %4122 = vmatpush1.bf16.msra.mxu1 %v9461_v1  ;;  %v9398_v0 = vcombine.high %v1026_v58, %v1030_v59  ;;  %v9526_v1 = vcombine.high %v1154_v60, %v1158_v61  ;;  %v1254_v58 = vld [vmem:[#allocation8 + $0x960] sm:$0xff]  ;;  %v9629_v61 = vcombine.low %v1258_v42, %v1262_v45 }
  0xec   :  { %4082 = vmatprep.subr.bf16.mxu0 %v9326_v2  ;;  %4123 = vmatprep.subr.bf16.mxu1 %v9454_v5  ;;  %v1018_v2 = vld [vmem:[#allocation8 + $0x200] sm:$0xff] }
  0xed   :  { %v1150_v5 = vld [vmem:[#allocation8 + $0x620] sm:$0xff] }
  0xee   :  { %v1378_v59 = vld [vmem:[#allocation8 + $0xd40] sm:$0xff] }
  0xef   :  { %4083 = vmatpush1.bf16.msra.mxu0 %v9325_v11  ;;  %4124 = vmatpush1.bf16.msra.mxu1 %v9453_v14  ;;  %v9390_v11 = vcombine.high %v1018_v2, %v1022_v3  ;;  %v9518_v14 = vcombine.high %v1146_v4, %v1150_v5  ;;  %v1382_v60 = vld [vmem:[#allocation8 + $0xd60] sm:$0xff] }
  0xf0   :  { %4084 = vmatprep.subr.bf16.mxu0 %v9446_v15  ;;  %4125 = vmatprep.subr.bf16.mxu1 %v9574_v16  ;;  %v9389_v15 = vcombine.low %v1018_v2, %v1022_v3  ;;  %v9517_v16 = vcombine.low %v1146_v4, %v1150_v5  ;;  %v1246_v2 = vld [vmem:[#allocation8 + $0x920] sm:$0xff]  ;;  %v9749_v6 = vcombine.low %v1378_v59, %v1382_v60 }
  0xf1   :  { %v1370_v3 = vld [vmem:[#allocation8 + $0xd00] sm:$0xff] }
  0xf2   :  { %v1374_v4 = vld [vmem:[#allocation8 + $0xd20] sm:$0xff] }
  0xf3   :  { %4085 = vmatpush2.bf16.msra.mxu0 %v9445_v21  ;;  %4126 = vmatpush2.bf16.msra.mxu1 %v9573_v22  ;;  %v10928_v21 = vsub.s32 0, %v10925_v20  ;;  %v10930_v22 = vld [vmem:[#allocation7] sm:$0xff] }
  0xf4   :  { %4086 = vmatprep.subr.bf16.mxu0 %v9438_v23  ;;  %4127 = vmatprep.subr.bf16.mxu1 %v9566_v24  ;;  %v10933_v23 = vsub.s32 2, %v10925_v20  ;;  %v10936_v24 = vsub.s32 1, %v10925_v20 }
  0xf5   :  { %v253_v26 = vrot.slane %v10930_v22, %v10928_v21 }
  0xf6   :  { %v261_v27 = vrot.slane %v10930_v22, %v10933_v23  ;;  %v257_v28 = vrot.slane %v10930_v22, %v10936_v24 }
  0xf7   :  { %4087 = vmatpush2.bf16.msra.mxu0 %v9437_v29  ;;  %4128 = vmatpush2.bf16.msra.mxu1 %v9565_v30  ;;  %v265_v30 = vrot.slane %v10930_v22, %v10939_v25 }
  0xf8   :  { %4088 = vmatprep.subr.bf16.mxu0 %v9430_v31  ;;  %4129 = vmatprep.subr.bf16.mxu1 %v9558_v32 }
  0xfb   :  { %4089 = vmatpush2.bf16.msra.mxu0 %v9429_v36  ;;  %4130 = vmatpush2.bf16.msra.mxu1 %v9557_v37 }
  0xfc   :  { %4090 = vmatprep.subr.bf16.mxu0 %v9422_v38  ;;  %4131 = vmatprep.subr.bf16.mxu1 %v9550_v39 }
  0xff   :  { %4091 = vmatpush2.bf16.msra.mxu0 %v9421_v46  ;;  %4132 = vmatpush2.bf16.msra.mxu1 %v9549_v47 }
 0x100   :  { %4092 = vmatprep.subr.bf16.mxu0 %v9414_v48  ;;  %4133 = vmatprep.subr.bf16.mxu1 %v9542_v49  ;;  %v1386_v48 = vld [vmem:[#allocation8 + $0xd80] sm:$0xff] }
 0x101   :  { %v1390_v49 = vld [vmem:[#allocation8 + $0xda0] sm:$0xff] }
 0x103   :  { %4093 = vmatpush2.bf16.msra.mxu0 %v9413_v55  ;;  %4134 = vmatpush2.bf16.msra.mxu1 %v9541_v43  ;;  %v9630_v43 = vcombine.high %v1258_v42, %v1262_v45 }
 0x104   :  { %4094 = vmatprep.subr.bf16.mxu0 %v9406_v56  ;;  %4135 = vmatprep.subr.bf16.mxu1 %v9534_v57  ;;  %v9758_v56 = vcombine.high %v1386_v48, %v1390_v49  ;;  %v1250_v57 = vld [vmem:[#allocation8 + $0x940] sm:$0xff] }
 0x105   :  { %v9621_v5 = vcombine.low %v1250_v57, %v1254_v58 }
 0x107   :  { %4095 = vmatpush2.bf16.msra.mxu0 %v9405_v62  ;;  %4136 = vmatpush2.bf16.msra.mxu1 %v9533_v63  ;;  %v9757_v62 = vcombine.low %v1386_v48, %v1390_v49  ;;  %v9622_v63 = vcombine.high %v1250_v57, %v1254_v58  ;;  %v1334_v48 = vld [vmem:[#allocation8 + $0xbe0] sm:$0xff] }
 0x108   :  { %4096 = vmatprep.subr.bf16.mxu0 %v9398_v0  ;;  %4137 = vmatprep.subr.bf16.mxu1 %v9526_v1  ;;  %v9750_v0 = vcombine.high %v1378_v59, %v1382_v60  ;;  %v1242_v1 = vld [vmem:[#allocation8 + $0x900] sm:$0xff] }
 0x109   :  { %v9614_v7 = vcombine.high %v1242_v1, %v1246_v2  ;;  %v1458_v49 = vld [vmem:[#allocation8 + $0xfc0] sm:$0xff] }
 0x10a   :  { %v1322_v59 = vld [vmem:[#allocation8 + $0xb80] sm:$0xff] }
 0x10b   :  { %4097 = vmatpush2.bf16.msra.mxu0 %v9397_v9  ;;  %4138 = vmatpush2.bf16.msra.mxu1 %v9525_v10  ;;  %v1234_v9 = vld [vmem:[#allocation8 + $0x8c0] sm:$0xff]  ;;  %v9613_v10 = vcombine.low %v1242_v1, %v1246_v2 }
 0x10c   :  { %4098 = vmatprep.subr.bf16.mxu0 %v9390_v11  ;;  %4139 = vmatprep.subr.bf16.mxu1 %v9518_v14  ;;  %v9741_v11 = vcombine.low %v1370_v3, %v1374_v4  ;;  %v9606_v14 = vcombine.high %v1234_v9, %v1238_v8  ;;  %v1326_v60 = vld [vmem:[#allocation8 + $0xba0] sm:$0xff] }
 0x10d   :  { %v9694_v1 = vcombine.high %v1322_v59, %v1326_v60 }
 0x10f   :  { %4099 = vmatpush2.bf16.msra.mxu0 %v9389_v15  ;;  %4140 = vmatpush2.bf16.msra.mxu1 %v9517_v16  ;;  %v1226_v16 = vld [vmem:[#allocation8 + $0x880] sm:$0xff] }
 0x110   :  { %4150 = vmatprep.subr.bf16.mxu0 %v9638_v17  ;;  %4191 = vmatprep.subr.bf16.mxu1 %v9766_v18  ;;  %v1230_v17 = vld [vmem:[#allocation8 + $0x8a0] sm:$0xff] }
 0x111   :  { %v1354_v18 = vld [vmem:[#allocation8 + $0xc80] sm:$0xff] }
 0x162   :  { %v808_v29 = vpop.f32.mrf.mxu0  ;;  %v849_v32 = vpop.f32.mrf.mxu1 }
 0x163   :  { %v809_v31 = vadd.f32 %v808_v29, %v253_v26  ;;  %v850_v33 = vadd.f32 %v849_v32, %v261_v27  ;;  %v9605_v26 = vcombine.low %v1234_v9, %v1238_v8  ;;  %v9726_v29 = vcombine.high %v1354_v18, %v1358_v19  ;;  %v1346_v32 = vld [vmem:[#allocation8 + $0xc40] sm:$0xff] }
 0x164   :  { %v810_v44 = vpop.f32.mrf.mxu0  ;;  %v851_v35 = vpop.f32.mrf.mxu1 }
 0x165   :  { %v811_v34 = vadd.f32 %v810_v44, %v257_v28  ;;  %v938_v36 = vmax.f32 %v809_v31, 0.0  ;;  %v940_v37 = vmax.f32 %v850_v33, 0.0  ;;  %v852_v38 = vadd.f32 %v851_v35, %v265_v30  ;;  %v1218_v30 = vld [vmem:[#allocation8 + $0x840] sm:$0xff] }
 0x166   :  { %v812_v39 = vpop.f32.mrf.mxu0  ;;  %v853_v41 = vpop.f32.mrf.mxu1  ;;  %v9598_v28 = vcombine.high %v1226_v16, %v1230_v17  ;;  %v1222_v31 = vld [vmem:[#allocation8 + $0x860] sm:$0xff]  ;;  %v9597_v44 = vcombine.low %v1226_v16, %v1230_v17 }
 0x167   :  { %v939_v40 = vmax.f32 %v811_v34, 0.0  ;;  %v941_v46 = vmax.f32 %v852_v38, 0.0  ;;  %v10949_v50 = vpack.c.bf16 %v940_v37, %v940_v37  ;;  %v10953_v54 = vpack.c.bf16 %v938_v36, %v938_v36  ;;  %v1350_v33 = vld [vmem:[#allocation8 + $0xc60] sm:$0xff] }
 0x168   :  { %v813_v47 = vpop.f32.mrf.mxu0  ;;  %v854_v53 = vpop.f32.mrf.mxu1  ;;  %v9725_v34 = vcombine.low %v1354_v18, %v1358_v19  ;;  %v9590_v35 = vcombine.high %v1218_v30, %v1222_v31  ;;  %v9718_v36 = vcombine.high %v1346_v32, %v1350_v33  ;;  %v1210_v37 = vld [vmem:[#allocation8 + $0x800] sm:$0xff]  ;;  %v9589_v41 = vcombine.low %v1218_v30, %v1222_v31 }
 0x169   :  { %v10951_v51 = vpack.c.bf16 %v939_v40, %v939_v40  ;;  %v10955_v55 = vpack.c.bf16 %v941_v46, %v941_v46  ;;  %v1214_v38 = vld [vmem:[#allocation8 + $0x820] sm:$0xff]  ;;  %v9717_v42 = vcombine.low %v1346_v32, %v1350_v33 }
 0x16a   :  { %v1338_v39 = vld [vmem:[#allocation8 + $0xc00] sm:$0xff]  ;;  %v9582_v45 = vcombine.high %v1210_v37, %v1214_v38 }
 0x16b   :  { %4100 = vmatprep.mubr.bf16.mxu0 %v10951_v51  ;;  %4141 = vmatprep.mubr.bf16.mxu1 %v10955_v55  ;;  %v1342_v40 = vld [vmem:[#allocation8 + $0xc20] sm:$0xff] }
 0x16c   :  { %4101 = vmatmul.mubr.bf16.vlgmr.msra.gmra.mxu0 %v10953_v54  ;;  %4142 = vmatmul.mubr.bf16.vlgmr.msra.gmra.mxu1 %v10949_v50  ;;  %v9710_v46 = vcombine.high %v1338_v39, %v1342_v40  ;;  %v1330_v47 = vld [vmem:[#allocation8 + $0xbc0] sm:$0xff] }
 0x16d   :  { %4151 = vmatpush1.bf16.msra.mxu0 %v9637_v12  ;;  %4192 = vmatpush1.bf16.msra.mxu1 %v9765_v13  ;;  %v9742_v12 = vcombine.high %v1370_v3, %v1374_v4  ;;  %v1366_v13 = vld [vmem:[#allocation8 + $0xce0] sm:$0xff]  ;;  %v9702_v57 = vcombine.high %v1330_v47, %v1334_v48 }
 0x16e   :  { %4152 = vmatprep.subr.bf16.mxu0 %v9630_v43  ;;  %4193 = vmatprep.subr.bf16.mxu1 %v9758_v56  ;;  %v9734_v15 = vcombine.high %v1362_v52, %v1366_v13  ;;  %v9733_v27 = vcombine.low %v1362_v52, %v1366_v13  ;;  %v1462_v53 = vld [vmem:[#allocation8 + $0xfe0] sm:$0xff]  ;;  %v9581_v43 = vcombine.low %v1210_v37, %v1214_v38  ;;  %v10971_v52 = vsub.s32 7, %v10925_v20 }
 0x16f   :  { %v9709_v56 = vcombine.low %v1338_v39, %v1342_v40  ;;  %v9830_v58 = vcombine.high %v1458_v49, %v1462_v53  ;;  %v1314_v3 = vld [vmem:[#allocation8 + $0xb40] sm:$0xff] }
 0x170   :  { %v1318_v4 = vld [vmem:[#allocation8 + $0xb60] sm:$0xff] }
 0x171   :  { %4153 = vmatpush1.bf16.msra.mxu0 %v9629_v61  ;;  %4194 = vmatpush1.bf16.msra.mxu1 %v9757_v62  ;;  %v1450_v61 = vld [vmem:[#allocation8 + $0xf80] sm:$0xff]  ;;  %v9686_v8 = vcombine.high %v1314_v3, %v1318_v4  ;;  %v9685_v16 = vcombine.low %v1314_v3, %v1318_v4 }
 0x172   :  { %4154 = vmatprep.subr.bf16.mxu0 %v9622_v63  ;;  %4195 = vmatprep.subr.bf16.mxu1 %v9750_v0  ;;  %v1454_v62 = vld [vmem:[#allocation8 + $0xfa0] sm:$0xff]  ;;  %v9701_v63 = vcombine.low %v1330_v47, %v1334_v48  ;;  %v9829_v0 = vcombine.low %v1458_v49, %v1462_v53 }
 0x173   :  { %v9822_v2 = vcombine.high %v1450_v61, %v1454_v62  ;;  %v9821_v9 = vcombine.low %v1450_v61, %v1454_v62  ;;  %v1302_v30 = vld [vmem:[#allocation8 + $0xae0] sm:$0xff]  ;;  %v10985_v61 = vsub.s32 4, %v10925_v20 }
 0x174   :  { %v1426_v32 = vld [vmem:[#allocation8 + $0xec0] sm:$0xff] }
 0x175   :  { %4155 = vmatpush1.bf16.msra.mxu0 %v9621_v5  ;;  %4196 = vmatpush1.bf16.msra.mxu1 %v9749_v6  ;;  %v1442_v5 = vld [vmem:[#allocation8 + $0xf40] sm:$0xff] }
 0x176   :  { %4156 = vmatprep.subr.bf16.mxu0 %v9614_v7  ;;  %4197 = vmatprep.subr.bf16.mxu1 %v9742_v12  ;;  %v1446_v6 = vld [vmem:[#allocation8 + $0xf60] sm:$0xff]  ;;  %v9693_v7 = vcombine.low %v1322_v59, %v1326_v60  ;;  %v10968_v12 = vsub.s32 5, %v10925_v20 }
 0x177   :  { %v9814_v13 = vcombine.high %v1442_v5, %v1446_v6  ;;  %v9813_v18 = vcombine.low %v1442_v5, %v1446_v6  ;;  %v1430_v33 = vld [vmem:[#allocation8 + $0xee0] sm:$0xff] }
 0x178   :  { %v273_v17 = vrot.slane %v10930_v22, %v10968_v12  ;;  %v1418_v48 = vld [vmem:[#allocation8 + $0xe80] sm:$0xff]  ;;  %v9797_v60 = vcombine.low %v1426_v32, %v1430_v33 }
 0x179   :  { %4157 = vmatpush1.bf16.msra.mxu0 %v9613_v10  ;;  %4198 = vmatpush1.bf16.msra.mxu1 %v9741_v11  ;;  %v1306_v10 = vld [vmem:[#allocation8 + $0xb00] sm:$0xff] }
 0x17a   :  { %4158 = vmatprep.subr.bf16.mxu0 %v9606_v14  ;;  %4199 = vmatprep.subr.bf16.mxu1 %v9734_v15  ;;  %v1310_v11 = vld [vmem:[#allocation8 + $0xb20] sm:$0xff] }
 0x17b   :  { %v1434_v14 = vld [vmem:[#allocation8 + $0xf00] sm:$0xff]  ;;  %v9678_v19 = vcombine.high %v1306_v10, %v1310_v11 }
 0x17c   :  { %v1438_v15 = vld [vmem:[#allocation8 + $0xf20] sm:$0xff] }
 0x17d   :  { %4159 = vmatpush1.bf16.msra.mxu0 %v9605_v26  ;;  %4200 = vmatpush1.bf16.msra.mxu1 %v9733_v27  ;;  %v281_v27 = vrot.slane %v10930_v22, %v10971_v52  ;;  %v9805_v37 = vcombine.low %v1434_v14, %v1438_v15  ;;  %v1422_v49 = vld [vmem:[#allocation8 + $0xea0] sm:$0xff] }
 0x17e   :  { %4160 = vmatprep.subr.bf16.mxu0 %v9598_v28  ;;  %4201 = vmatprep.subr.bf16.mxu1 %v9726_v29  ;;  %v9806_v28 = vcombine.high %v1434_v14, %v1438_v15  ;;  %v1298_v29 = vld [vmem:[#allocation8 + $0xac0] sm:$0xff] }
 0x17f   :  { %v9670_v38 = vcombine.high %v1298_v29, %v1302_v30  ;;  %v1410_v3 = vld [vmem:[#allocation8 + $0xe40] sm:$0xff] }
 0x180   :  { %v1414_v4 = vld [vmem:[#allocation8 + $0xe60] sm:$0xff] }
 0x181   :  { %4161 = vmatpush1.bf16.msra.mxu0 %v9597_v44  ;;  %4202 = vmatpush1.bf16.msra.mxu1 %v9725_v34  ;;  %v9677_v34 = vcombine.low %v1306_v10, %v1310_v11  ;;  %v1278_v10 = vld [vmem:[#allocation8 + $0xa20] sm:$0xff] }
 0x182   :  { %4162 = vmatprep.subr.bf16.mxu0 %v9590_v35  ;;  %4203 = vmatprep.subr.bf16.mxu1 %v9718_v36  ;;  %v1402_v11 = vld [vmem:[#allocation8 + $0xe00] sm:$0xff] }
 0x183   :  { %v1406_v14 = vld [vmem:[#allocation8 + $0xe20] sm:$0xff] }
 0x185   :  { %4163 = vmatpush1.bf16.msra.mxu0 %v9589_v41  ;;  %4204 = vmatpush1.bf16.msra.mxu1 %v9717_v42  ;;  %v9798_v41 = vcombine.high %v1426_v32, %v1430_v33 }
 0x186   :  { %4164 = vmatprep.subr.bf16.mxu0 %v9582_v45  ;;  %4205 = vmatprep.subr.bf16.mxu1 %v9710_v46  ;;  %v1290_v45 = vld [vmem:[#allocation8 + $0xa80] sm:$0xff] }
 0x187   :  { %v1294_v46 = vld [vmem:[#allocation8 + $0xaa0] sm:$0xff] }
 0x188   :  { %v9662_v62 = vcombine.high %v1290_v45, %v1294_v46  ;;  %v9661_v6 = vcombine.low %v1290_v45, %v1294_v46  ;;  %v995_v46 = vld [vmem:[#allocation8 + $0x148] sm:$0xff] }
 0x189   :  { %4165 = vmatpush1.bf16.msra.mxu0 %v9581_v43  ;;  %4206 = vmatpush1.bf16.msra.mxu1 %v9709_v56  ;;  %v9669_v56 = vcombine.low %v1298_v29, %v1302_v30  ;;  %v1139_v29 = vld [vmem:[#allocation8 + $0x5c8] sm:$0xff] }
 0x18a   :  { %4166 = vmatprep.subr.bf16.mxu0 %v9702_v57  ;;  %4207 = vmatprep.subr.bf16.mxu1 %v9830_v58  ;;  %v10982_v58 = vsub.s32 6, %v10925_v20  ;;  %v269_v20 = vrot.slane %v10930_v22, %v10985_v61  ;;  %v1143_v30 = vld [vmem:[#allocation8 + $0x5e8] sm:$0xff] }
 0x18c   :  { %v277_v5 = vrot.slane %v10930_v22, %v10982_v58  ;;  %v9774_v22 = vcombine.high %v1402_v11, %v1406_v14 }
 0x18d   :  { %4167 = vmatpush2.bf16.msra.mxu0 %v9701_v63  ;;  %4208 = vmatpush2.bf16.msra.mxu1 %v9829_v0  ;;  %v9790_v0 = vcombine.high %v1418_v48, %v1422_v49 }
 0x18e   :  { %4168 = vmatprep.subr.bf16.mxu0 %v9694_v1  ;;  %4209 = vmatprep.subr.bf16.mxu1 %v9822_v2  ;;  %v1282_v1 = vld [vmem:[#allocation8 + $0xa40] sm:$0xff] }
 0x18f   :  { %v1286_v2 = vld [vmem:[#allocation8 + $0xa60] sm:$0xff] }
 0x191   :  { %4169 = vmatpush2.bf16.msra.mxu0 %v9693_v7  ;;  %4210 = vmatpush2.bf16.msra.mxu1 %v9821_v9  ;;  %v9789_v7 = vcombine.low %v1418_v48, %v1422_v49  ;;  %v9654_v9 = vcombine.high %v1282_v1, %v1286_v2  ;;  %v1123_v49 = vld [vmem:[#allocation8 + $0x548] sm:$0xff] }
 0x192   :  { %4170 = vmatprep.subr.bf16.mxu0 %v9686_v8  ;;  %v10975_v26 = vpop.f32.mrf.mxu0  ;;  %4211 = vmatprep.subr.bf16.mxu1 %v9814_v13  ;;  %v931_v31 = vpop.f32.mrf.mxu1  ;;  %v9782_v8 = vcombine.high %v1410_v3, %v1414_v4  ;;  %v1274_v13 = vld [vmem:[#allocation8 + $0xa00] sm:$0xff] }
 0x193   :  { %v932_v15 = vadd.f32 %v931_v31, %v277_v5  ;;  %v9645_v33 = vcombine.low %v1274_v13, %v1278_v10  ;;  %v9773_v31 = vcombine.low %v1402_v11, %v1406_v14 }
 0x194   :  { %v892_v44 = vpop.f32.mrf.mxu0  ;;  %v933_v36 = vpop.f32.mrf.mxu1 }
 0x195   :  { %4171 = vmatpush2.bf16.msra.mxu0 %v9685_v16  ;;  %v893_v35 = vadd.f32 %v892_v44, %v273_v17  ;;  %4212 = vmatpush2.bf16.msra.mxu1 %v9813_v18  ;;  %v934_v40 = vadd.f32 %v933_v36, %v281_v27  ;;  %v9653_v16 = vcombine.low %v1282_v1, %v1286_v2  ;;  %v1011_v27 = vld [vmem:[#allocation8 + $0x1c8] sm:$0xff]  ;;  %v944_v32 = vmax.f32 %v932_v15, 0.0 }
 0x196   :  { %4172 = vmatprep.subr.bf16.mxu0 %v9678_v19  ;;  %v894_v39 = vpop.f32.mrf.mxu0  ;;  %4213 = vmatprep.subr.bf16.mxu1 %v9806_v28  ;;  %v935_v47 = vpop.f32.mrf.mxu1  ;;  %v891_v17 = vadd.f32 %v10975_v26, %v269_v20  ;;  %v9781_v18 = vcombine.low %v1410_v3, %v1414_v4  ;;  %v9646_v19 = vcombine.high %v1274_v13, %v1278_v10  ;;  %v1015_v28 = vld [vmem:[#allocation8 + $0x1e8] sm:$0xff] }
 0x197   :  { %v943_v42 = vmax.f32 %v893_v35, 0.0  ;;  %v945_v53 = vmax.f32 %v934_v40, 0.0  ;;  %v9512_v26 = vcombine.high %v1139_v29, %v1143_v30  ;;  %v1003_v35 = vld [vmem:[#allocation8 + $0x188] sm:$0xff] }
 0x198   :  { %v895_v43 = vpop.f32.mrf.mxu0  ;;  %v936_v59 = vpop.f32.mrf.mxu1  ;;  %v942_v44 = vmax.f32 %v891_v17, 0.0  ;;  %v1007_v36 = vld [vmem:[#allocation8 + $0x1a8] sm:$0xff] }
 0x199   :  { %4173 = vmatpush2.bf16.msra.mxu0 %v9677_v34  ;;  %v10979_v57 = vpack.c.bf16 %v943_v42, %v943_v42  ;;  %4214 = vmatpush2.bf16.msra.mxu1 %v9805_v37  ;;  %v10987_v63 = vpack.c.bf16 %v945_v53, %v945_v53  ;;  %v9384_v34 = vcombine.high %v1011_v27, %v1015_v28  ;;  %v1131_v39 = vld [vmem:[#allocation8 + $0x588] sm:$0xff] }
 0x19a   :  { %4174 = vmatprep.subr.bf16.mxu0 %v9670_v38  ;;  %4215 = vmatprep.subr.bf16.mxu1 %v9798_v41  ;;  %v10996_v37 = vpack.c.bf16 %v944_v32, %v944_v32  ;;  %v9383_v38 = vcombine.low %v1011_v27, %v1015_v28  ;;  %v1135_v40 = vld [vmem:[#allocation8 + $0x5a8] sm:$0xff]  ;;  %v10998_v41 = vpack.c.bf16 %v942_v44, %v942_v44 }
 0x19b   :  { %4182 = vmatprep.mubr.bf16.mxu0 %v10979_v57  ;;  %4223 = vmatprep.mubr.bf16.mxu1 %v10987_v63  ;;  %v9511_v42 = vcombine.low %v1139_v29, %v1143_v30  ;;  %v9376_v45 = vcombine.high %v1003_v35, %v1007_v36  ;;  %v999_v47 = vld [vmem:[#allocation8 + $0x168] sm:$0xff]  ;;  %v9504_v48 = vcombine.high %v1131_v39, %v1135_v40 }
 0x19c   :  { %v1127_v53 = vld [vmem:[#allocation8 + $0x568] sm:$0xff]  ;;  %v9375_v43 = vcombine.low %v1003_v35, %v1007_v36  ;;  %v9368_v59 = vcombine.high %v995_v46, %v999_v47  ;;  %v9367_v3 = vcombine.low %v995_v46, %v999_v47 }
 0x19d   :  { %4175 = vmatpush2.bf16.msra.mxu0 %v9669_v56  ;;  %4216 = vmatpush2.bf16.msra.mxu1 %v9797_v60  ;;  %v9503_v56 = vcombine.low %v1131_v39, %v1135_v40  ;;  %v9496_v60 = vcombine.high %v1123_v49, %v1127_v53  ;;  %v1115_v1 = vld [vmem:[#allocation8 + $0x508] sm:$0xff]  ;;  %v9495_v4 = vcombine.low %v1123_v49, %v1127_v53 }
 0x19e   :  { %4176 = vmatprep.subr.bf16.mxu0 %v9662_v62  ;;  %4217 = vmatprep.subr.bf16.mxu1 %v9790_v0  ;;  %v987_v62 = vld [vmem:[#allocation8 + $0x108] sm:$0xff] }
 0x19f   :  { %v991_v0 = vld [vmem:[#allocation8 + $0x128] sm:$0xff] }
 0x1a0   :  { %v1119_v2 = vld [vmem:[#allocation8 + $0x528] sm:$0xff]  ;;  %v9360_v5 = vcombine.high %v987_v62, %v991_v0  ;;  %v9359_v13 = vcombine.low %v987_v62, %v991_v0 }
 0x1a1   :  { %4177 = vmatpush2.bf16.msra.mxu0 %v9661_v6  ;;  %4218 = vmatpush2.bf16.msra.mxu1 %v9789_v7  ;;  %v9488_v6 = vcombine.high %v1115_v1, %v1119_v2  ;;  %v979_v20 = vld [vmem:[#allocation8 + $0xc8] sm:$0xff]  ;;  %v9487_v10 = vcombine.low %v1115_v1, %v1119_v2 }
 0x1a2   :  { %4178 = vmatprep.subr.bf16.mxu0 %v9654_v9  ;;  %4219 = vmatprep.subr.bf16.mxu1 %v9782_v8  ;;  %v983_v7 = vld [vmem:[#allocation8 + $0xe8] sm:$0xff] }
 0x1a3   :  { %v1107_v9 = vld [vmem:[#allocation8 + $0x4c8] sm:$0xff]  ;;  %v9352_v11 = vcombine.high %v979_v20, %v983_v7 }
 0x1a4   :  { %v1111_v8 = vld [vmem:[#allocation8 + $0x4e8] sm:$0xff] }
 0x1a5   :  { %4179 = vmatpush2.bf16.msra.mxu0 %v9653_v16  ;;  %4220 = vmatpush2.bf16.msra.mxu1 %v9781_v18  ;;  %v9480_v14 = vcombine.high %v1107_v9, %v1111_v8  ;;  %v971_v15 = vld [vmem:[#allocation8 + $0x88] sm:$0xff] }
 0x1a6   :  { %4180 = vmatprep.subr.bf16.mxu0 %v9646_v19  ;;  %4221 = vmatprep.subr.bf16.mxu1 %v9774_v22  ;;  %v975_v16 = vld [vmem:[#allocation8 + $0xa8] sm:$0xff]  ;;  %v9351_v19 = vcombine.low %v979_v20, %v983_v7  ;;  %v9479_v22 = vcombine.low %v1107_v9, %v1111_v8 }
 0x1a7   :  { %v1099_v17 = vld [vmem:[#allocation8 + $0x488] sm:$0xff]  ;;  %v9344_v27 = vcombine.high %v971_v15, %v975_v16  ;;  %v9343_v44 = vcombine.low %v971_v15, %v975_v16 }
 0x1a8   :  { %v1103_v18 = vld [vmem:[#allocation8 + $0x4a8] sm:$0xff] }
 0x1a9   :  { %4181 = vmatpush2.bf16.msra.mxu0 %v9645_v33  ;;  %4222 = vmatpush2.bf16.msra.mxu1 %v9773_v31  ;;  %v9472_v28 = vcombine.high %v1099_v17, %v1103_v18  ;;  %v963_v29 = vld [vmem:[#allocation8 + $0x48] sm:$0xff]  ;;  %v9471_v31 = vcombine.low %v1099_v17, %v1103_v18 }
 0x1aa   :  { %4232 = vmatprep.subr.bf16.mxu0 %v9384_v34  ;;  %4273 = vmatprep.subr.bf16.mxu1 %v9512_v26  ;;  %v967_v30 = vld [vmem:[#allocation8 + $0x68] sm:$0xff] }
 0x1ab   :  { %v1091_v32 = vld [vmem:[#allocation8 + $0x448] sm:$0xff]  ;;  %v9336_v34 = vcombine.high %v963_v29, %v967_v30  ;;  %v9335_v40 = vcombine.low %v963_v29, %v967_v30 }
 0x1ac   :  { %4183 = vmatmul.mubr.bf16.vlgmr.msra.gmra.mxu0 %v10998_v41  ;;  %4224 = vmatmul.mubr.bf16.vlgmr.msra.gmra.mxu1 %v10996_v37  ;;  %v1095_v33 = vld [vmem:[#allocation8 + $0x468] sm:$0xff] }
 0x1ad   :  { %4233 = vmatpush1.bf16.msra.mxu0 %v9383_v38  ;;  %4264 = vmatprep.mubr.bf16.mxu0 %v10951_v51  ;;  %v9464_v26 = vcombine.high %v1091_v32, %v1095_v33  ;;  %v955_v35 = vld [vmem:[#allocation8 + $0x8] sm:$0xff] }
 0x1ae   :  { %4274 = vmatpush1.bf16.msra.mxu1 %v9511_v42  ;;  %4305 = vmatprep.mubr.bf16.mxu1 %v10955_v55  ;;  %v959_v36 = vld [vmem:[#allocation8 + $0x28] sm:$0xff]  ;;  %v9463_v42 = vcombine.low %v1091_v32, %v1095_v33 }
 0x1af   :  { %4234 = vmatprep.subr.bf16.mxu0 %v9376_v45  ;;  %4275 = vmatprep.subr.bf16.mxu1 %v9504_v48  ;;  %v1083_v38 = vld [vmem:[#allocation8 + $0x408] sm:$0xff]  ;;  %v9328_v45 = vcombine.high %v955_v35, %v959_v36 }
 0x1b0   :  { %v1087_v39 = vld [vmem:[#allocation8 + $0x428] sm:$0xff] }
 0x1b1   :  { %4235 = vmatpush1.bf16.msra.mxu0 %v9375_v43  ;;  %v9456_v46 = vcombine.high %v1083_v38, %v1087_v39  ;;  %v1075_v47 = vld [vmem:[#allocation8 + $0x3c8] sm:$0xff]  ;;  %v9327_v43 = vcombine.low %v955_v35, %v959_v36 }
 0x1b2   :  { %4276 = vmatpush1.bf16.msra.mxu1 %v9503_v56  ;;  %4236 = vmatprep.subr.bf16.mxu0 %v9368_v59  ;;  %v1079_v48 = vld [vmem:[#allocation8 + $0x3e8] sm:$0xff]  ;;  %v9455_v56 = vcombine.low %v1083_v38, %v1087_v39 }
 0x1b3   :  { %4277 = vmatprep.subr.bf16.mxu1 %v9496_v60  ;;  %v1203_v49 = vld [vmem:[#allocation8 + $0x7c8] sm:$0xff]  ;;  %v9448_v59 = vcombine.high %v1075_v47, %v1079_v48 }
 0x1b4   :  { %v1207_v53 = vld [vmem:[#allocation8 + $0x7e8] sm:$0xff] }
 0x1b5   :  { %4237 = vmatpush1.bf16.msra.mxu0 %v9367_v3  ;;  %v9576_v60 = vcombine.high %v1203_v49, %v1207_v53  ;;  %v1067_v62 = vld [vmem:[#allocation8 + $0x388] sm:$0xff]  ;;  %v9447_v3 = vcombine.low %v1075_v47, %v1079_v48 }
 0x1b6   :  { %4278 = vmatpush1.bf16.msra.mxu1 %v9495_v4  ;;  %4238 = vmatprep.subr.bf16.mxu0 %v9360_v5  ;;  %v1071_v0 = vld [vmem:[#allocation8 + $0x3a8] sm:$0xff]  ;;  %v9575_v4 = vcombine.low %v1203_v49, %v1207_v53 }
 0x1b7   :  { %4279 = vmatprep.subr.bf16.mxu1 %v9488_v6  ;;  %v1195_v1 = vld [vmem:[#allocation8 + $0x788] sm:$0xff]  ;;  %v9440_v5 = vcombine.high %v1067_v62, %v1071_v0 }
 0x1b8   :  { %v1199_v2 = vld [vmem:[#allocation8 + $0x7a8] sm:$0xff] }
 0x1b9   :  { %4239 = vmatpush1.bf16.msra.mxu0 %v9359_v13  ;;  %v9568_v6 = vcombine.high %v1195_v1, %v1199_v2  ;;  %v1059_v20 = vld [vmem:[#allocation8 + $0x348] sm:$0xff]  ;;  %v9439_v13 = vcombine.low %v1067_v62, %v1071_v0 }
 0x1ba   :  { %4280 = vmatpush1.bf16.msra.mxu1 %v9487_v10  ;;  %4240 = vmatprep.subr.bf16.mxu0 %v9352_v11  ;;  %v1063_v7 = vld [vmem:[#allocation8 + $0x368] sm:$0xff]  ;;  %v9567_v10 = vcombine.low %v1195_v1, %v1199_v2 }
 0x1bb   :  { %4281 = vmatprep.subr.bf16.mxu1 %v9480_v14  ;;  %v1187_v9 = vld [vmem:[#allocation8 + $0x748] sm:$0xff]  ;;  %v9432_v11 = vcombine.high %v1059_v20, %v1063_v7 }
 0x1bc   :  { %v1191_v8 = vld [vmem:[#allocation8 + $0x768] sm:$0xff] }
 0x1bd   :  { %4241 = vmatpush1.bf16.msra.mxu0 %v9351_v19  ;;  %v9560_v14 = vcombine.high %v1187_v9, %v1191_v8  ;;  %v1051_v15 = vld [vmem:[#allocation8 + $0x308] sm:$0xff]  ;;  %v9431_v19 = vcombine.low %v1059_v20, %v1063_v7 }
 0x1be   :  { %4282 = vmatpush1.bf16.msra.mxu1 %v9479_v22  ;;  %4242 = vmatprep.subr.bf16.mxu0 %v9344_v27  ;;  %v1055_v16 = vld [vmem:[#allocation8 + $0x328] sm:$0xff]  ;;  %v9559_v22 = vcombine.low %v1187_v9, %v1191_v8 }
 0x1bf   :  { %4283 = vmatprep.subr.bf16.mxu1 %v9472_v28  ;;  %v1179_v17 = vld [vmem:[#allocation8 + $0x708] sm:$0xff]  ;;  %v9424_v27 = vcombine.high %v1051_v15, %v1055_v16 }
 0x1c0   :  { %v1183_v18 = vld [vmem:[#allocation8 + $0x728] sm:$0xff] }
 0x1c1   :  { %4243 = vmatpush1.bf16.msra.mxu0 %v9343_v44  ;;  %v9552_v28 = vcombine.high %v1179_v17, %v1183_v18  ;;  %v1043_v29 = vld [vmem:[#allocation8 + $0x2c8] sm:$0xff]  ;;  %v9423_v44 = vcombine.low %v1051_v15, %v1055_v16 }
 0x1c2   :  { %4284 = vmatpush1.bf16.msra.mxu1 %v9471_v31  ;;  %4244 = vmatprep.subr.bf16.mxu0 %v9336_v34  ;;  %v1047_v30 = vld [vmem:[#allocation8 + $0x2e8] sm:$0xff]  ;;  %v9551_v31 = vcombine.low %v1179_v17, %v1183_v18 }
 0x1c3   :  { %4285 = vmatprep.subr.bf16.mxu1 %v9464_v26  ;;  %v1171_v32 = vld [vmem:[#allocation8 + $0x6c8] sm:$0xff]  ;;  %v9416_v34 = vcombine.high %v1043_v29, %v1047_v30 }
 0x1c4   :  { %v1175_v33 = vld [vmem:[#allocation8 + $0x6e8] sm:$0xff] }
 0x1c5   :  { %4245 = vmatpush1.bf16.msra.mxu0 %v9335_v40  ;;  %v9544_v26 = vcombine.high %v1171_v32, %v1175_v33  ;;  %v1035_v35 = vld [vmem:[#allocation8 + $0x288] sm:$0xff]  ;;  %v9415_v40 = vcombine.low %v1043_v29, %v1047_v30 }
 0x1c6   :  { %4286 = vmatpush1.bf16.msra.mxu1 %v9463_v42  ;;  %4246 = vmatprep.subr.bf16.mxu0 %v9328_v45  ;;  %v1039_v36 = vld [vmem:[#allocation8 + $0x2a8] sm:$0xff]  ;;  %v9543_v42 = vcombine.low %v1171_v32, %v1175_v33 }
 0x1c7   :  { %4287 = vmatprep.subr.bf16.mxu1 %v9456_v46  ;;  %v1163_v38 = vld [vmem:[#allocation8 + $0x688] sm:$0xff]  ;;  %v9408_v45 = vcombine.high %v1035_v35, %v1039_v36 }
 0x1c8   :  { %v1167_v39 = vld [vmem:[#allocation8 + $0x6a8] sm:$0xff] }
 0x1c9   :  { %4247 = vmatpush1.bf16.msra.mxu0 %v9327_v43  ;;  %v9536_v46 = vcombine.high %v1163_v38, %v1167_v39  ;;  %v1027_v47 = vld [vmem:[#allocation8 + $0x248] sm:$0xff]  ;;  %v9407_v43 = vcombine.low %v1035_v35, %v1039_v36 }
 0x1ca   :  { %4288 = vmatpush1.bf16.msra.mxu1 %v9455_v56  ;;  %4248 = vmatprep.subr.bf16.mxu0 %v9448_v59  ;;  %v1031_v48 = vld [vmem:[#allocation8 + $0x268] sm:$0xff]  ;;  %v9535_v56 = vcombine.low %v1163_v38, %v1167_v39 }
 0x1cb   :  { %4289 = vmatprep.subr.bf16.mxu1 %v9576_v60  ;;  %v1155_v49 = vld [vmem:[#allocation8 + $0x648] sm:$0xff]  ;;  %v9400_v59 = vcombine.high %v1027_v47, %v1031_v48 }
 0x1cc   :  { %v1159_v53 = vld [vmem:[#allocation8 + $0x668] sm:$0xff] }
 0x1cd   :  { %4249 = vmatpush2.bf16.msra.mxu0 %v9447_v3  ;;  %v9528_v60 = vcombine.high %v1155_v49, %v1159_v53  ;;  %v1019_v62 = vld [vmem:[#allocation8 + $0x208] sm:$0xff]  ;;  %v9399_v3 = vcombine.low %v1027_v47, %v1031_v48 }
 0x1ce   :  { %4290 = vmatpush2.bf16.msra.mxu1 %v9575_v4  ;;  %4250 = vmatprep.subr.bf16.mxu0 %v9440_v5  ;;  %v1023_v0 = vld [vmem:[#allocation8 + $0x228] sm:$0xff]  ;;  %v9527_v4 = vcombine.low %v1155_v49, %v1159_v53 }
 0x1cf   :  { %4291 = vmatprep.subr.bf16.mxu1 %v9568_v6  ;;  %v1147_v1 = vld [vmem:[#allocation8 + $0x608] sm:$0xff]  ;;  %v9392_v5 = vcombine.high %v1019_v62, %v1023_v0 }
 0x1d0   :  { %v1151_v2 = vld [vmem:[#allocation8 + $0x628] sm:$0xff] }
 0x1d1   :  { %4251 = vmatpush2.bf16.msra.mxu0 %v9439_v13  ;;  %v9520_v6 = vcombine.high %v1147_v1, %v1151_v2  ;;  %v1267_v20 = vld [vmem:[#allocation8 + $0x9c8] sm:$0xff]  ;;  %v9391_v13 = vcombine.low %v1019_v62, %v1023_v0 }
 0x1d2   :  { %4292 = vmatpush2.bf16.msra.mxu1 %v9567_v10  ;;  %4252 = vmatprep.subr.bf16.mxu0 %v9432_v11  ;;  %v1271_v7 = vld [vmem:[#allocation8 + $0x9e8] sm:$0xff]  ;;  %v9519_v10 = vcombine.low %v1147_v1, %v1151_v2 }
 0x1d3   :  { %4293 = vmatprep.subr.bf16.mxu1 %v9560_v14  ;;  %v1395_v9 = vld [vmem:[#allocation8 + $0xdc8] sm:$0xff]  ;;  %v9640_v11 = vcombine.high %v1267_v20, %v1271_v7  ;;  %v9639_v17 = vcombine.low %v1267_v20, %v1271_v7 }
 0x1d4   :  { %v1399_v8 = vld [vmem:[#allocation8 + $0xde8] sm:$0xff] }
 0x1d5   :  { %4253 = vmatpush2.bf16.msra.mxu0 %v9431_v19  ;;  %v9768_v14 = vcombine.high %v1395_v9, %v1399_v8  ;;  %v1259_v15 = vld [vmem:[#allocation8 + $0x988] sm:$0xff] }
 0x1d6   :  { %4294 = vmatpush2.bf16.msra.mxu1 %v9559_v22  ;;  %4254 = vmatprep.subr.bf16.mxu0 %v9424_v27  ;;  %v1263_v16 = vld [vmem:[#allocation8 + $0x9a8] sm:$0xff]  ;;  %v9767_v22 = vcombine.low %v1395_v9, %v1399_v8 }
 0x1d7   :  { %4295 = vmatprep.subr.bf16.mxu1 %v9552_v28  ;;  %v1387_v18 = vld [vmem:[#allocation8 + $0xd88] sm:$0xff]  ;;  %v9632_v27 = vcombine.high %v1259_v15, %v1263_v16 }
 0x1d8   :  { %v1391_v19 = vld [vmem:[#allocation8 + $0xda8] sm:$0xff] }
 0x1d9   :  { %4255 = vmatpush2.bf16.msra.mxu0 %v9423_v44  ;;  %v1251_v28 = vld [vmem:[#allocation8 + $0x948] sm:$0xff]  ;;  %v9760_v30 = vcombine.high %v1387_v18, %v1391_v19  ;;  %v9631_v44 = vcombine.low %v1259_v15, %v1263_v16 }
 0x1da   :  { %4296 = vmatpush2.bf16.msra.mxu1 %v9551_v31  ;;  %4256 = vmatprep.subr.bf16.mxu0 %v9416_v34  ;;  %v1255_v29 = vld [vmem:[#allocation8 + $0x968] sm:$0xff]  ;;  %v9759_v31 = vcombine.low %v1387_v18, %v1391_v19 }
 0x1db   :  { %4297 = vmatprep.subr.bf16.mxu1 %v9544_v26  ;;  %v1379_v32 = vld [vmem:[#allocation8 + $0xd48] sm:$0xff]  ;;  %v9624_v34 = vcombine.high %v1251_v28, %v1255_v29 }
 0x1dc   :  { %v1383_v33 = vld [vmem:[#allocation8 + $0xd68] sm:$0xff] }
 0x1dd   :  { %4257 = vmatpush2.bf16.msra.mxu0 %v9415_v40  ;;  %v9752_v26 = vcombine.high %v1379_v32, %v1383_v33  ;;  %v1243_v35 = vld [vmem:[#allocation8 + $0x908] sm:$0xff]  ;;  %v9623_v40 = vcombine.low %v1251_v28, %v1255_v29 }
 0x1de   :  { %4298 = vmatpush2.bf16.msra.mxu1 %v9543_v42  ;;  %4258 = vmatprep.subr.bf16.mxu0 %v9408_v45  ;;  %v1247_v36 = vld [vmem:[#allocation8 + $0x928] sm:$0xff]  ;;  %v9751_v42 = vcombine.low %v1379_v32, %v1383_v33 }
 0x1df   :  { %4299 = vmatprep.subr.bf16.mxu1 %v9536_v46  ;;  %v1371_v38 = vld [vmem:[#allocation8 + $0xd08] sm:$0xff]  ;;  %v9616_v45 = vcombine.high %v1243_v35, %v1247_v36 }
 0x1e0   :  { %v1375_v39 = vld [vmem:[#allocation8 + $0xd28] sm:$0xff] }
 0x1e1   :  { %4259 = vmatpush2.bf16.msra.mxu0 %v9407_v43  ;;  %v9744_v46 = vcombine.high %v1371_v38, %v1375_v39  ;;  %v1235_v47 = vld [vmem:[#allocation8 + $0x8c8] sm:$0xff]  ;;  %v9615_v43 = vcombine.low %v1243_v35, %v1247_v36 }
 0x1e2   :  { %4300 = vmatpush2.bf16.msra.mxu1 %v9535_v56  ;;  %4260 = vmatprep.subr.bf16.mxu0 %v9400_v59  ;;  %v1239_v48 = vld [vmem:[#allocation8 + $0x8e8] sm:$0xff]  ;;  %v9743_v56 = vcombine.low %v1371_v38, %v1375_v39 }
 0x1e3   :  { %4301 = vmatprep.subr.bf16.mxu1 %v9528_v60  ;;  %v1363_v49 = vld [vmem:[#allocation8 + $0xcc8] sm:$0xff]  ;;  %v9608_v59 = vcombine.high %v1235_v47, %v1239_v48 }
 0x1e4   :  { %v1367_v53 = vld [vmem:[#allocation8 + $0xce8] sm:$0xff] }
 0x1e5   :  { %4261 = vmatpush2.bf16.msra.mxu0 %v9399_v3  ;;  %v9736_v60 = vcombine.high %v1363_v49, %v1367_v53  ;;  %v1227_v62 = vld [vmem:[#allocation8 + $0x888] sm:$0xff]  ;;  %v9607_v3 = vcombine.low %v1235_v47, %v1239_v48 }
 0x1e6   :  { %4302 = vmatpush2.bf16.msra.mxu1 %v9527_v4  ;;  %4262 = vmatprep.subr.bf16.mxu0 %v9392_v5  ;;  %v1231_v0 = vld [vmem:[#allocation8 + $0x8a8] sm:$0xff]  ;;  %v9735_v4 = vcombine.low %v1363_v49, %v1367_v53 }
 0x1e7   :  { %4303 = vmatprep.subr.bf16.mxu1 %v9520_v6  ;;  %v1355_v1 = vld [vmem:[#allocation8 + $0xc88] sm:$0xff]  ;;  %v9600_v5 = vcombine.high %v1227_v62, %v1231_v0 }
 0x1e8   :  { %v1359_v2 = vld [vmem:[#allocation8 + $0xca8] sm:$0xff] }
 0x1e9   :  { %4263 = vmatpush2.bf16.msra.mxu0 %v9391_v13  ;;  %v9728_v6 = vcombine.high %v1355_v1, %v1359_v2  ;;  %v1219_v20 = vld [vmem:[#allocation8 + $0x848] sm:$0xff]  ;;  %v9599_v13 = vcombine.low %v1227_v62, %v1231_v0 }
 0x1ea   :  { %4304 = vmatpush2.bf16.msra.mxu1 %v9519_v10  ;;  %4314 = vmatprep.subr.bf16.mxu0 %v9640_v11  ;;  %v1223_v7 = vld [vmem:[#allocation8 + $0x868] sm:$0xff]  ;;  %v9727_v10 = vcombine.low %v1355_v1, %v1359_v2 }
 0x1eb   :  { %4355 = vmatprep.subr.bf16.mxu1 %v9768_v14  ;;  %v1347_v9 = vld [vmem:[#allocation8 + $0xc48] sm:$0xff]  ;;  %v9592_v11 = vcombine.high %v1219_v20, %v1223_v7  ;;  %v9591_v19 = vcombine.low %v1219_v20, %v1223_v7 }
 0x1ec   :  { %4265 = vmatmul.mubr.bf16.vlgmr.msra.gmra.mxu0 %v10953_v54  ;;  %v1351_v8 = vld [vmem:[#allocation8 + $0xc68] sm:$0xff] }
 0x1ed   :  { %4306 = vmatmul.mubr.bf16.vlgmr.msra.gmra.mxu1 %v10949_v50  ;;  %4315 = vmatpush1.bf16.msra.mxu0 %v9639_v17  ;;  %v9720_v14 = vcombine.high %v1347_v9, %v1351_v8  ;;  %v1211_v15 = vld [vmem:[#allocation8 + $0x808] sm:$0xff] }
 0x1ee   :  { %4346 = vmatprep.mubr.bf16.mxu0 %v10979_v57  ;;  %4356 = vmatpush1.bf16.msra.mxu1 %v9767_v22  ;;  %v1215_v16 = vld [vmem:[#allocation8 + $0x828] sm:$0xff]  ;;  %v9719_v22 = vcombine.low %v1347_v9, %v1351_v8 }
 0x1ef   :  { %4387 = vmatprep.mubr.bf16.mxu1 %v10987_v63  ;;  %4316 = vmatprep.subr.bf16.mxu0 %v9632_v27  ;;  %v1339_v17 = vld [vmem:[#allocation8 + $0xc08] sm:$0xff]  ;;  %v9584_v27 = vcombine.high %v1211_v15, %v1215_v16 }
 0x1f0   :  { %4357 = vmatprep.subr.bf16.mxu1 %v9760_v30  ;;  %v1343_v18 = vld [vmem:[#allocation8 + $0xc28] sm:$0xff] }
 0x1f1   :  { %4317 = vmatpush1.bf16.msra.mxu0 %v9631_v44  ;;  %v9712_v28 = vcombine.high %v1339_v17, %v1343_v18  ;;  %v1331_v29 = vld [vmem:[#allocation8 + $0xbc8] sm:$0xff]  ;;  %v9583_v44 = vcombine.low %v1211_v15, %v1215_v16 }
 0x1f2   :  { %4358 = vmatpush1.bf16.msra.mxu1 %v9759_v31  ;;  %4318 = vmatprep.subr.bf16.mxu0 %v9624_v34  ;;  %v1335_v30 = vld [vmem:[#allocation8 + $0xbe8] sm:$0xff]  ;;  %v9711_v31 = vcombine.low %v1339_v17, %v1343_v18 }
 0x1f3   :  { %4359 = vmatprep.subr.bf16.mxu1 %v9752_v26  ;;  %v1459_v32 = vld [vmem:[#allocation8 + $0xfc8] sm:$0xff]  ;;  %v9704_v34 = vcombine.high %v1331_v29, %v1335_v30 }
 0x1f4   :  { %v1463_v33 = vld [vmem:[#allocation8 + $0xfe8] sm:$0xff] }
 0x1f5   :  { %4319 = vmatpush1.bf16.msra.mxu0 %v9623_v40  ;;  %v9832_v26 = vcombine.high %v1459_v32, %v1463_v33  ;;  %v1323_v35 = vld [vmem:[#allocation8 + $0xb88] sm:$0xff]  ;;  %v9703_v40 = vcombine.low %v1331_v29, %v1335_v30 }
 0x1f6   :  { %4360 = vmatpush1.bf16.msra.mxu1 %v9751_v42  ;;  %4320 = vmatprep.subr.bf16.mxu0 %v9616_v45  ;;  %v1327_v36 = vld [vmem:[#allocation8 + $0xba8] sm:$0xff]  ;;  %v9831_v42 = vcombine.low %v1459_v32, %v1463_v33 }
 0x1f7   :  { %4361 = vmatprep.subr.bf16.mxu1 %v9744_v46  ;;  %v1451_v38 = vld [vmem:[#allocation8 + $0xf88] sm:$0xff]  ;;  %v9696_v45 = vcombine.high %v1323_v35, %v1327_v36 }
 0x1f8   :  { %v1455_v39 = vld [vmem:[#allocation8 + $0xfa8] sm:$0xff] }
 0x1f9   :  { %4321 = vmatpush1.bf16.msra.mxu0 %v9615_v43  ;;  %v9824_v46 = vcombine.high %v1451_v38, %v1455_v39  ;;  %v1315_v47 = vld [vmem:[#allocation8 + $0xb48] sm:$0xff]  ;;  %v9695_v43 = vcombine.low %v1323_v35, %v1327_v36 }
 0x1fa   :  { %4362 = vmatpush1.bf16.msra.mxu1 %v9743_v56  ;;  %4322 = vmatprep.subr.bf16.mxu0 %v9608_v59  ;;  %v1319_v48 = vld [vmem:[#allocation8 + $0xb68] sm:$0xff]  ;;  %v9823_v56 = vcombine.low %v1451_v38, %v1455_v39 }
 0x1fb   :  { %4363 = vmatprep.subr.bf16.mxu1 %v9736_v60  ;;  %v1443_v49 = vld [vmem:[#allocation8 + $0xf48] sm:$0xff]  ;;  %v9688_v59 = vcombine.high %v1315_v47, %v1319_v48 }
 0x1fc   :  { %v1447_v53 = vld [vmem:[#allocation8 + $0xf68] sm:$0xff] }
 0x1fd   :  { %4323 = vmatpush1.bf16.msra.mxu0 %v9607_v3  ;;  %v9816_v60 = vcombine.high %v1443_v49, %v1447_v53  ;;  %v1307_v62 = vld [vmem:[#allocation8 + $0xb08] sm:$0xff]  ;;  %v9687_v3 = vcombine.low %v1315_v47, %v1319_v48  ;;  %v1012_v47 = vld [vmem:[#allocation8 + $0x1d0] sm:$0xff] }
 0x1fe   :  { %4364 = vmatpush1.bf16.msra.mxu1 %v9735_v4  ;;  %4324 = vmatprep.subr.bf16.mxu0 %v9600_v5  ;;  %v1311_v0 = vld [vmem:[#allocation8 + $0xb28] sm:$0xff]  ;;  %v9815_v4 = vcombine.low %v1443_v49, %v1447_v53  ;;  %v1016_v48 = vld [vmem:[#allocation8 + $0x1f0] sm:$0xff] }
 0x1ff   :  { %4365 = vmatprep.subr.bf16.mxu1 %v9728_v6  ;;  %v1435_v1 = vld [vmem:[#allocation8 + $0xf08] sm:$0xff]  ;;  %v9680_v5 = vcombine.high %v1307_v62, %v1311_v0  ;;  %v1140_v49 = vld [vmem:[#allocation8 + $0x5d0] sm:$0xff] }
 0x200   :  { %v1439_v2 = vld [vmem:[#allocation8 + $0xf28] sm:$0xff]  ;;  %v1144_v53 = vld [vmem:[#allocation8 + $0x5f0] sm:$0xff] }
 0x201   :  { %4325 = vmatpush1.bf16.msra.mxu0 %v9599_v13  ;;  %v9808_v6 = vcombine.high %v1435_v1, %v1439_v2  ;;  %v1299_v20 = vld [vmem:[#allocation8 + $0xac8] sm:$0xff]  ;;  %v9679_v13 = vcombine.low %v1307_v62, %v1311_v0  ;;  %v9514_v62 = vcombine.high %v1140_v49, %v1144_v53  ;;  %v1004_v0 = vld [vmem:[#allocation8 + $0x190] sm:$0xff] }
 0x202   :  { %4366 = vmatpush1.bf16.msra.mxu1 %v9727_v10  ;;  %4326 = vmatprep.subr.bf16.mxu0 %v9592_v11  ;;  %v1303_v7 = vld [vmem:[#allocation8 + $0xae8] sm:$0xff]  ;;  %v9807_v10 = vcombine.low %v1435_v1, %v1439_v2  ;;  %v1008_v1 = vld [vmem:[#allocation8 + $0x1b0] sm:$0xff]  ;;  %v9385_v2 = vcombine.low %v1012_v47, %v1016_v48 }
 0x203   :  { %4367 = vmatprep.subr.bf16.mxu1 %v9720_v14  ;;  %v1427_v9 = vld [vmem:[#allocation8 + $0xec8] sm:$0xff]  ;;  %v9672_v11 = vcombine.high %v1299_v20, %v1303_v7 }
 0x204   :  { %v1431_v8 = vld [vmem:[#allocation8 + $0xee8] sm:$0xff] }
 0x205   :  { %4327 = vmatpush1.bf16.msra.mxu0 %v9591_v19  ;;  %v9800_v14 = vcombine.high %v1427_v9, %v1431_v8  ;;  %v1291_v15 = vld [vmem:[#allocation8 + $0xa88] sm:$0xff]  ;;  %v9671_v19 = vcombine.low %v1299_v20, %v1303_v7  ;;  %v9378_v7 = vcombine.high %v1004_v0, %v1008_v1 }
 0x206   :  { %4368 = vmatpush1.bf16.msra.mxu1 %v9719_v22  ;;  %4328 = vmatprep.subr.bf16.mxu0 %v9584_v27  ;;  %v1295_v16 = vld [vmem:[#allocation8 + $0xaa8] sm:$0xff]  ;;  %v9799_v22 = vcombine.low %v1427_v9, %v1431_v8  ;;  %v996_v9 = vld [vmem:[#allocation8 + $0x150] sm:$0xff] }
 0x207   :  { %4369 = vmatprep.subr.bf16.mxu1 %v9712_v28  ;;  %v1419_v17 = vld [vmem:[#allocation8 + $0xe88] sm:$0xff]  ;;  %v9664_v27 = vcombine.high %v1291_v15, %v1295_v16  ;;  %v1000_v8 = vld [vmem:[#allocation8 + $0x170] sm:$0xff] }
 0x208   :  { %v1423_v18 = vld [vmem:[#allocation8 + $0xea8] sm:$0xff] }
 0x209   :  { %4329 = vmatpush1.bf16.msra.mxu0 %v9583_v44  ;;  %v9792_v28 = vcombine.high %v1419_v17, %v1423_v18  ;;  %v1283_v29 = vld [vmem:[#allocation8 + $0xa48] sm:$0xff]  ;;  %v9663_v44 = vcombine.low %v1291_v15, %v1295_v16 }
 0x20a   :  { %4370 = vmatpush1.bf16.msra.mxu1 %v9711_v31  ;;  %4330 = vmatprep.subr.bf16.mxu0 %v9704_v34  ;;  %v1287_v30 = vld [vmem:[#allocation8 + $0xa68] sm:$0xff]  ;;  %v9791_v31 = vcombine.low %v1419_v17, %v1423_v18  ;;  %v9377_v17 = vcombine.low %v1004_v0, %v1008_v1  ;;  %v976_v0 = vld [vmem:[#allocation8 + $0xb0] sm:$0xff] }
 0x20b   :  { %4371 = vmatprep.subr.bf16.mxu1 %v9832_v26  ;;  %v1411_v32 = vld [vmem:[#allocation8 + $0xe48] sm:$0xff]  ;;  %v9656_v34 = vcombine.high %v1283_v29, %v1287_v30  ;;  %v1100_v1 = vld [vmem:[#allocation8 + $0x490] sm:$0xff] }
 0x20c   :  { %v1415_v33 = vld [vmem:[#allocation8 + $0xe68] sm:$0xff] }
 0x20d   :  { %4331 = vmatpush2.bf16.msra.mxu0 %v9703_v40  ;;  %v9784_v26 = vcombine.high %v1411_v32, %v1415_v33  ;;  %v1275_v35 = vld [vmem:[#allocation8 + $0xa08] sm:$0xff]  ;;  %v9655_v40 = vcombine.low %v1283_v29, %v1287_v30 }
 0x20e   :  { %4372 = vmatpush2.bf16.msra.mxu1 %v9831_v42  ;;  %4332 = vmatprep.subr.bf16.mxu0 %v9696_v45  ;;  %v1279_v36 = vld [vmem:[#allocation8 + $0xa28] sm:$0xff]  ;;  %v9783_v42 = vcombine.low %v1411_v32, %v1415_v33  ;;  %v988_v32 = vld [vmem:[#allocation8 + $0x110] sm:$0xff] }
 0x20f   :  { %4373 = vmatprep.subr.bf16.mxu1 %v9824_v46  ;;  %v1403_v38 = vld [vmem:[#allocation8 + $0xe08] sm:$0xff]  ;;  %v9648_v45 = vcombine.high %v1275_v35, %v1279_v36  ;;  %v992_v33 = vld [vmem:[#allocation8 + $0x130] sm:$0xff] }
 0x210   :  { %v1407_v39 = vld [vmem:[#allocation8 + $0xe28] sm:$0xff] }
 0x211   :  { %4333 = vmatpush2.bf16.msra.mxu0 %v9695_v43  ;;  %v9776_v46 = vcombine.high %v1403_v38, %v1407_v39  ;;  %v9647_v43 = vcombine.low %v1275_v35, %v1279_v36  ;;  %v9369_v36 = vcombine.low %v996_v9, %v1000_v8 }
 0x212   :  { %4374 = vmatpush2.bf16.msra.mxu1 %v9823_v56  ;;  %4334 = vmatprep.subr.bf16.mxu0 %v9688_v59  ;;  %v9775_v56 = vcombine.low %v1403_v38, %v1407_v39  ;;  %v9386_v59 = vcombine.high %v1012_v47, %v1016_v48  ;;  %v984_v47 = vld [vmem:[#allocation8 + $0xf0] sm:$0xff] }
 0x213   :  { %4375 = vmatprep.subr.bf16.mxu1 %v9816_v60  ;;  %v11008_v60 = vld [vmem:[#allocation10] sm:$0xff]  ;;  %v1108_v48 = vld [vmem:[#allocation8 + $0x4d0] sm:$0xff] }
 0x214   :  { %v1475_v20 = vrot.slane %v11008_v60, %v10936_v24 }
 0x215   :  { %4335 = vmatpush2.bf16.msra.mxu0 %v9687_v3  ;;  %v1471_v3 = vrot.slane %v11008_v60, %v10928_v21 }
 0x216   :  { %4376 = vmatpush2.bf16.msra.mxu1 %v9815_v4  ;;  %4336 = vmatprep.subr.bf16.mxu0 %v9680_v5  ;;  %v1132_v4 = vld [vmem:[#allocation8 + $0x590] sm:$0xff] }
 0x217   :  { %4377 = vmatprep.subr.bf16.mxu1 %v9808_v6  ;;  %v1136_v5 = vld [vmem:[#allocation8 + $0x5b0] sm:$0xff]  ;;  %v9513_v6 = vcombine.low %v1140_v49, %v1144_v53  ;;  %v9361_v53 = vcombine.low %v988_v32, %v992_v33 }
 0x218   :  { %v1112_v49 = vld [vmem:[#allocation8 + $0x4f0] sm:$0xff] }
 0x219   :  { %4337 = vmatpush2.bf16.msra.mxu0 %v9679_v13 }
 0x21a   :  { %4378 = vmatpush2.bf16.msra.mxu1 %v9807_v10  ;;  %4338 = vmatprep.subr.bf16.mxu0 %v9672_v11  ;;  %v9506_v10 = vcombine.high %v1132_v4, %v1136_v5  ;;  %v1124_v11 = vld [vmem:[#allocation8 + $0x550] sm:$0xff] }
 0x21b   :  { %4379 = vmatprep.subr.bf16.mxu1 %v9800_v14  ;;  %v1128_v14 = vld [vmem:[#allocation8 + $0x570] sm:$0xff] }
 0x21c   :  { %v9498_v30 = vcombine.high %v1124_v11, %v1128_v14  ;;  %v9497_v39 = vcombine.low %v1124_v11, %v1128_v14 }
 0x21d   :  { %4339 = vmatpush2.bf16.msra.mxu0 %v9671_v19  ;;  %v9505_v19 = vcombine.low %v1132_v4, %v1136_v5  ;;  %v9481_v4 = vcombine.low %v1108_v48, %v1112_v49 }
 0x21e   :  { %4380 = vmatpush2.bf16.msra.mxu1 %v9799_v22  ;;  %4340 = vmatprep.subr.bf16.mxu0 %v9664_v27  ;;  %v9370_v22 = vcombine.high %v996_v9, %v1000_v8  ;;  %v1092_v9 = vld [vmem:[#allocation8 + $0x450] sm:$0xff] }
 0x21f   :  { %4381 = vmatprep.subr.bf16.mxu1 %v9792_v28  ;;  %v1096_v8 = vld [vmem:[#allocation8 + $0x470] sm:$0xff] }
 0x220   :  { %v9466_v14 = vcombine.high %v1092_v9, %v1096_v8 }
 0x221   :  { %4341 = vmatpush2.bf16.msra.mxu0 %v9663_v44 }
 0x222   :  { %4382 = vmatpush2.bf16.msra.mxu1 %v9791_v31  ;;  %4342 = vmatprep.subr.bf16.mxu0 %v9656_v34  ;;  %v1116_v31 = vld [vmem:[#allocation8 + $0x510] sm:$0xff] }
 0x223   :  { %4383 = vmatprep.subr.bf16.mxu1 %v9784_v26  ;;  %v1120_v34 = vld [vmem:[#allocation8 + $0x530] sm:$0xff] }
 0x225   :  { %4343 = vmatpush2.bf16.msra.mxu0 %v9655_v40  ;;  %v9362_v40 = vcombine.high %v988_v32, %v992_v33  ;;  %v1080_v32 = vld [vmem:[#allocation8 + $0x3f0] sm:$0xff] }
 0x226   :  { %4384 = vmatpush2.bf16.msra.mxu1 %v9783_v42  ;;  %4344 = vmatprep.subr.bf16.mxu0 %v9648_v45  ;;  %v9490_v45 = vcombine.high %v1116_v31, %v1120_v34  ;;  %v1204_v33 = vld [vmem:[#allocation8 + $0x7d0] sm:$0xff] }
 0x227   :  { %4385 = vmatprep.subr.bf16.mxu1 %v9776_v46  ;;  %v980_v46 = vld [vmem:[#allocation8 + $0xd0] sm:$0xff] }
 0x229   :  { %4345 = vmatpush2.bf16.msra.mxu0 %v9647_v43  ;;  %v9489_v43 = vcombine.low %v1116_v31, %v1120_v34 }
 0x22a   :  { %4386 = vmatpush2.bf16.msra.mxu1 %v9775_v56  ;;  %4396 = vmatprep.subr.bf16.mxu0 %v9386_v59  ;;  %v9354_v56 = vcombine.high %v980_v46, %v984_v47  ;;  %v9482_v59 = vcombine.high %v1108_v48, %v1112_v49  ;;  %v1060_v49 = vld [vmem:[#allocation8 + $0x350] sm:$0xff] }
 0x22b   :  { %4437 = vmatprep.subr.bf16.mxu1 %v9514_v62  ;;  %v972_v62 = vld [vmem:[#allocation8 + $0x90] sm:$0xff] }
 0x22c   :  { %4347 = vmatmul.mubr.bf16.vlgmr.msra.gmra.mxu0 %v10998_v41  ;;  %v4102_v13 = vpop.f32.mrf.mxu0  ;;  %v4143_v16 = vpop.f32.mrf.mxu1  ;;  %v9346_v5 = vcombine.high %v972_v62, %v976_v0 }
 0x22d   :  { %4388 = vmatmul.mubr.bf16.vlgmr.msra.gmra.mxu1 %v10996_v37  ;;  %v4103_v15 = vadd.f32 %v4102_v13, %v1471_v3  ;;  %4397 = vmatpush1.bf16.msra.mxu0 %v9385_v2  ;;  %v1104_v2 = vld [vmem:[#allocation8 + $0x4b0] sm:$0xff]  ;;  %v9353_v3 = vcombine.low %v980_v46, %v984_v47  ;;  %v9345_v13 = vcombine.low %v972_v62, %v976_v0 }
 0x22e   :  { %4428 = vmatprep.mubr.bf16.mxu0 %v10951_v51  ;;  %4438 = vmatpush1.bf16.msra.mxu1 %v9513_v6  ;;  %v4104_v18 = vpop.f32.mrf.mxu0  ;;  %v4145_v29 = vpop.f32.mrf.mxu1  ;;  %v9474_v6 = vcombine.high %v1100_v1, %v1104_v2 }
 0x22f   :  { %v11017_v27 = vadd.f32 %v4143_v16, %v4103_v15  ;;  %4469 = vmatprep.mubr.bf16.mxu1 %v10955_v55  ;;  %v4105_v28 = vadd.f32 %v4104_v18, %v1475_v20  ;;  %4398 = vmatprep.subr.bf16.mxu0 %v9378_v7  ;;  %v964_v20 = vld [vmem:[#allocation8 + $0x50] sm:$0xff] }
 0x230   :  { %4439 = vmatprep.subr.bf16.mxu1 %v9506_v10  ;;  %v4106_v44 = vpop.f32.mrf.mxu0  ;;  %v4147_v35 = vpop.f32.mrf.mxu1  ;;  %v968_v7 = vld [vmem:[#allocation8 + $0x70] sm:$0xff]  ;;  %v9473_v10 = vcombine.low %v1100_v1, %v1104_v2 }
 0x231   :  { %v11020_v26 = vadd.f32 %v4145_v29, %v4105_v28  ;;  %4399 = vmatpush1.bf16.msra.mxu0 %v9377_v17  ;;  %v9338_v11 = vcombine.high %v964_v20, %v968_v7  ;;  %v956_v15 = vld [vmem:[#allocation8 + $0x10] sm:$0xff] }
 0x232   :  { %4440 = vmatpush1.bf16.msra.mxu1 %v9505_v19  ;;  %v4107_v38 = vpop.f32.mrf.mxu0  ;;  %4400 = vmatprep.subr.bf16.mxu0 %v9370_v22  ;;  %v4148_v42 = vpop.f32.mrf.mxu1  ;;  %v960_v16 = vld [vmem:[#allocation8 + $0x30] sm:$0xff]  ;;  %v9337_v19 = vcombine.low %v964_v20, %v968_v7  ;;  %v9465_v22 = vcombine.low %v1092_v9, %v1096_v8 }
 0x233   :  { %4441 = vmatprep.subr.bf16.mxu1 %v9498_v30  ;;  %v1084_v17 = vld [vmem:[#allocation8 + $0x410] sm:$0xff]  ;;  %v9330_v28 = vcombine.high %v956_v15, %v960_v16  ;;  %v9329_v31 = vcombine.low %v956_v15, %v960_v16 }
 0x234   :  { %v1088_v18 = vld [vmem:[#allocation8 + $0x430] sm:$0xff] }
 0x235   :  { %4401 = vmatpush1.bf16.msra.mxu0 %v9369_v36  ;;  %v9458_v29 = vcombine.high %v1084_v17, %v1088_v18  ;;  %v1076_v30 = vld [vmem:[#allocation8 + $0x3d0] sm:$0xff]  ;;  %v9457_v34 = vcombine.low %v1084_v17, %v1088_v18 }
 0x236   :  { %4442 = vmatpush1.bf16.msra.mxu1 %v9497_v39  ;;  %4402 = vmatprep.subr.bf16.mxu0 %v9362_v40  ;;  %v1208_v44 = vld [vmem:[#allocation8 + $0x7f0] sm:$0xff]  ;;  %v9450_v35 = vcombine.high %v1076_v30, %v1080_v32 }
 0x237   :  { %4443 = vmatprep.subr.bf16.mxu1 %v9490_v45  ;;  %v9578_v36 = vcombine.high %v1204_v33, %v1208_v44  ;;  %v1068_v38 = vld [vmem:[#allocation8 + $0x390] sm:$0xff]  ;;  %v9449_v45 = vcombine.low %v1076_v30, %v1080_v32  ;;  %v9577_v46 = vcombine.low %v1204_v33, %v1208_v44 }
 0x238   :  { %v1072_v39 = vld [vmem:[#allocation8 + $0x3b0] sm:$0xff] }
 0x239   :  { %4403 = vmatpush1.bf16.msra.mxu0 %v9361_v53  ;;  %v1196_v40 = vld [vmem:[#allocation8 + $0x790] sm:$0xff]  ;;  %v9442_v47 = vcombine.high %v1068_v38, %v1072_v39 }
 0x23a   :  { %4444 = vmatpush1.bf16.msra.mxu1 %v9489_v43  ;;  %4404 = vmatprep.subr.bf16.mxu0 %v9354_v56  ;;  %v1200_v42 = vld [vmem:[#allocation8 + $0x7b0] sm:$0xff] }
 0x23b   :  { %4445 = vmatprep.subr.bf16.mxu1 %v9482_v59  ;;  %v9570_v48 = vcombine.high %v1196_v40, %v1200_v42  ;;  %v1064_v53 = vld [vmem:[#allocation8 + $0x370] sm:$0xff]  ;;  %v9441_v59 = vcombine.low %v1068_v38, %v1072_v39  ;;  %v9569_v62 = vcombine.low %v1196_v40, %v1200_v42 }
 0x23c   :  { %v1188_v43 = vld [vmem:[#allocation8 + $0x750] sm:$0xff]  ;;  %v9434_v0 = vcombine.high %v1060_v49, %v1064_v53 }
 0x23d   :  { %4405 = vmatpush1.bf16.msra.mxu0 %v9353_v3  ;;  %v1192_v56 = vld [vmem:[#allocation8 + $0x770] sm:$0xff] }
 0x23e   :  { %4446 = vmatpush1.bf16.msra.mxu1 %v9481_v4  ;;  %4406 = vmatprep.subr.bf16.mxu0 %v9346_v5  ;;  %v9562_v1 = vcombine.high %v1188_v43, %v1192_v56  ;;  %v1052_v2 = vld [vmem:[#allocation8 + $0x310] sm:$0xff]  ;;  %v9561_v20 = vcombine.low %v1188_v43, %v1192_v56 }
 0x23f   :  { %4447 = vmatprep.subr.bf16.mxu1 %v9474_v6  ;;  %v1056_v3 = vld [vmem:[#allocation8 + $0x330] sm:$0xff]  ;;  %v9433_v6 = vcombine.low %v1060_v49, %v1064_v53 }
 0x240   :  { %v1180_v4 = vld [vmem:[#allocation8 + $0x710] sm:$0xff]  ;;  %v9426_v7 = vcombine.high %v1052_v2, %v1056_v3 }
 0x241   :  { %4407 = vmatpush1.bf16.msra.mxu0 %v9345_v13  ;;  %v1184_v5 = vld [vmem:[#allocation8 + $0x730] sm:$0xff] }
 0x242   :  { %4448 = vmatpush1.bf16.msra.mxu1 %v9473_v10  ;;  %4408 = vmatprep.subr.bf16.mxu0 %v9338_v11  ;;  %v9554_v9 = vcombine.high %v1180_v4, %v1184_v5  ;;  %v1044_v8 = vld [vmem:[#allocation8 + $0x2d0] sm:$0xff]  ;;  %v9553_v15 = vcombine.low %v1180_v4, %v1184_v5 }
 0x243   :  { %4449 = vmatprep.subr.bf16.mxu1 %v9466_v14  ;;  %v1048_v13 = vld [vmem:[#allocation8 + $0x2f0] sm:$0xff]  ;;  %v9425_v14 = vcombine.low %v1052_v2, %v1056_v3 }
 0x244   :  { %v1172_v10 = vld [vmem:[#allocation8 + $0x6d0] sm:$0xff]  ;;  %v9418_v16 = vcombine.high %v1044_v8, %v1048_v13 }
 0x245   :  { %4409 = vmatpush1.bf16.msra.mxu0 %v9337_v19  ;;  %v1176_v11 = vld [vmem:[#allocation8 + $0x6f0] sm:$0xff] }
 0x246   :  { %4450 = vmatpush1.bf16.msra.mxu1 %v9465_v22  ;;  %4410 = vmatprep.subr.bf16.mxu0 %v9330_v28  ;;  %v9546_v17 = vcombine.high %v1172_v10, %v1176_v11  ;;  %v1036_v18 = vld [vmem:[#allocation8 + $0x290] sm:$0xff]  ;;  %v9545_v30 = vcombine.low %v1172_v10, %v1176_v11 }
 0x247   :  { %4451 = vmatprep.subr.bf16.mxu1 %v9458_v29  ;;  %v1040_v19 = vld [vmem:[#allocation8 + $0x2b0] sm:$0xff]  ;;  %v9417_v29 = vcombine.low %v1044_v8, %v1048_v13 }
 0x248   :  { %v1164_v22 = vld [vmem:[#allocation8 + $0x690] sm:$0xff]  ;;  %v9410_v32 = vcombine.high %v1036_v18, %v1040_v19 }
 0x249   :  { %4411 = vmatpush1.bf16.msra.mxu0 %v9329_v31  ;;  %v1168_v28 = vld [vmem:[#allocation8 + $0x6b0] sm:$0xff] }
 0x24a   :  { %4452 = vmatpush1.bf16.msra.mxu1 %v9457_v34  ;;  %4412 = vmatprep.subr.bf16.mxu0 %v9450_v35  ;;  %v9538_v33 = vcombine.high %v1164_v22, %v1168_v28  ;;  %v1028_v44 = vld [vmem:[#allocation8 + $0x250] sm:$0xff]  ;;  %v9537_v38 = vcombine.low %v1164_v22, %v1168_v28 }
 0x24b   :  { %4453 = vmatprep.subr.bf16.mxu1 %v9578_v36  ;;  %v1032_v31 = vld [vmem:[#allocation8 + $0x270] sm:$0xff]  ;;  %v9409_v36 = vcombine.low %v1036_v18, %v1040_v19 }
 0x24c   :  { %v1156_v34 = vld [vmem:[#allocation8 + $0x650] sm:$0xff]  ;;  %v9402_v39 = vcombine.high %v1028_v44, %v1032_v31 }
 0x24d   :  { %4413 = vmatpush2.bf16.msra.mxu0 %v9449_v45  ;;  %v1160_v35 = vld [vmem:[#allocation8 + $0x670] sm:$0xff] }
 0x24e   :  { %4454 = vmatpush2.bf16.msra.mxu1 %v9577_v46  ;;  %4414 = vmatprep.subr.bf16.mxu0 %v9442_v47  ;;  %v9530_v40 = vcombine.high %v1156_v34, %v1160_v35  ;;  %v1020_v42 = vld [vmem:[#allocation8 + $0x210] sm:$0xff]  ;;  %v9529_v49 = vcombine.low %v1156_v34, %v1160_v35 }
 0x24f   :  { %4455 = vmatprep.subr.bf16.mxu1 %v9570_v48  ;;  %v1024_v45 = vld [vmem:[#allocation8 + $0x230] sm:$0xff]  ;;  %v9401_v48 = vcombine.low %v1028_v44, %v1032_v31 }
 0x250   :  { %v1148_v46 = vld [vmem:[#allocation8 + $0x610] sm:$0xff]  ;;  %v9394_v53 = vcombine.high %v1020_v42, %v1024_v45 }
 0x251   :  { %4415 = vmatpush2.bf16.msra.mxu0 %v9441_v59  ;;  %v1152_v47 = vld [vmem:[#allocation8 + $0x630] sm:$0xff] }
 0x252   :  { %4456 = vmatpush2.bf16.msra.mxu1 %v9569_v62  ;;  %4416 = vmatprep.subr.bf16.mxu0 %v9434_v0  ;;  %v9522_v43 = vcombine.high %v1148_v46, %v1152_v47  ;;  %v1268_v56 = vld [vmem:[#allocation8 + $0x9d0] sm:$0xff]  ;;  %v9521_v2 = vcombine.low %v1148_v46, %v1152_v47 }
 0x253   :  { %4457 = vmatprep.subr.bf16.mxu1 %v9562_v1  ;;  %v1272_v59 = vld [vmem:[#allocation8 + $0x9f0] sm:$0xff]  ;;  %v9393_v1 = vcombine.low %v1020_v42, %v1024_v45 }
 0x254   :  { %v1396_v62 = vld [vmem:[#allocation8 + $0xdd0] sm:$0xff]  ;;  %v9642_v3 = vcombine.high %v1268_v56, %v1272_v59 }
 0x255   :  { %4417 = vmatpush2.bf16.msra.mxu0 %v9433_v6  ;;  %v1400_v0 = vld [vmem:[#allocation8 + $0xdf0] sm:$0xff] }
 0x256   :  { %4458 = vmatpush2.bf16.msra.mxu1 %v9561_v20  ;;  %4418 = vmatprep.subr.bf16.mxu0 %v9426_v7  ;;  %v9770_v4 = vcombine.high %v1396_v62, %v1400_v0  ;;  %v1260_v5 = vld [vmem:[#allocation8 + $0x990] sm:$0xff]  ;;  %v9641_v20 = vcombine.low %v1268_v56, %v1272_v59  ;;  %v9769_v8 = vcombine.low %v1396_v62, %v1400_v0 }
 0x257   :  { %4459 = vmatprep.subr.bf16.mxu1 %v9554_v9  ;;  %v1264_v6 = vld [vmem:[#allocation8 + $0x9b0] sm:$0xff] }
 0x258   :  { %v1388_v7 = vld [vmem:[#allocation8 + $0xd90] sm:$0xff]  ;;  %v9634_v13 = vcombine.high %v1260_v5, %v1264_v6  ;;  %v9633_v22 = vcombine.low %v1260_v5, %v1264_v6 }
 0x259   :  { %4419 = vmatpush2.bf16.msra.mxu0 %v9425_v14  ;;  %v1392_v9 = vld [vmem:[#allocation8 + $0xdb0] sm:$0xff] }
 0x25a   :  { %4460 = vmatpush2.bf16.msra.mxu1 %v9553_v15  ;;  %4420 = vmatprep.subr.bf16.mxu0 %v9418_v16  ;;  %v1252_v10 = vld [vmem:[#allocation8 + $0x950] sm:$0xff]  ;;  %v9762_v15 = vcombine.high %v1388_v7, %v1392_v9 }
 0x25b   :  { %4461 = vmatprep.subr.bf16.mxu1 %v9546_v17  ;;  %v1256_v11 = vld [vmem:[#allocation8 + $0x970] sm:$0xff] }
 0x25c   :  { %v1380_v16 = vld [vmem:[#allocation8 + $0xd50] sm:$0xff]  ;;  %v9625_v42 = vcombine.low %v1252_v10, %v1256_v11 }
 0x25d   :  { %4421 = vmatpush2.bf16.msra.mxu0 %v9417_v29  ;;  %v1384_v17 = vld [vmem:[#allocation8 + $0xd70] sm:$0xff]  ;;  %v9761_v29 = vcombine.low %v1388_v7, %v1392_v9 }
 0x25e   :  { %4462 = vmatpush2.bf16.msra.mxu1 %v9545_v30  ;;  %4422 = vmatprep.subr.bf16.mxu0 %v9410_v32  ;;  %v9626_v30 = vcombine.high %v1252_v10, %v1256_v11  ;;  %v1244_v31 = vld [vmem:[#allocation8 + $0x910] sm:$0xff]  ;;  %v9753_v46 = vcombine.low %v1380_v16, %v1384_v17 }
 0x25f   :  { %4463 = vmatprep.subr.bf16.mxu1 %v9538_v33  ;;  %v1248_v34 = vld [vmem:[#allocation8 + $0x930] sm:$0xff] }
 0x260   :  { %v9618_v47 = vcombine.high %v1244_v31, %v1248_v34  ;;  %v1368_v56 = vld [vmem:[#allocation8 + $0xcf0] sm:$0xff]  ;;  %v9617_v59 = vcombine.low %v1244_v31, %v1248_v34 }
 0x261   :  { %4423 = vmatpush2.bf16.msra.mxu0 %v9409_v36  ;;  %v1372_v36 = vld [vmem:[#allocation8 + $0xd10] sm:$0xff] }
 0x262   :  { %4464 = vmatpush2.bf16.msra.mxu1 %v9537_v38  ;;  %4424 = vmatprep.subr.bf16.mxu0 %v9402_v39  ;;  %v1376_v38 = vld [vmem:[#allocation8 + $0xd30] sm:$0xff] }
 0x263   :  { %4465 = vmatprep.subr.bf16.mxu1 %v9530_v40  ;;  %v9745_v62 = vcombine.low %v1372_v36, %v1376_v38  ;;  %v1360_v5 = vld [vmem:[#allocation8 + $0xcb0] sm:$0xff] }
 0x264   :  { %v1348_v10 = vld [vmem:[#allocation8 + $0xc50] sm:$0xff] }
 0x265   :  { %4425 = vmatpush2.bf16.msra.mxu0 %v9401_v48  ;;  %v9746_v48 = vcombine.high %v1372_v36, %v1376_v38  ;;  %v1352_v11 = vld [vmem:[#allocation8 + $0xc70] sm:$0xff] }
 0x266   :  { %4466 = vmatpush2.bf16.msra.mxu1 %v9529_v49  ;;  %4426 = vmatprep.subr.bf16.mxu0 %v9394_v53  ;;  %v1236_v49 = vld [vmem:[#allocation8 + $0x8d0] sm:$0xff] }
 0x267   :  { %4467 = vmatprep.subr.bf16.mxu1 %v9522_v43  ;;  %v1240_v53 = vld [vmem:[#allocation8 + $0x8f0] sm:$0xff] }
 0x268   :  { %v1364_v43 = vld [vmem:[#allocation8 + $0xcd0] sm:$0xff]  ;;  %v9610_v0 = vcombine.high %v1236_v49, %v1240_v53  ;;  %v9609_v6 = vcombine.low %v1236_v49, %v1240_v53 }
 0x269   :  { %4427 = vmatpush2.bf16.msra.mxu0 %v9393_v1  ;;  %v9738_v1 = vcombine.high %v1364_v43, %v1368_v56  ;;  %v1336_v31 = vld [vmem:[#allocation8 + $0xbf0] sm:$0xff] }
 0x26a   :  { %4468 = vmatpush2.bf16.msra.mxu1 %v9521_v2  ;;  %4478 = vmatprep.subr.bf16.mxu0 %v9642_v3  ;;  %v1228_v2 = vld [vmem:[#allocation8 + $0x890] sm:$0xff] }
 0x26b   :  { %4519 = vmatprep.subr.bf16.mxu1 %v9770_v4  ;;  %v1232_v3 = vld [vmem:[#allocation8 + $0x8b0] sm:$0xff] }
 0x26c   :  { %v4184_v14 = vpop.f32.mrf.mxu0  ;;  %4429 = vmatmul.mubr.bf16.vlgmr.msra.gmra.mxu0 %v10953_v54  ;;  %v4225_v19 = vpop.f32.mrf.mxu1  ;;  %v1356_v4 = vld [vmem:[#allocation8 + $0xc90] sm:$0xff]  ;;  %v9602_v7 = vcombine.high %v1228_v2, %v1232_v3 }
 0x26d   :  { %v4185_v18 = vadd.f32 %v4184_v14, %v11017_v27  ;;  %4470 = vmatmul.mubr.bf16.vlgmr.msra.gmra.mxu1 %v10949_v50  ;;  %4479 = vmatpush1.bf16.msra.mxu0 %v9641_v20  ;;  %v9754_v27 = vcombine.high %v1380_v16, %v1384_v17  ;;  %v9737_v20 = vcombine.low %v1364_v43, %v1368_v56  ;;  %v1460_v34 = vld [vmem:[#allocation8 + $0xfd0] sm:$0xff] }
 0x26e   :  { %4510 = vmatprep.mubr.bf16.mxu0 %v10979_v57  ;;  %4520 = vmatpush1.bf16.msra.mxu1 %v9769_v8  ;;  %v4186_v28 = vpop.f32.mrf.mxu0  ;;  %v4227_v44 = vpop.f32.mrf.mxu1  ;;  %v9730_v9 = vcombine.high %v1356_v4, %v1360_v5  ;;  %v1220_v8 = vld [vmem:[#allocation8 + $0x850] sm:$0xff]  ;;  %v9601_v14 = vcombine.low %v1228_v2, %v1232_v3  ;;  %v9722_v17 = vcombine.high %v1348_v10, %v1352_v11 }
 0x26f   :  { %v11026_v32 = vadd.f32 %v4225_v19, %v4185_v18  ;;  %4551 = vmatprep.mubr.bf16.mxu1 %v10987_v63  ;;  %v4187_v33 = vadd.f32 %v4186_v28, %v11020_v26  ;;  %4480 = vmatprep.subr.bf16.mxu0 %v9634_v13  ;;  %v1224_v13 = vld [vmem:[#allocation8 + $0x870] sm:$0xff] }
 0x270   :  { %v4188_v35 = vpop.f32.mrf.mxu0  ;;  %4521 = vmatprep.subr.bf16.mxu1 %v9762_v15  ;;  %v4229_v40 = vpop.f32.mrf.mxu1  ;;  %v9729_v15 = vcombine.low %v1356_v4, %v1360_v5  ;;  %v9594_v16 = vcombine.high %v1220_v8, %v1224_v13  ;;  %v1212_v18 = vld [vmem:[#allocation8 + $0x810] sm:$0xff] }
 0x271   :  { %v11030_v39 = vadd.f32 %v4227_v44, %v4187_v33  ;;  %4481 = vmatpush1.bf16.msra.mxu0 %v9633_v22  ;;  %v1216_v19 = vld [vmem:[#allocation8 + $0x830] sm:$0xff] }
 0x272   :  { %4522 = vmatpush1.bf16.msra.mxu1 %v9761_v29  ;;  %v4189_v45 = vpop.f32.mrf.mxu0  ;;  %4482 = vmatprep.subr.bf16.mxu0 %v9626_v30  ;;  %v4230_v26 = vpop.f32.mrf.mxu1  ;;  %v1340_v22 = vld [vmem:[#allocation8 + $0xc10] sm:$0xff]  ;;  %v9593_v29 = vcombine.low %v1220_v8, %v1224_v13  ;;  %v9721_v30 = vcombine.low %v1348_v10, %v1352_v11  ;;  %v9586_v33 = vcombine.high %v1212_v18, %v1216_v19 }
 0x273   :  { %4523 = vmatprep.subr.bf16.mxu1 %v9754_v27  ;;  %v1344_v28 = vld [vmem:[#allocation8 + $0xc30] sm:$0xff]  ;;  %v9585_v36 = vcombine.low %v1212_v18, %v1216_v19 }
 0x274   :  { %v9714_v44 = vcombine.high %v1340_v22, %v1344_v28  ;;  %v1332_v27 = vld [vmem:[#allocation8 + $0xbd0] sm:$0xff]  ;;  %v9713_v38 = vcombine.low %v1340_v22, %v1344_v28 }
 0x275   :  { %4483 = vmatpush1.bf16.msra.mxu0 %v9625_v42  ;;  %v1464_v35 = vld [vmem:[#allocation8 + $0xff0] sm:$0xff]  ;;  %v9706_v40 = vcombine.high %v1332_v27, %v1336_v31 }
 0x276   :  { %4524 = vmatpush1.bf16.msra.mxu1 %v9753_v46  ;;  %4484 = vmatprep.subr.bf16.mxu0 %v9618_v47  ;;  %v9834_v42 = vcombine.high %v1460_v34, %v1464_v35  ;;  %v1324_v45 = vld [vmem:[#allocation8 + $0xb90] sm:$0xff]  ;;  %v9833_v49 = vcombine.low %v1460_v34, %v1464_v35 }
 0x277   :  { %4525 = vmatprep.subr.bf16.mxu1 %v9746_v48  ;;  %v1328_v46 = vld [vmem:[#allocation8 + $0xbb0] sm:$0xff]  ;;  %v9705_v48 = vcombine.low %v1332_v27, %v1336_v31 }
 0x278   :  { %v1452_v47 = vld [vmem:[#allocation8 + $0xf90] sm:$0xff]  ;;  %v9698_v53 = vcombine.high %v1324_v45, %v1328_v46 }
 0x279   :  { %4485 = vmatpush1.bf16.msra.mxu0 %v9617_v59  ;;  %v1456_v26 = vld [vmem:[#allocation8 + $0xfb0] sm:$0xff] }
 0x27a   :  { %4526 = vmatpush1.bf16.msra.mxu1 %v9745_v62  ;;  %4486 = vmatprep.subr.bf16.mxu0 %v9610_v0  ;;  %v9826_v43 = vcombine.high %v1452_v47, %v1456_v26  ;;  %v1316_v56 = vld [vmem:[#allocation8 + $0xb50] sm:$0xff]  ;;  %v9825_v2 = vcombine.low %v1452_v47, %v1456_v26 }
 0x27b   :  { %4527 = vmatprep.subr.bf16.mxu1 %v9738_v1  ;;  %v1320_v59 = vld [vmem:[#allocation8 + $0xb70] sm:$0xff]  ;;  %v9697_v1 = vcombine.low %v1324_v45, %v1328_v46 }
 0x27c   :  { %v1444_v62 = vld [vmem:[#allocation8 + $0xf50] sm:$0xff]  ;;  %v9690_v3 = vcombine.high %v1316_v56, %v1320_v59 }
 0x27d   :  { %4487 = vmatpush1.bf16.msra.mxu0 %v9609_v6  ;;  %v1448_v0 = vld [vmem:[#allocation8 + $0xf70] sm:$0xff] }
 0x27e   :  { %4528 = vmatpush1.bf16.msra.mxu1 %v9737_v20  ;;  %4488 = vmatprep.subr.bf16.mxu0 %v9602_v7  ;;  %v9818_v4 = vcombine.high %v1444_v62, %v1448_v0  ;;  %v1308_v5 = vld [vmem:[#allocation8 + $0xb10] sm:$0xff]  ;;  %v9817_v8 = vcombine.low %v1444_v62, %v1448_v0  ;;  %v1013_v0 = vld [vmem:[#allocation8 + $0x1d8] sm:$0xff] }
 0x27f   :  { %4529 = vmatprep.subr.bf16.mxu1 %v9730_v9  ;;  %v1312_v6 = vld [vmem:[#allocation8 + $0xb30] sm:$0xff]  ;;  %v9689_v9 = vcombine.low %v1316_v56, %v1320_v59 }
 0x280   :  { %v1436_v20 = vld [vmem:[#allocation8 + $0xf10] sm:$0xff]  ;;  %v9682_v13 = vcombine.high %v1308_v5, %v1312_v6 }
 0x281   :  { %4489 = vmatpush1.bf16.msra.mxu0 %v9601_v14  ;;  %v1440_v7 = vld [vmem:[#allocation8 + $0xf30] sm:$0xff] }
 0x282   :  { %4530 = vmatpush1.bf16.msra.mxu1 %v9729_v15  ;;  %4490 = vmatprep.subr.bf16.mxu0 %v9594_v16  ;;  %v9810_v10 = vcombine.high %v1436_v20, %v1440_v7  ;;  %v1300_v11 = vld [vmem:[#allocation8 + $0xad0] sm:$0xff]  ;;  %v9809_v18 = vcombine.low %v1436_v20, %v1440_v7  ;;  %v1005_v7 = vld [vmem:[#allocation8 + $0x198] sm:$0xff] }
 0x283   :  { %4531 = vmatprep.subr.bf16.mxu1 %v9722_v17  ;;  %v1304_v14 = vld [vmem:[#allocation8 + $0xaf0] sm:$0xff]  ;;  %v9681_v17 = vcombine.low %v1308_v5, %v1312_v6 }
 0x284   :  { %v1428_v15 = vld [vmem:[#allocation8 + $0xed0] sm:$0xff]  ;;  %v9674_v19 = vcombine.high %v1300_v11, %v1304_v14 }
 0x285   :  { %4491 = vmatpush1.bf16.msra.mxu0 %v9593_v29  ;;  %v1432_v16 = vld [vmem:[#allocation8 + $0xef0] sm:$0xff] }
 0x286   :  { %4532 = vmatpush1.bf16.msra.mxu1 %v9721_v30  ;;  %4492 = vmatprep.subr.bf16.mxu0 %v9586_v33  ;;  %v9802_v22 = vcombine.high %v1428_v15, %v1432_v16  ;;  %v1292_v28 = vld [vmem:[#allocation8 + $0xa90] sm:$0xff]  ;;  %v9801_v27 = vcombine.low %v1428_v15, %v1432_v16  ;;  %v1483_v15 = vrot.slane %v11008_v60, %v10939_v25 }
 0x287   :  { %4533 = vmatprep.subr.bf16.mxu1 %v9714_v44  ;;  %v1296_v29 = vld [vmem:[#allocation8 + $0xab0] sm:$0xff]  ;;  %v9673_v44 = vcombine.low %v1300_v11, %v1304_v14  ;;  %v1137_v11 = vld [vmem:[#allocation8 + $0x5b8] sm:$0xff] }
 0x288   :  { %v1420_v30 = vld [vmem:[#allocation8 + $0xe90] sm:$0xff]  ;;  %v9666_v31 = vcombine.high %v1292_v28, %v1296_v29 }
 0x289   :  { %4493 = vmatpush1.bf16.msra.mxu0 %v9585_v36  ;;  %v1424_v33 = vld [vmem:[#allocation8 + $0xeb0] sm:$0xff] }
 0x28a   :  { %4534 = vmatpush1.bf16.msra.mxu1 %v9713_v38  ;;  %4494 = vmatprep.subr.bf16.mxu0 %v9706_v40  ;;  %v9794_v34 = vcombine.high %v1420_v30, %v1424_v33  ;;  %v1284_v35 = vld [vmem:[#allocation8 + $0xa50] sm:$0xff]  ;;  %v9793_v45 = vcombine.low %v1420_v30, %v1424_v33 }
 0x28b   :  { %4535 = vmatprep.subr.bf16.mxu1 %v9834_v42  ;;  %v1288_v36 = vld [vmem:[#allocation8 + $0xa70] sm:$0xff]  ;;  %v9665_v42 = vcombine.low %v1292_v28, %v1296_v29  ;;  %v1125_v28 = vld [vmem:[#allocation8 + $0x558] sm:$0xff] }
 0x28c   :  { %v1412_v38 = vld [vmem:[#allocation8 + $0xe50] sm:$0xff]  ;;  %v9658_v46 = vcombine.high %v1284_v35, %v1288_v36  ;;  %v1129_v29 = vld [vmem:[#allocation8 + $0x578] sm:$0xff] }
 0x28d   :  { %4495 = vmatpush2.bf16.msra.mxu0 %v9705_v48  ;;  %v1416_v40 = vld [vmem:[#allocation8 + $0xe70] sm:$0xff] }
 0x28e   :  { %4536 = vmatpush2.bf16.msra.mxu1 %v9833_v49  ;;  %4496 = vmatprep.subr.bf16.mxu0 %v9698_v53  ;;  %v9786_v47 = vcombine.high %v1412_v38, %v1416_v40  ;;  %v1276_v26 = vld [vmem:[#allocation8 + $0xa10] sm:$0xff]  ;;  %v9785_v56 = vcombine.low %v1412_v38, %v1416_v40  ;;  %v9500_v38 = vcombine.high %v1125_v28, %v1129_v29  ;;  %v989_v40 = vld [vmem:[#allocation8 + $0x118] sm:$0xff] }
 0x28f   :  { %4537 = vmatprep.subr.bf16.mxu1 %v9826_v43  ;;  %v1280_v48 = vld [vmem:[#allocation8 + $0xa30] sm:$0xff]  ;;  %v9657_v43 = vcombine.low %v1284_v35, %v1288_v36 }
 0x290   :  { %v1404_v49 = vld [vmem:[#allocation8 + $0xe10] sm:$0xff]  ;;  %v9650_v59 = vcombine.high %v1276_v26, %v1280_v48 }
 0x291   :  { %4497 = vmatpush2.bf16.msra.mxu0 %v9697_v1  ;;  %v1408_v53 = vld [vmem:[#allocation8 + $0xe30] sm:$0xff]  ;;  %v1017_v1 = vld [vmem:[#allocation8 + $0x1f8] sm:$0xff] }
 0x292   :  { %4538 = vmatpush2.bf16.msra.mxu1 %v9825_v2  ;;  %4498 = vmatprep.subr.bf16.mxu0 %v9690_v3  ;;  %v9778_v62 = vcombine.high %v1404_v49, %v1408_v53  ;;  %v1141_v2 = vld [vmem:[#allocation8 + $0x5d8] sm:$0xff]  ;;  %v9777_v5 = vcombine.low %v1404_v49, %v1408_v53  ;;  %v9388_v6 = vcombine.high %v1013_v0, %v1017_v1 }
 0x293   :  { %4539 = vmatprep.subr.bf16.mxu1 %v9818_v4  ;;  %v1145_v3 = vld [vmem:[#allocation8 + $0x5f8] sm:$0xff]  ;;  %v9649_v4 = vcombine.low %v1276_v26, %v1280_v48  ;;  %v9499_v53 = vcombine.low %v1125_v28, %v1129_v29 }
 0x294   :  { %v9516_v20 = vcombine.high %v1141_v2, %v1145_v3  ;;  %v9515_v14 = vcombine.low %v1141_v2, %v1145_v3  ;;  %v957_v29 = vld [vmem:[#allocation8 + $0x18] sm:$0xff] }
 0x295   :  { %4499 = vmatpush2.bf16.msra.mxu0 %v9689_v9  ;;  %v1009_v9 = vld [vmem:[#allocation8 + $0x1b8] sm:$0xff] }
 0x296   :  { %4540 = vmatpush2.bf16.msra.mxu1 %v9817_v8  ;;  %4500 = vmatprep.subr.bf16.mxu0 %v9682_v13  ;;  %v1479_v8 = vrot.slane %v11008_v60, %v10933_v23  ;;  %v9387_v13 = vcombine.low %v1013_v0, %v1017_v1  ;;  %v9380_v16 = vcombine.high %v1005_v7, %v1009_v9  ;;  %v1109_v0 = vld [vmem:[#allocation8 + $0x4d8] sm:$0xff] }
 0x297   :  { %4541 = vmatprep.subr.bf16.mxu1 %v9810_v10  ;;  %v1133_v10 = vld [vmem:[#allocation8 + $0x598] sm:$0xff] }
 0x298   :  { %v9507_v60 = vcombine.low %v1133_v10, %v1137_v11  ;;  %v1113_v1 = vld [vmem:[#allocation8 + $0x4f8] sm:$0xff] }
 0x299   :  { %4501 = vmatpush2.bf16.msra.mxu0 %v9681_v17  ;;  %v997_v17 = vld [vmem:[#allocation8 + $0x158] sm:$0xff] }
 0x29a   :  { %4542 = vmatpush2.bf16.msra.mxu1 %v9809_v18  ;;  %4502 = vmatprep.subr.bf16.mxu0 %v9674_v19  ;;  %v1001_v18 = vld [vmem:[#allocation8 + $0x178] sm:$0xff] }
 0x29b   :  { %4543 = vmatprep.subr.bf16.mxu1 %v9802_v22  ;;  %v9508_v22 = vcombine.high %v1133_v10, %v1137_v11  ;;  %v9371_v48 = vcombine.low %v997_v17, %v1001_v18 }
 0x29d   :  { %4503 = vmatpush2.bf16.msra.mxu0 %v9673_v44  ;;  %v9379_v44 = vcombine.low %v1005_v7, %v1009_v9  ;;  %v1101_v7 = vld [vmem:[#allocation8 + $0x498] sm:$0xff] }
 0x29e   :  { %4544 = vmatpush2.bf16.msra.mxu1 %v9801_v27  ;;  %4504 = vmatprep.subr.bf16.mxu0 %v9666_v31  ;;  %v9372_v31 = vcombine.high %v997_v17, %v1001_v18  ;;  %v1105_v9 = vld [vmem:[#allocation8 + $0x4b8] sm:$0xff] }
 0x29f   :  { %4545 = vmatprep.subr.bf16.mxu1 %v9794_v34  ;;  %v9476_v11 = vcombine.high %v1101_v7, %v1105_v9  ;;  %v1097_v17 = vld [vmem:[#allocation8 + $0x478] sm:$0xff] }
 0x2a1   :  { %4505 = vmatpush2.bf16.msra.mxu0 %v9665_v42  ;;  %v993_v42 = vld [vmem:[#allocation8 + $0x138] sm:$0xff] }
 0x2a2   :  { %4546 = vmatpush2.bf16.msra.mxu1 %v9793_v45  ;;  %4506 = vmatprep.subr.bf16.mxu0 %v9658_v46  ;;  %v1117_v46 = vld [vmem:[#allocation8 + $0x518] sm:$0xff]  ;;  %v9363_v2 = vcombine.low %v989_v40, %v993_v42 }
 0x2a3   :  { %4547 = vmatprep.subr.bf16.mxu1 %v9786_v47  ;;  %v1121_v47 = vld [vmem:[#allocation8 + $0x538] sm:$0xff] }
 0x2a4   :  { %v9491_v3 = vcombine.low %v1117_v46, %v1121_v47 }
 0x2a5   :  { %4507 = vmatpush2.bf16.msra.mxu0 %v9657_v43 }
 0x2a6   :  { %4548 = vmatpush2.bf16.msra.mxu1 %v9785_v56  ;;  %4508 = vmatprep.subr.bf16.mxu0 %v9650_v59  ;;  %v9492_v56 = vcombine.high %v1117_v46, %v1121_v47  ;;  %v981_v59 = vld [vmem:[#allocation8 + $0xd8] sm:$0xff] }
 0x2a7   :  { %4549 = vmatprep.subr.bf16.mxu1 %v9778_v62  ;;  %v985_v62 = vld [vmem:[#allocation8 + $0xf8] sm:$0xff] }
 0x2a9   :  { %4509 = vmatpush2.bf16.msra.mxu0 %v9649_v4  ;;  %v9356_v4 = vcombine.high %v981_v59, %v985_v62 }
 0x2aa   :  { %4550 = vmatpush2.bf16.msra.mxu1 %v9777_v5  ;;  %4560 = vmatprep.subr.bf16.mxu0 %v9388_v6  ;;  %v9484_v5 = vcombine.high %v1109_v0, %v1113_v1  ;;  %v973_v6 = vld [vmem:[#allocation8 + $0x98] sm:$0xff] }
 0x2ab   :  { %4601 = vmatprep.subr.bf16.mxu1 %v9516_v20  ;;  %v977_v20 = vld [vmem:[#allocation8 + $0xb8] sm:$0xff] }
 0x2ac   :  { %v4266_v19 = vpop.f32.mrf.mxu0  ;;  %4511 = vmatmul.mubr.bf16.vlgmr.msra.gmra.mxu0 %v10998_v41  ;;  %v9348_v10 = vcombine.high %v973_v6, %v977_v20  ;;  %v9347_v18 = vcombine.low %v973_v6, %v977_v20 }
 0x2ad   :  { %v4267_v30 = vadd.f32 %v4266_v19, %v1479_v8  ;;  %v4307_v33 = vpop.f32.mrf.mxu1  ;;  %4552 = vmatmul.mubr.bf16.vlgmr.msra.gmra.mxu1 %v10996_v37  ;;  %4561 = vmatpush1.bf16.msra.mxu0 %v9387_v13  ;;  %v9355_v8 = vcombine.low %v981_v59, %v985_v62  ;;  %v9483_v13 = vcombine.low %v1109_v0, %v1113_v1  ;;  %v1061_v0 = vld [vmem:[#allocation8 + $0x358] sm:$0xff] }
 0x2ae   :  { %4592 = vmatprep.mubr.bf16.mxu0 %v10951_v51  ;;  %4602 = vmatpush1.bf16.msra.mxu1 %v9515_v14  ;;  %v4268_v27 = vpop.f32.mrf.mxu0  ;;  %v965_v14 = vld [vmem:[#allocation8 + $0x58] sm:$0xff]  ;;  %v9475_v19 = vcombine.low %v1101_v7, %v1105_v9 }
 0x2af   :  { %v11039_v34 = vadd.f32 %v4307_v33, %v4267_v30  ;;  %4633 = vmatprep.mubr.bf16.mxu1 %v10955_v55  ;;  %v4269_v35 = vadd.f32 %v4268_v27, %v1483_v15  ;;  %v4309_v36 = vpop.f32.mrf.mxu1  ;;  %4562 = vmatprep.subr.bf16.mxu0 %v9380_v16  ;;  %v9364_v55 = vcombine.high %v989_v40, %v993_v42  ;;  %v969_v15 = vld [vmem:[#allocation8 + $0x78] sm:$0xff] }
 0x2b0   :  { %v4270_v45 = vpop.f32.mrf.mxu0  ;;  %4603 = vmatprep.subr.bf16.mxu1 %v9508_v22  ;;  %v1093_v16 = vld [vmem:[#allocation8 + $0x458] sm:$0xff]  ;;  %v9340_v22 = vcombine.high %v965_v14, %v969_v15  ;;  %v9339_v27 = vcombine.low %v965_v14, %v969_v15 }
 0x2b1   :  { %v11042_v26 = vadd.f32 %v4309_v36, %v4269_v35  ;;  %v4311_v51 = vpop.f32.mrf.mxu1  ;;  %4563 = vmatpush1.bf16.msra.mxu0 %v9379_v44  ;;  %v9468_v28 = vcombine.high %v1093_v16, %v1097_v17  ;;  %v961_v30 = vld [vmem:[#allocation8 + $0x38] sm:$0xff] }
 0x2b2   :  { %4604 = vmatpush1.bf16.msra.mxu1 %v9507_v60  ;;  %v4271_v49 = vpop.f32.mrf.mxu0  ;;  %4564 = vmatprep.subr.bf16.mxu0 %v9372_v31  ;;  %v1085_v33 = vld [vmem:[#allocation8 + $0x418] sm:$0xff]  ;;  %v9467_v60 = vcombine.low %v1093_v16, %v1097_v17  ;;  %v9332_v31 = vcombine.high %v957_v29, %v961_v30  ;;  %v9331_v45 = vcombine.low %v957_v29, %v961_v30 }
 0x2b3   :  { %v4312_v43 = vpop.f32.mrf.mxu1  ;;  %4605 = vmatprep.subr.bf16.mxu1 %v9500_v38  ;;  %v1089_v44 = vld [vmem:[#allocation8 + $0x438] sm:$0xff] }
 0x2b4   :  { %v9460_v35 = vcombine.high %v1085_v33, %v1089_v44  ;;  %v1077_v36 = vld [vmem:[#allocation8 + $0x3d8] sm:$0xff]  ;;  %v9459_v46 = vcombine.low %v1085_v33, %v1089_v44 }
 0x2b5   :  { %4565 = vmatpush1.bf16.msra.mxu0 %v9371_v48  ;;  %v1081_v38 = vld [vmem:[#allocation8 + $0x3f8] sm:$0xff] }
 0x2b6   :  { %4606 = vmatpush1.bf16.msra.mxu1 %v9499_v53  ;;  %4566 = vmatprep.subr.bf16.mxu0 %v9364_v55  ;;  %v1205_v40 = vld [vmem:[#allocation8 + $0x7d8] sm:$0xff]  ;;  %v9452_v47 = vcombine.high %v1077_v36, %v1081_v38  ;;  %v9451_v43 = vcombine.low %v1077_v36, %v1081_v38 }
 0x2b7   :  { %4607 = vmatprep.subr.bf16.mxu1 %v9492_v56  ;;  %v1209_v42 = vld [vmem:[#allocation8 + $0x7f8] sm:$0xff] }
 0x2b8   :  { %v9580_v51 = vcombine.high %v1205_v40, %v1209_v42  ;;  %v1069_v48 = vld [vmem:[#allocation8 + $0x398] sm:$0xff]  ;;  %v9579_v56 = vcombine.low %v1205_v40, %v1209_v42 }
 0x2b9   :  { %4567 = vmatpush1.bf16.msra.mxu0 %v9363_v2  ;;  %v1073_v49 = vld [vmem:[#allocation8 + $0x3b8] sm:$0xff] }
 0x2ba   :  { %4608 = vmatpush1.bf16.msra.mxu1 %v9491_v3  ;;  %4568 = vmatprep.subr.bf16.mxu0 %v9356_v4  ;;  %v1197_v53 = vld [vmem:[#allocation8 + $0x798] sm:$0xff]  ;;  %v9444_v59 = vcombine.high %v1069_v48, %v1073_v49  ;;  %v9443_v4 = vcombine.low %v1069_v48, %v1073_v49 }
 0x2bb   :  { %4609 = vmatprep.subr.bf16.mxu1 %v9484_v5  ;;  %v1201_v55 = vld [vmem:[#allocation8 + $0x7b8] sm:$0xff] }
 0x2bc   :  { %v9572_v62 = vcombine.high %v1197_v53, %v1201_v55  ;;  %v1065_v1 = vld [vmem:[#allocation8 + $0x378] sm:$0xff]  ;;  %v9571_v5 = vcombine.low %v1197_v53, %v1201_v55 }
 0x2bd   :  { %4569 = vmatpush1.bf16.msra.mxu0 %v9355_v8  ;;  %v1189_v2 = vld [vmem:[#allocation8 + $0x758] sm:$0xff]  ;;  %v9436_v6 = vcombine.high %v1061_v0, %v1065_v1 }
 0x2be   :  { %4610 = vmatpush1.bf16.msra.mxu1 %v9483_v13  ;;  %4570 = vmatprep.subr.bf16.mxu0 %v9348_v10  ;;  %v1193_v3 = vld [vmem:[#allocation8 + $0x778] sm:$0xff]  ;;  %v9435_v10 = vcombine.low %v1061_v0, %v1065_v1 }
 0x2bf   :  { %4611 = vmatprep.subr.bf16.mxu1 %v9476_v11  ;;  %v9564_v20 = vcombine.high %v1189_v2, %v1193_v3  ;;  %v1053_v7 = vld [vmem:[#allocation8 + $0x318] sm:$0xff]  ;;  %v9563_v11 = vcombine.low %v1189_v2, %v1193_v3 }
 0x2c0   :  { %v1057_v9 = vld [vmem:[#allocation8 + $0x338] sm:$0xff] }
 0x2c1   :  { %4571 = vmatpush1.bf16.msra.mxu0 %v9347_v18  ;;  %v1181_v8 = vld [vmem:[#allocation8 + $0x718] sm:$0xff]  ;;  %v9428_v14 = vcombine.high %v1053_v7, %v1057_v9 }
 0x2c2   :  { %4612 = vmatpush1.bf16.msra.mxu1 %v9475_v19  ;;  %4572 = vmatprep.subr.bf16.mxu0 %v9340_v22  ;;  %v1185_v13 = vld [vmem:[#allocation8 + $0x738] sm:$0xff]  ;;  %v9427_v22 = vcombine.low %v1053_v7, %v1057_v9 }
 0x2c3   :  { %4613 = vmatprep.subr.bf16.mxu1 %v9468_v28  ;;  %v9556_v15 = vcombine.high %v1181_v8, %v1185_v13  ;;  %v1045_v16 = vld [vmem:[#allocation8 + $0x2d8] sm:$0xff]  ;;  %v9555_v28 = vcombine.low %v1181_v8, %v1185_v13 }
 0x2c4   :  { %v1049_v17 = vld [vmem:[#allocation8 + $0x2f8] sm:$0xff] }
 0x2c5   :  { %4573 = vmatpush1.bf16.msra.mxu0 %v9339_v27  ;;  %v1173_v18 = vld [vmem:[#allocation8 + $0x6d8] sm:$0xff]  ;;  %v9420_v29 = vcombine.high %v1045_v16, %v1049_v17 }
 0x2c6   :  { %4614 = vmatpush1.bf16.msra.mxu1 %v9467_v60  ;;  %4574 = vmatprep.subr.bf16.mxu0 %v9332_v31  ;;  %v1177_v19 = vld [vmem:[#allocation8 + $0x6f8] sm:$0xff]  ;;  %v9419_v31 = vcombine.low %v1045_v16, %v1049_v17 }
 0x2c7   :  { %4615 = vmatprep.subr.bf16.mxu1 %v9460_v35  ;;  %v9548_v30 = vcombine.high %v1173_v18, %v1177_v19  ;;  %v1037_v33 = vld [vmem:[#allocation8 + $0x298] sm:$0xff]  ;;  %v9547_v35 = vcombine.low %v1173_v18, %v1177_v19 }
 0x2c8   :  { %v1041_v44 = vld [vmem:[#allocation8 + $0x2b8] sm:$0xff] }
 0x2c9   :  { %4575 = vmatpush1.bf16.msra.mxu0 %v9331_v45  ;;  %v1165_v27 = vld [vmem:[#allocation8 + $0x698] sm:$0xff]  ;;  %v9412_v36 = vcombine.high %v1037_v33, %v1041_v44 }
 0x2ca   :  { %4616 = vmatpush1.bf16.msra.mxu1 %v9459_v46  ;;  %4576 = vmatprep.subr.bf16.mxu0 %v9452_v47  ;;  %v1169_v60 = vld [vmem:[#allocation8 + $0x6b8] sm:$0xff]  ;;  %v9411_v47 = vcombine.low %v1037_v33, %v1041_v44 }
 0x2cb   :  { %4617 = vmatprep.subr.bf16.mxu1 %v9580_v51  ;;  %v9540_v38 = vcombine.high %v1165_v27, %v1169_v60  ;;  %v1029_v40 = vld [vmem:[#allocation8 + $0x258] sm:$0xff]  ;;  %v9539_v51 = vcombine.low %v1165_v27, %v1169_v60 }
 0x2cc   :  { %v1033_v42 = vld [vmem:[#allocation8 + $0x278] sm:$0xff] }
 0x2cd   :  { %4577 = vmatpush2.bf16.msra.mxu0 %v9451_v43  ;;  %v1157_v45 = vld [vmem:[#allocation8 + $0x658] sm:$0xff]  ;;  %v9404_v48 = vcombine.high %v1029_v40, %v1033_v42 }
 0x2ce   :  { %4618 = vmatpush2.bf16.msra.mxu1 %v9579_v56  ;;  %4578 = vmatprep.subr.bf16.mxu0 %v9444_v59  ;;  %v1161_v46 = vld [vmem:[#allocation8 + $0x678] sm:$0xff]  ;;  %v9403_v59 = vcombine.low %v1029_v40, %v1033_v42 }
 0x2cf   :  { %4619 = vmatprep.subr.bf16.mxu1 %v9572_v62  ;;  %v9532_v49 = vcombine.high %v1157_v45, %v1161_v46  ;;  %v1021_v53 = vld [vmem:[#allocation8 + $0x218] sm:$0xff]  ;;  %v9531_v62 = vcombine.low %v1157_v45, %v1161_v46 }
 0x2d0   :  { %v1025_v55 = vld [vmem:[#allocation8 + $0x238] sm:$0xff] }
 0x2d1   :  { %4579 = vmatpush2.bf16.msra.mxu0 %v9443_v4  ;;  %v1149_v43 = vld [vmem:[#allocation8 + $0x618] sm:$0xff]  ;;  %v9396_v0 = vcombine.high %v1021_v53, %v1025_v55 }
 0x2d2   :  { %4620 = vmatpush2.bf16.msra.mxu1 %v9571_v5  ;;  %4580 = vmatprep.subr.bf16.mxu0 %v9436_v6  ;;  %v1153_v56 = vld [vmem:[#allocation8 + $0x638] sm:$0xff]  ;;  %v9395_v6 = vcombine.low %v1021_v53, %v1025_v55 }
 0x2d3   :  { %4621 = vmatprep.subr.bf16.mxu1 %v9564_v20  ;;  %v9524_v1 = vcombine.high %v1149_v43, %v1153_v56  ;;  %v1269_v2 = vld [vmem:[#allocation8 + $0x9d8] sm:$0xff]  ;;  %v9523_v20 = vcombine.low %v1149_v43, %v1153_v56 }
 0x2d4   :  { %v1273_v3 = vld [vmem:[#allocation8 + $0x9f8] sm:$0xff] }
 0x2d5   :  { %4581 = vmatpush2.bf16.msra.mxu0 %v9435_v10  ;;  %v1397_v4 = vld [vmem:[#allocation8 + $0xdd8] sm:$0xff]  ;;  %v9644_v7 = vcombine.high %v1269_v2, %v1273_v3  ;;  %v9643_v10 = vcombine.low %v1269_v2, %v1273_v3 }
 0x2d6   :  { %4622 = vmatpush2.bf16.msra.mxu1 %v9563_v11  ;;  %4582 = vmatprep.subr.bf16.mxu0 %v9428_v14  ;;  %v1401_v5 = vld [vmem:[#allocation8 + $0xdf8] sm:$0xff] }
 0x2d7   :  { %4623 = vmatprep.subr.bf16.mxu1 %v9556_v15  ;;  %v9772_v9 = vcombine.high %v1397_v4, %v1401_v5  ;;  %v1261_v8 = vld [vmem:[#allocation8 + $0x998] sm:$0xff]  ;;  %v9771_v15 = vcombine.low %v1397_v4, %v1401_v5 }
 0x2d8   :  { %v1265_v13 = vld [vmem:[#allocation8 + $0x9b8] sm:$0xff] }
 0x2d9   :  { %4583 = vmatpush2.bf16.msra.mxu0 %v9427_v22  ;;  %v1389_v11 = vld [vmem:[#allocation8 + $0xd98] sm:$0xff]  ;;  %v9636_v16 = vcombine.high %v1261_v8, %v1265_v13  ;;  %v9635_v44 = vcombine.low %v1261_v8, %v1265_v13 }
 0x2da   :  { %4624 = vmatpush2.bf16.msra.mxu1 %v9555_v28  ;;  %4584 = vmatprep.subr.bf16.mxu0 %v9420_v29  ;;  %v1393_v14 = vld [vmem:[#allocation8 + $0xdb8] sm:$0xff] }
 0x2db   :  { %4625 = vmatprep.subr.bf16.mxu1 %v9548_v30  ;;  %v1253_v17 = vld [vmem:[#allocation8 + $0x958] sm:$0xff]  ;;  %v9764_v22 = vcombine.high %v1389_v11, %v1393_v14  ;;  %v9763_v60 = vcombine.low %v1389_v11, %v1393_v14 }
 0x2dc   :  { %v1257_v18 = vld [vmem:[#allocation8 + $0x978] sm:$0xff] }
 0x2dd   :  { %4585 = vmatpush2.bf16.msra.mxu0 %v9419_v31  ;;  %v1381_v28 = vld [vmem:[#allocation8 + $0xd58] sm:$0xff]  ;;  %v9628_v31 = vcombine.high %v1253_v17, %v1257_v18  ;;  %v9627_v45 = vcombine.low %v1253_v17, %v1257_v18 }
 0x2de   :  { %4626 = vmatpush2.bf16.msra.mxu1 %v9547_v35  ;;  %4586 = vmatprep.subr.bf16.mxu0 %v9412_v36  ;;  %v1385_v29 = vld [vmem:[#allocation8 + $0xd78] sm:$0xff] }
 0x2df   :  { %4627 = vmatprep.subr.bf16.mxu1 %v9540_v38  ;;  %v1245_v36 = vld [vmem:[#allocation8 + $0x918] sm:$0xff] }
 0x2e0   :  { %v1249_v38 = vld [vmem:[#allocation8 + $0x938] sm:$0xff] }
 0x2e1   :  { %4587 = vmatpush2.bf16.msra.mxu0 %v9411_v47  ;;  %v1373_v40 = vld [vmem:[#allocation8 + $0xd18] sm:$0xff]  ;;  %v9755_v47 = vcombine.low %v1381_v28, %v1385_v29  ;;  %v9619_v56 = vcombine.low %v1245_v36, %v1249_v38 }
 0x2e2   :  { %4628 = vmatpush2.bf16.msra.mxu1 %v9539_v51  ;;  %4588 = vmatprep.subr.bf16.mxu0 %v9404_v48  ;;  %v1377_v42 = vld [vmem:[#allocation8 + $0xd38] sm:$0xff]  ;;  %v9620_v51 = vcombine.high %v1245_v36, %v1249_v38 }
 0x2e3   :  { %4629 = vmatprep.subr.bf16.mxu1 %v9532_v49  ;;  %v1237_v49 = vld [vmem:[#allocation8 + $0x8d8] sm:$0xff] }
 0x2e4   :  { %v1241_v53 = vld [vmem:[#allocation8 + $0x8f8] sm:$0xff] }
 0x2e5   :  { %4589 = vmatpush2.bf16.msra.mxu0 %v9403_v59  ;;  %v1365_v55 = vld [vmem:[#allocation8 + $0xcd8] sm:$0xff]  ;;  %v9747_v59 = vcombine.low %v1373_v40, %v1377_v42  ;;  %v9611_v5 = vcombine.low %v1237_v49, %v1241_v53 }
 0x2e6   :  { %4630 = vmatpush2.bf16.msra.mxu1 %v9531_v62  ;;  %4590 = vmatprep.subr.bf16.mxu0 %v9396_v0  ;;  %v1369_v43 = vld [vmem:[#allocation8 + $0xcf8] sm:$0xff]  ;;  %v9612_v62 = vcombine.high %v1237_v49, %v1241_v53 }
 0x2e7   :  { %4631 = vmatprep.subr.bf16.mxu1 %v9524_v1  ;;  %v9740_v0 = vcombine.high %v1365_v55, %v1369_v43  ;;  %v1229_v1 = vld [vmem:[#allocation8 + $0x898] sm:$0xff] }
 0x2e8   :  { %v1233_v2 = vld [vmem:[#allocation8 + $0x8b8] sm:$0xff] }
 0x2e9   :  { %4591 = vmatpush2.bf16.msra.mxu0 %v9395_v6  ;;  %v1357_v3 = vld [vmem:[#allocation8 + $0xc98] sm:$0xff]  ;;  %v9739_v6 = vcombine.low %v1365_v55, %v1369_v43  ;;  %v9603_v11 = vcombine.low %v1229_v1, %v1233_v2 }
 0x2ea   :  { %4632 = vmatpush2.bf16.msra.mxu1 %v9523_v20  ;;  %4642 = vmatprep.subr.bf16.mxu0 %v9644_v7  ;;  %v1361_v4 = vld [vmem:[#allocation8 + $0xcb8] sm:$0xff]  ;;  %v9604_v20 = vcombine.high %v1229_v1, %v1233_v2 }
 0x2eb   :  { %4683 = vmatprep.subr.bf16.mxu1 %v9772_v9  ;;  %v9732_v7 = vcombine.high %v1357_v3, %v1361_v4  ;;  %v1221_v9 = vld [vmem:[#allocation8 + $0x858] sm:$0xff]  ;;  %v9731_v14 = vcombine.low %v1357_v3, %v1361_v4 }
 0x2ec   :  { %v4348_v19 = vpop.f32.mrf.mxu0  ;;  %4593 = vmatmul.mubr.bf16.vlgmr.msra.gmra.mxu0 %v10953_v54  ;;  %v1225_v8 = vld [vmem:[#allocation8 + $0x878] sm:$0xff] }
 0x2ed   :  { %v4349_v30 = vadd.f32 %v4348_v19, %v11039_v34  ;;  %v4389_v33 = vpop.f32.mrf.mxu1  ;;  %4634 = vmatmul.mubr.bf16.vlgmr.msra.gmra.mxu1 %v10949_v50  ;;  %4643 = vmatpush1.bf16.msra.mxu0 %v9643_v10  ;;  %v9756_v34 = vcombine.high %v1381_v28, %v1385_v29  ;;  %v1349_v13 = vld [vmem:[#allocation8 + $0xc58] sm:$0xff]  ;;  %v9595_v28 = vcombine.low %v1221_v9, %v1225_v8 }
 0x2ee   :  { %4674 = vmatprep.mubr.bf16.mxu0 %v10979_v57  ;;  %4684 = vmatpush1.bf16.msra.mxu1 %v9771_v15  ;;  %v11048_v27 = vpop.f32.mrf.mxu0  ;;  %v1353_v10 = vld [vmem:[#allocation8 + $0xc78] sm:$0xff]  ;;  %v9596_v15 = vcombine.high %v1221_v9, %v1225_v8 }
 0x2ef   :  { %v11050_v35 = vadd.f32 %v4389_v33, %v4349_v30  ;;  %4715 = vmatprep.mubr.bf16.mxu1 %v10987_v63  ;;  %v11053_v54 = vpop.f32.mrf.mxu1  ;;  %4644 = vmatprep.subr.bf16.mxu0 %v9636_v16  ;;  %v9748_v63 = vcombine.high %v1373_v40, %v1377_v42  ;;  %v9724_v16 = vcombine.high %v1349_v13, %v1353_v10  ;;  %v1213_v17 = vld [vmem:[#allocation8 + $0x818] sm:$0xff] }
 0x2f0   :  { %v4352_v50 = vpop.f32.mrf.mxu0  ;;  %4685 = vmatprep.subr.bf16.mxu1 %v9764_v22  ;;  %v1217_v18 = vld [vmem:[#allocation8 + $0x838] sm:$0xff]  ;;  %v9723_v29 = vcombine.low %v1349_v13, %v1353_v10 }
 0x2f1   :  { %v4393_v57 = vpop.f32.mrf.mxu1  ;;  %4645 = vmatpush1.bf16.msra.mxu0 %v9635_v44  ;;  %v1341_v19 = vld [vmem:[#allocation8 + $0xc18] sm:$0xff]  ;;  %v9588_v30 = vcombine.high %v1213_v17, %v1217_v18  ;;  %v9587_v36 = vcombine.low %v1213_v17, %v1217_v18 }
 0x2f2   :  { %4686 = vmatpush1.bf16.msra.mxu1 %v9763_v60  ;;  %v4353_v46 = vpop.f32.mrf.mxu0  ;;  %4646 = vmatprep.subr.bf16.mxu0 %v9628_v31  ;;  %v1345_v22 = vld [vmem:[#allocation8 + $0xc38] sm:$0xff] }
 0x2f3   :  { %v4394_v48 = vpop.f32.mrf.mxu1  ;;  %4687 = vmatprep.subr.bf16.mxu1 %v9756_v34  ;;  %v9716_v33 = vcombine.high %v1341_v19, %v1345_v22  ;;  %v1333_v44 = vld [vmem:[#allocation8 + $0xbd8] sm:$0xff]  ;;  %v9715_v38 = vcombine.low %v1341_v19, %v1345_v22 }
 0x2f4   :  { %v1337_v60 = vld [vmem:[#allocation8 + $0xbf8] sm:$0xff] }
 0x2f5   :  { %4647 = vmatpush1.bf16.msra.mxu0 %v9627_v45  ;;  %v1461_v31 = vld [vmem:[#allocation8 + $0xfd8] sm:$0xff]  ;;  %v9708_v50 = vcombine.high %v1333_v44, %v1337_v60 }
 0x2f6   :  { %4688 = vmatpush1.bf16.msra.mxu1 %v9755_v47  ;;  %4648 = vmatprep.subr.bf16.mxu0 %v9620_v51  ;;  %v1465_v34 = vld [vmem:[#allocation8 + $0xff8] sm:$0xff]  ;;  %v9707_v47 = vcombine.low %v1333_v44, %v1337_v60 }
 0x2f7   :  { %4689 = vmatprep.subr.bf16.mxu1 %v9748_v63  ;;  %v9836_v40 = vcombine.high %v1461_v31, %v1465_v34  ;;  %v1325_v42 = vld [vmem:[#allocation8 + $0xb98] sm:$0xff]  ;;  %v9835_v51 = vcombine.low %v1461_v31, %v1465_v34 }
 0x2f8   :  { %v1329_v57 = vld [vmem:[#allocation8 + $0xbb8] sm:$0xff] }
 0x2f9   :  { %4649 = vmatpush1.bf16.msra.mxu0 %v9619_v56  ;;  %v1453_v45 = vld [vmem:[#allocation8 + $0xf98] sm:$0xff]  ;;  %v9700_v48 = vcombine.high %v1325_v42, %v1329_v57  ;;  %v9699_v56 = vcombine.low %v1325_v42, %v1329_v57 }
 0x2fa   :  { %4690 = vmatpush1.bf16.msra.mxu1 %v9747_v59  ;;  %4650 = vmatprep.subr.bf16.mxu0 %v9612_v62  ;;  %v1457_v46 = vld [vmem:[#allocation8 + $0xfb8] sm:$0xff] }
 0x2fb   :  { %4691 = vmatprep.subr.bf16.mxu1 %v9740_v0  ;;  %v9828_v63 = vcombine.high %v1453_v45, %v1457_v46  ;;  %v1317_v49 = vld [vmem:[#allocation8 + $0xb58] sm:$0xff]  ;;  %v9827_v59 = vcombine.low %v1453_v45, %v1457_v46 }
 0x2fc   :  { %v1321_v53 = vld [vmem:[#allocation8 + $0xb78] sm:$0xff] }
 0x2fd   :  { %4651 = vmatpush1.bf16.msra.mxu0 %v9611_v5  ;;  %v1445_v55 = vld [vmem:[#allocation8 + $0xf58] sm:$0xff]  ;;  %v9692_v62 = vcombine.high %v1317_v49, %v1321_v53  ;;  %v9691_v5 = vcombine.low %v1317_v49, %v1321_v53  ;;  %v4796_v53 = vld [vmem:[#allocation11 + $0x1c0] sm:$0xff] }
 0x2fe   :  { %4692 = vmatpush1.bf16.msra.mxu1 %v9739_v6  ;;  %4652 = vmatprep.subr.bf16.mxu0 %v9604_v20  ;;  %v1449_v43 = vld [vmem:[#allocation8 + $0xf78] sm:$0xff] }
 0x2ff   :  { %4693 = vmatprep.subr.bf16.mxu1 %v9732_v7  ;;  %v9820_v0 = vcombine.high %v1445_v55, %v1449_v43  ;;  %v1309_v1 = vld [vmem:[#allocation8 + $0xb18] sm:$0xff]  ;;  %v9819_v6 = vcombine.low %v1445_v55, %v1449_v43  ;;  %v4800_v55 = vld [vmem:[#allocation11 + $0x1e0] sm:$0xff] }
 0x300   :  { %v1313_v2 = vld [vmem:[#allocation8 + $0xb38] sm:$0xff]  ;;  %v4924_v43 = vld [vmem:[#allocation11 + $0x5c0] sm:$0xff] }
 0x301   :  { %4653 = vmatpush1.bf16.msra.mxu0 %v9603_v11  ;;  %v1437_v3 = vld [vmem:[#allocation8 + $0xf18] sm:$0xff]  ;;  %v9684_v20 = vcombine.high %v1309_v1, %v1313_v2  ;;  %v9683_v11 = vcombine.low %v1309_v1, %v1313_v2  ;;  %v4725_v1 = vmax.f32 %v11030_v39, 0.0  ;;  %v4788_v2 = vld [vmem:[#allocation11 + $0x180] sm:$0xff] }
 0x302   :  { %4694 = vmatpush1.bf16.msra.mxu1 %v9731_v14  ;;  %4654 = vmatprep.subr.bf16.mxu0 %v9596_v15  ;;  %v1441_v4 = vld [vmem:[#allocation8 + $0xf38] sm:$0xff] }
 0x303   :  { %4695 = vmatprep.subr.bf16.mxu1 %v9724_v16  ;;  %v9812_v7 = vcombine.high %v1437_v3, %v1441_v4  ;;  %v1301_v9 = vld [vmem:[#allocation8 + $0xad8] sm:$0xff]  ;;  %v9811_v14 = vcombine.low %v1437_v3, %v1441_v4  ;;  %v4792_v3 = vld [vmem:[#allocation11 + $0x1a0] sm:$0xff]  ;;  %v11063_v39 = vpack.c.bf16 %v4725_v1, %v4725_v1 }
 0x304   :  { %v1305_v8 = vld [vmem:[#allocation8 + $0xaf8] sm:$0xff] }
 0x305   :  { %4655 = vmatpush1.bf16.msra.mxu0 %v9595_v28  ;;  %v1429_v13 = vld [vmem:[#allocation8 + $0xed8] sm:$0xff]  ;;  %v9676_v15 = vcombine.high %v1301_v9, %v1305_v8  ;;  %v9675_v28 = vcombine.low %v1301_v9, %v1305_v8  ;;  %v9886_v8 = vcombine.high %v4788_v2, %v4792_v3 }
 0x306   :  { %4696 = vmatpush1.bf16.msra.mxu1 %v9723_v29  ;;  %4656 = vmatprep.subr.bf16.mxu0 %v9588_v30  ;;  %v1433_v10 = vld [vmem:[#allocation8 + $0xef8] sm:$0xff] }
 0x307   :  { %4697 = vmatprep.subr.bf16.mxu1 %v9716_v33  ;;  %v9804_v16 = vcombine.high %v1429_v13, %v1433_v10  ;;  %v1293_v17 = vld [vmem:[#allocation8 + $0xa98] sm:$0xff]  ;;  %v9803_v29 = vcombine.low %v1429_v13, %v1433_v10  ;;  %v4780_v13 = vld [vmem:[#allocation11 + $0x140] sm:$0xff] }
 0x308   :  { %v1297_v18 = vld [vmem:[#allocation8 + $0xab8] sm:$0xff]  ;;  %v4784_v10 = vld [vmem:[#allocation11 + $0x160] sm:$0xff] }
 0x309   :  { %4657 = vmatpush1.bf16.msra.mxu0 %v9587_v36  ;;  %v1421_v19 = vld [vmem:[#allocation8 + $0xe98] sm:$0xff]  ;;  %v9668_v30 = vcombine.high %v1293_v17, %v1297_v18  ;;  %v9667_v36 = vcombine.low %v1293_v17, %v1297_v18 }
 0x30a   :  { %4698 = vmatpush1.bf16.msra.mxu1 %v9715_v38  ;;  %4658 = vmatprep.subr.bf16.mxu0 %v9708_v50  ;;  %v1425_v22 = vld [vmem:[#allocation8 + $0xeb8] sm:$0xff] }
 0x30b   :  { %4699 = vmatprep.subr.bf16.mxu1 %v9836_v40  ;;  %v9796_v33 = vcombine.high %v1421_v19, %v1425_v22  ;;  %v1285_v44 = vld [vmem:[#allocation8 + $0xa58] sm:$0xff]  ;;  %v9795_v38 = vcombine.low %v1421_v19, %v1425_v22  ;;  %v9885_v22 = vcombine.low %v4788_v2, %v4792_v3  ;;  %v4748_v3 = vld [vmem:[#allocation11 + $0x40] sm:$0xff] }
 0x30c   :  { %v1289_v60 = vld [vmem:[#allocation8 + $0xa78] sm:$0xff] }
 0x30d   :  { %4659 = vmatpush2.bf16.msra.mxu0 %v9707_v47  ;;  %v1413_v31 = vld [vmem:[#allocation8 + $0xe58] sm:$0xff]  ;;  %v9660_v50 = vcombine.high %v1285_v44, %v1289_v60  ;;  %v4351_v47 = vadd.f32 %v11048_v27, %v11042_v26  ;;  %v9894_v26 = vcombine.high %v4796_v53, %v4800_v55 }
 0x30e   :  { %4700 = vmatpush2.bf16.msra.mxu1 %v9835_v51  ;;  %4660 = vmatprep.subr.bf16.mxu0 %v9700_v48  ;;  %v1417_v34 = vld [vmem:[#allocation8 + $0xe78] sm:$0xff]  ;;  %v9659_v51 = vcombine.low %v1285_v44, %v1289_v60  ;;  %v4772_v60 = vld [vmem:[#allocation11 + $0x100] sm:$0xff] }
 0x30f   :  { %4701 = vmatprep.subr.bf16.mxu1 %v9828_v63  ;;  %v9788_v40 = vcombine.high %v1413_v31, %v1417_v34  ;;  %v1277_v42 = vld [vmem:[#allocation8 + $0xa18] sm:$0xff]  ;;  %v9787_v48 = vcombine.low %v1413_v31, %v1417_v34  ;;  %v4776_v31 = vld [vmem:[#allocation11 + $0x120] sm:$0xff] }
 0x310   :  { %v1281_v57 = vld [vmem:[#allocation8 + $0xa38] sm:$0xff]  ;;  %v4900_v34 = vld [vmem:[#allocation11 + $0x500] sm:$0xff] }
 0x311   :  { %4661 = vmatpush2.bf16.msra.mxu0 %v9699_v56  ;;  %v1405_v45 = vld [vmem:[#allocation8 + $0xe18] sm:$0xff]  ;;  %v9652_v63 = vcombine.high %v1277_v42, %v1281_v57  ;;  %v4928_v56 = vld [vmem:[#allocation11 + $0x5e0] sm:$0xff] }
 0x312   :  { %4702 = vmatpush2.bf16.msra.mxu1 %v9827_v59  ;;  %4662 = vmatprep.subr.bf16.mxu0 %v9692_v62  ;;  %v1409_v46 = vld [vmem:[#allocation8 + $0xe38] sm:$0xff]  ;;  %v4392_v59 = vadd.f32 %v11053_v54, %v4351_v47  ;;  %v9651_v62 = vcombine.low %v1277_v42, %v1281_v57  ;;  %v10022_v27 = vcombine.high %v4924_v43, %v4928_v56  ;;  %v4764_v47 = vld [vmem:[#allocation11 + $0xc0] sm:$0xff] }
 0x313   :  { %4703 = vmatprep.subr.bf16.mxu1 %v9820_v0  ;;  %v9780_v49 = vcombine.high %v1405_v45, %v1409_v46  ;;  %v9779_v0 = vcombine.low %v1405_v45, %v1409_v46  ;;  %v9893_v54 = vcombine.low %v4796_v53, %v4800_v55  ;;  %v10021_v9 = vcombine.low %v4924_v43, %v4928_v56  ;;  %v4756_v56 = vld [vmem:[#allocation11 + $0x80] sm:$0xff] }
 0x314   :  { %v4727_v4 = vmax.f32 %v4392_v59, 0.0  ;;  %v9870_v57 = vcombine.high %v4772_v60, %v4776_v31  ;;  %v4760_v59 = vld [vmem:[#allocation11 + $0xa0] sm:$0xff] }
 0x315   :  { %4663 = vmatpush2.bf16.msra.mxu0 %v9691_v5  ;;  %v11059_v5 = vld [vmem:[#allocation10] sm:$0xff]  ;;  %v9854_v1 = vcombine.high %v4756_v56, %v4760_v59 }
 0x316   :  { %4704 = vmatpush2.bf16.msra.mxu1 %v9819_v6  ;;  %4664 = vmatprep.subr.bf16.mxu0 %v9684_v20  ;;  %v1487_v6 = vrot.slane %v11059_v5, %v10985_v61  ;;  %v4916_v20 = vld [vmem:[#allocation11 + $0x580] sm:$0xff]  ;;  %v11066_v17 = vpack.c.bf16 %v4727_v4, %v4727_v4 }
 0x317   :  { %4705 = vmatprep.subr.bf16.mxu1 %v9812_v7  ;;  %v4920_v7 = vld [vmem:[#allocation11 + $0x5a0] sm:$0xff] }
 0x318   :  { %v4752_v4 = vld [vmem:[#allocation11 + $0x60] sm:$0xff] }
 0x319   :  { %4665 = vmatpush2.bf16.msra.mxu0 %v9683_v11 }
 0x31a   :  { %4706 = vmatpush2.bf16.msra.mxu1 %v9811_v14  ;;  %4666 = vmatprep.subr.bf16.mxu0 %v9676_v15  ;;  %v10014_v14 = vcombine.high %v4916_v20, %v4920_v7  ;;  %v4908_v15 = vld [vmem:[#allocation11 + $0x540] sm:$0xff] }
 0x31b   :  { %4707 = vmatprep.subr.bf16.mxu1 %v9804_v16  ;;  %v4912_v16 = vld [vmem:[#allocation11 + $0x560] sm:$0xff] }
 0x31c   :  { %v10006_v44 = vcombine.high %v4908_v15, %v4912_v16  ;;  %v10005_v42 = vcombine.low %v4908_v15, %v4912_v16  ;;  %v9845_v15 = vcombine.low %v4748_v3, %v4752_v4 }
 0x31d   :  { %4667 = vmatpush2.bf16.msra.mxu0 %v9675_v28 }
 0x31e   :  { %4708 = vmatpush2.bf16.msra.mxu1 %v9803_v29  ;;  %4668 = vmatprep.subr.bf16.mxu0 %v9668_v30  ;;  %v10013_v29 = vcombine.low %v4916_v20, %v4920_v7  ;;  %v9878_v30 = vcombine.high %v4780_v13, %v4784_v10  ;;  %v9853_v20 = vcombine.low %v4756_v56, %v4760_v59  ;;  %v4836_v56 = vld [vmem:[#allocation11 + $0x300] sm:$0xff] }
 0x31f   :  { %4709 = vmatprep.subr.bf16.mxu1 %v9796_v33  ;;  %v4840_v59 = vld [vmem:[#allocation11 + $0x320] sm:$0xff] }
 0x321   :  { %4669 = vmatpush2.bf16.msra.mxu0 %v9667_v36  ;;  %v4904_v36 = vld [vmem:[#allocation11 + $0x520] sm:$0xff] }
 0x322   :  { %4710 = vmatpush2.bf16.msra.mxu1 %v9795_v38  ;;  %4670 = vmatprep.subr.bf16.mxu0 %v9660_v50  ;;  %v9877_v50 = vcombine.low %v4780_v13, %v4784_v10  ;;  %v9998_v46 = vcombine.high %v4900_v34, %v4904_v36  ;;  %v9997_v53 = vcombine.low %v4900_v34, %v4904_v36  ;;  %v4740_v13 = vld [vmem:[#allocation11] sm:$0xff] }
 0x323   :  { %4711 = vmatprep.subr.bf16.mxu1 %v9788_v40  ;;  %v4744_v10 = vld [vmem:[#allocation11 + $0x20] sm:$0xff] }
 0x324   :  { %v4852_v36 = vld [vmem:[#allocation11 + $0x380] sm:$0xff] }
 0x325   :  { %4671 = vmatpush2.bf16.msra.mxu0 %v9659_v51  ;;  %v4768_v51 = vld [vmem:[#allocation11 + $0xe0] sm:$0xff] }
 0x326   :  { %4712 = vmatpush2.bf16.msra.mxu1 %v9787_v48  ;;  %4672 = vmatprep.subr.bf16.mxu0 %v9652_v63  ;;  %v4892_v48 = vld [vmem:[#allocation11 + $0x4c0] sm:$0xff]  ;;  %v9862_v55 = vcombine.high %v4764_v47, %v4768_v51 }
 0x327   :  { %4713 = vmatprep.subr.bf16.mxu1 %v9780_v49  ;;  %v4896_v63 = vld [vmem:[#allocation11 + $0x4e0] sm:$0xff]  ;;  %v9869_v49 = vcombine.low %v4772_v60, %v4776_v31  ;;  %v9837_v60 = vcombine.low %v4740_v13, %v4744_v10 }
 0x328   :  { %v9990_v43 = vcombine.high %v4892_v48, %v4896_v63 }
 0x329   :  { %4673 = vmatpush2.bf16.msra.mxu0 %v9651_v62  ;;  %v4884_v62 = vld [vmem:[#allocation11 + $0x480] sm:$0xff] }
 0x32a   :  { %4714 = vmatpush2.bf16.msra.mxu1 %v9779_v0  ;;  %7854 = vmatprep.subr.bf16.mxu0 %v9894_v26  ;;  %v4888_v0 = vld [vmem:[#allocation11 + $0x4a0] sm:$0xff]  ;;  %v9861_v26 = vcombine.low %v4764_v47, %v4768_v51 }
 0x32b   :  { %7895 = vmatprep.subr.bf16.mxu1 %v10022_v27  ;;  %v9989_v27 = vcombine.low %v4892_v48, %v4896_v63  ;;  %v9982_v2 = vcombine.high %v4884_v62, %v4888_v0  ;;  %v9981_v7 = vcombine.low %v4884_v62, %v4888_v0  ;;  %v4844_v47 = vld [vmem:[#allocation11 + $0x340] sm:$0xff] }
 0x32c   :  { %v4430_v11 = vpop.f32.mrf.mxu0  ;;  %4675 = vmatmul.mubr.bf16.vlgmr.msra.gmra.mxu0 %v10998_v41  ;;  %v4848_v51 = vld [vmem:[#allocation11 + $0x360] sm:$0xff] }
 0x32d   :  { %v4431_v18 = vadd.f32 %v4430_v11, %v1487_v6  ;;  %v4471_v19 = vpop.f32.mrf.mxu1  ;;  %4716 = vmatmul.mubr.bf16.vlgmr.msra.gmra.mxu1 %v10996_v37  ;;  %7855 = vmatpush1.bf16.msra.mxu0 %v9893_v54  ;;  %v4876_v6 = vld [vmem:[#allocation11 + $0x440] sm:$0xff] }
 0x32e   :  { %7886 = vmatprep.mubr.bf16.mxu0 %v11063_v39  ;;  %7896 = vmatpush1.bf16.msra.mxu1 %v10021_v9  ;;  %v11070_v28 = vpop.f32.mrf.mxu0  ;;  %v4880_v54 = vld [vmem:[#allocation11 + $0x460] sm:$0xff]  ;;  %v9846_v9 = vcombine.high %v4748_v3, %v4752_v4 }
 0x32f   :  { %v11072_v33 = vadd.f32 %v4471_v19, %v4431_v18  ;;  %7927 = vmatprep.mubr.bf16.mxu1 %v11066_v17  ;;  %v11075_v41 = vpop.f32.mrf.mxu1  ;;  %7856 = vmatprep.subr.bf16.mxu0 %v9886_v8  ;;  %v9974_v8 = vcombine.high %v4876_v6, %v4880_v54  ;;  %v4868_v11 = vld [vmem:[#allocation11 + $0x400] sm:$0xff]  ;;  %v9973_v16 = vcombine.low %v4876_v6, %v4880_v54 }
 0x330   :  { %v4434_v37 = vpop.f32.mrf.mxu0  ;;  %7897 = vmatprep.subr.bf16.mxu1 %v10014_v14  ;;  %v4872_v14 = vld [vmem:[#allocation11 + $0x420] sm:$0xff]  ;;  %v9838_v18 = vcombine.high %v4740_v13, %v4744_v10 }
 0x331   :  { %v4475_v38 = vpop.f32.mrf.mxu1  ;;  %7857 = vmatpush1.bf16.msra.mxu0 %v9885_v22  ;;  %v9966_v19 = vcombine.high %v4868_v11, %v4872_v14  ;;  %v4860_v22 = vld [vmem:[#allocation11 + $0x3c0] sm:$0xff]  ;;  %v9965_v31 = vcombine.low %v4868_v11, %v4872_v14 }
 0x332   :  { %7898 = vmatpush1.bf16.msra.mxu1 %v10013_v29  ;;  %v4435_v40 = vpop.f32.mrf.mxu0  ;;  %7858 = vmatprep.subr.bf16.mxu0 %v9878_v30  ;;  %v4864_v29 = vld [vmem:[#allocation11 + $0x3e0] sm:$0xff] }
 0x333   :  { %v4476_v45 = vpop.f32.mrf.mxu1  ;;  %7899 = vmatprep.subr.bf16.mxu1 %v10006_v44  ;;  %v4988_v30 = vld [vmem:[#allocation11 + $0x7c0] sm:$0xff]  ;;  %v9958_v37 = vcombine.high %v4860_v22, %v4864_v29 }
 0x334   :  { %v4992_v44 = vld [vmem:[#allocation11 + $0x7e0] sm:$0xff] }
 0x335   :  { %7859 = vmatpush1.bf16.msra.mxu0 %v9877_v50  ;;  %v10086_v34 = vcombine.high %v4988_v30, %v4992_v44  ;;  %v4856_v38 = vld [vmem:[#allocation11 + $0x3a0] sm:$0xff] }
 0x336   :  { %7900 = vmatpush1.bf16.msra.mxu1 %v10005_v42  ;;  %7860 = vmatprep.subr.bf16.mxu0 %v9870_v57  ;;  %v4980_v50 = vld [vmem:[#allocation11 + $0x780] sm:$0xff]  ;;  %v9957_v42 = vcombine.low %v4860_v22, %v4864_v29  ;;  %v10085_v57 = vcombine.low %v4988_v30, %v4992_v44  ;;  %v9950_v45 = vcombine.high %v4852_v36, %v4856_v38 }
 0x337   :  { %7901 = vmatprep.subr.bf16.mxu1 %v9998_v46  ;;  %v4984_v40 = vld [vmem:[#allocation11 + $0x7a0] sm:$0xff] }
 0x338   :  { %v10078_v46 = vcombine.high %v4980_v50, %v4984_v40  ;;  %v4972_v48 = vld [vmem:[#allocation11 + $0x740] sm:$0xff] }
 0x339   :  { %7861 = vmatpush1.bf16.msra.mxu0 %v9869_v49  ;;  %v4976_v63 = vld [vmem:[#allocation11 + $0x760] sm:$0xff]  ;;  %v9949_v49 = vcombine.low %v4852_v36, %v4856_v38 }
 0x33a   :  { %7902 = vmatpush1.bf16.msra.mxu1 %v9997_v53  ;;  %7862 = vmatprep.subr.bf16.mxu0 %v9862_v55  ;;  %v10077_v53 = vcombine.low %v4980_v50, %v4984_v40  ;;  %v9942_v55 = vcombine.high %v4844_v47, %v4848_v51  ;;  %v4964_v62 = vld [vmem:[#allocation11 + $0x700] sm:$0xff] }
 0x33b   :  { %7903 = vmatprep.subr.bf16.mxu1 %v9990_v43  ;;  %v10070_v43 = vcombine.high %v4972_v48, %v4976_v63  ;;  %v4968_v0 = vld [vmem:[#allocation11 + $0x720] sm:$0xff] }
 0x33c   :  { %v4828_v3 = vld [vmem:[#allocation11 + $0x2c0] sm:$0xff] }
 0x33d   :  { %7863 = vmatpush1.bf16.msra.mxu0 %v9861_v26  ;;  %v9941_v26 = vcombine.low %v4844_v47, %v4848_v51  ;;  %v4832_v4 = vld [vmem:[#allocation11 + $0x2e0] sm:$0xff] }
 0x33e   :  { %7904 = vmatpush1.bf16.msra.mxu1 %v9989_v27  ;;  %7864 = vmatprep.subr.bf16.mxu0 %v9854_v1  ;;  %v10069_v27 = vcombine.low %v4972_v48, %v4976_v63  ;;  %v9934_v1 = vcombine.high %v4836_v56, %v4840_v59  ;;  %v4956_v6 = vld [vmem:[#allocation11 + $0x6c0] sm:$0xff] }
 0x33f   :  { %7905 = vmatprep.subr.bf16.mxu1 %v9982_v2  ;;  %v10062_v2 = vcombine.high %v4964_v62, %v4968_v0  ;;  %v4960_v54 = vld [vmem:[#allocation11 + $0x6e0] sm:$0xff] }
 0x340   :  { %v4820_v13 = vld [vmem:[#allocation11 + $0x280] sm:$0xff] }
 0x341   :  { %7865 = vmatpush1.bf16.msra.mxu0 %v9853_v20  ;;  %v9933_v20 = vcombine.low %v4836_v56, %v4840_v59  ;;  %v4824_v10 = vld [vmem:[#allocation11 + $0x2a0] sm:$0xff]  ;;  %v4726_v59 = vmax.f32 %v11050_v35, 0.0 }
 0x342   :  { %7906 = vmatpush1.bf16.msra.mxu1 %v9981_v7  ;;  %7866 = vmatprep.subr.bf16.mxu0 %v9846_v9  ;;  %v10061_v7 = vcombine.low %v4964_v62, %v4968_v0  ;;  %v9926_v9 = vcombine.high %v4828_v3, %v4832_v4  ;;  %v4948_v11 = vld [vmem:[#allocation11 + $0x680] sm:$0xff] }
 0x343   :  { %7907 = vmatprep.subr.bf16.mxu1 %v9974_v8  ;;  %v10054_v8 = vcombine.high %v4956_v6, %v4960_v54  ;;  %v4952_v14 = vld [vmem:[#allocation11 + $0x6a0] sm:$0xff] }
 0x344   :  { %v4812_v22 = vld [vmem:[#allocation11 + $0x240] sm:$0xff] }
 0x345   :  { %7867 = vmatpush1.bf16.msra.mxu0 %v9845_v15  ;;  %v9925_v15 = vcombine.low %v4828_v3, %v4832_v4  ;;  %v4816_v29 = vld [vmem:[#allocation11 + $0x260] sm:$0xff] }
 0x346   :  { %7908 = vmatpush1.bf16.msra.mxu1 %v9973_v16  ;;  %7868 = vmatprep.subr.bf16.mxu0 %v9838_v18  ;;  %v10053_v16 = vcombine.low %v4956_v6, %v4960_v54  ;;  %v9918_v18 = vcombine.high %v4820_v13, %v4824_v10  ;;  %v4940_v30 = vld [vmem:[#allocation11 + $0x640] sm:$0xff]  ;;  %v11084_v6 = vpack.c.bf16 %v4726_v59, %v4726_v59 }
 0x347   :  { %7909 = vmatprep.subr.bf16.mxu1 %v9966_v19  ;;  %v10046_v19 = vcombine.high %v4948_v11, %v4952_v14  ;;  %v4944_v44 = vld [vmem:[#allocation11 + $0x660] sm:$0xff] }
 0x348   :  { %v4804_v36 = vld [vmem:[#allocation11 + $0x200] sm:$0xff] }
 0x349   :  { %7869 = vmatpush1.bf16.msra.mxu0 %v9837_v60  ;;  %v9917_v60 = vcombine.low %v4820_v13, %v4824_v10  ;;  %v4808_v38 = vld [vmem:[#allocation11 + $0x220] sm:$0xff] }
 0x34a   :  { %7910 = vmatpush1.bf16.msra.mxu1 %v9965_v31  ;;  %7870 = vmatprep.subr.bf16.mxu0 %v9958_v37  ;;  %v10045_v31 = vcombine.low %v4948_v11, %v4952_v14  ;;  %v9910_v37 = vcombine.high %v4812_v22, %v4816_v29  ;;  %v4932_v50 = vld [vmem:[#allocation11 + $0x600] sm:$0xff] }
 0x34b   :  { %7911 = vmatprep.subr.bf16.mxu1 %v10086_v34  ;;  %v10038_v34 = vcombine.high %v4940_v30, %v4944_v44  ;;  %v4936_v40 = vld [vmem:[#allocation11 + $0x620] sm:$0xff] }
 0x34c   :  { %v5052_v47 = vld [vmem:[#allocation11 + $0x9c0] sm:$0xff] }
 0x34d   :  { %7871 = vmatpush2.bf16.msra.mxu0 %v9957_v42  ;;  %v9909_v42 = vcombine.low %v4812_v22, %v4816_v29  ;;  %v5056_v51 = vld [vmem:[#allocation11 + $0x9e0] sm:$0xff] }
 0x34e   :  { %7912 = vmatpush2.bf16.msra.mxu1 %v10085_v57  ;;  %7872 = vmatprep.subr.bf16.mxu0 %v9950_v45  ;;  %v10037_v57 = vcombine.low %v4940_v30, %v4944_v44  ;;  %v9902_v45 = vcombine.high %v4804_v36, %v4808_v38  ;;  %v5180_v48 = vld [vmem:[#allocation11 + $0xdc0] sm:$0xff]  ;;  %v10150_v56 = vcombine.high %v5052_v47, %v5056_v51 }
 0x34f   :  { %7913 = vmatprep.subr.bf16.mxu1 %v10078_v46  ;;  %v10030_v46 = vcombine.high %v4932_v50, %v4936_v40  ;;  %v5184_v63 = vld [vmem:[#allocation11 + $0xde0] sm:$0xff] }
 0x350   :  { %v5044_v62 = vld [vmem:[#allocation11 + $0x980] sm:$0xff]  ;;  %v10277_v4 = vcombine.low %v5180_v48, %v5184_v63 }
 0x351   :  { %7873 = vmatpush2.bf16.msra.mxu0 %v9949_v49  ;;  %v1491_v49 = vrot.slane %v11059_v5, %v10968_v12  ;;  %v5048_v0 = vld [vmem:[#allocation11 + $0x9a0] sm:$0xff]  ;;  %v10149_v5 = vcombine.low %v5052_v47, %v5056_v51 }
 0x352   :  { %7914 = vmatpush2.bf16.msra.mxu1 %v10077_v53  ;;  %7874 = vmatprep.subr.bf16.mxu0 %v9942_v55  ;;  %v9901_v53 = vcombine.low %v4804_v36, %v4808_v38  ;;  %v4724_v55 = vmax.f32 %v11026_v32, 0.0  ;;  %v10142_v32 = vcombine.high %v5044_v62, %v5048_v0  ;;  %v5036_v54 = vld [vmem:[#allocation11 + $0x940] sm:$0xff]  ;;  %v10141_v10 = vcombine.low %v5044_v62, %v5048_v0 }
 0x353   :  { %7915 = vmatprep.subr.bf16.mxu1 %v10070_v43  ;;  %v10029_v43 = vcombine.low %v4932_v50, %v4936_v40  ;;  %v5040_v35 = vld [vmem:[#allocation11 + $0x960] sm:$0xff] }
 0x354   :  { %v11082_v3 = vpack.c.bf16 %v4724_v55, %v4724_v55  ;;  %v10134_v14 = vcombine.high %v5036_v54, %v5040_v35  ;;  %v5032_v22 = vld [vmem:[#allocation11 + $0x920] sm:$0xff]  ;;  %v11097_v55 = vld [vmem:[#allocation11 + $0x5e8] sm:$0xff] }
 0x355   :  { %7875 = vmatpush2.bf16.msra.mxu0 %v9941_v26  ;;  %v10278_v26 = vcombine.high %v5180_v48, %v5184_v63  ;;  %v5156_v44 = vld [vmem:[#allocation11 + $0xd00] sm:$0xff] }
 0x356   :  { %7916 = vmatpush2.bf16.msra.mxu1 %v10069_v27  ;;  %7876 = vmatprep.subr.bf16.mxu0 %v9934_v1  ;;  %v5172_v27 = vld [vmem:[#allocation11 + $0xd80] sm:$0xff] }
 0x357   :  { %7917 = vmatprep.subr.bf16.mxu1 %v10062_v2  ;;  %v5176_v1 = vld [vmem:[#allocation11 + $0xda0] sm:$0xff]  ;;  %v4433_v2 = vadd.f32 %v11070_v28, %v1491_v49 }
 0x358   :  { %v5168_v28 = vld [vmem:[#allocation11 + $0xd60] sm:$0xff] }
 0x359   :  { %7877 = vmatpush2.bf16.msra.mxu0 %v9933_v20  ;;  %v10270_v20 = vcombine.high %v5172_v27, %v5176_v1  ;;  %v5152_v47 = vld [vmem:[#allocation11 + $0xce0] sm:$0xff] }
 0x35a   :  { %7918 = vmatpush2.bf16.msra.mxu1 %v10061_v7  ;;  %7878 = vmatprep.subr.bf16.mxu0 %v9926_v9  ;;  %v5164_v9 = vld [vmem:[#allocation11 + $0xd40] sm:$0xff] }
 0x35b   :  { %7919 = vmatprep.subr.bf16.mxu1 %v10054_v8  ;;  %v4474_v8 = vadd.f32 %v11075_v41, %v4433_v2  ;;  %v10262_v29 = vcombine.high %v5164_v9, %v5168_v28  ;;  %v5160_v41 = vld [vmem:[#allocation11 + $0xd20] sm:$0xff]  ;;  %v10261_v38 = vcombine.low %v5164_v9, %v5168_v28 }
 0x35c   :  { %v10253_v49 = vcombine.low %v5156_v44, %v5160_v41  ;;  %v5140_v0 = vld [vmem:[#allocation11 + $0xc80] sm:$0xff] }
 0x35d   :  { %7879 = vmatpush2.bf16.msra.mxu0 %v9925_v15  ;;  %v10269_v15 = vcombine.low %v5172_v27, %v5176_v1 }
 0x35e   :  { %7920 = vmatpush2.bf16.msra.mxu1 %v10053_v16  ;;  %7880 = vmatprep.subr.bf16.mxu0 %v9918_v18 }
 0x35f   :  { %7921 = vmatprep.subr.bf16.mxu1 %v10046_v19  ;;  %v5028_v19 = vld [vmem:[#allocation11 + $0x900] sm:$0xff] }
 0x360   :  { %v10126_v36 = vcombine.high %v5028_v19, %v5032_v22  ;;  %v10125_v48 = vcombine.low %v5028_v19, %v5032_v22  ;;  %v5116_v22 = vld [vmem:[#allocation11 + $0xbc0] sm:$0xff] }
 0x361   :  { %7881 = vmatpush2.bf16.msra.mxu0 %v9917_v60 }
 0x362   :  { %7922 = vmatpush2.bf16.msra.mxu1 %v10045_v31  ;;  %7882 = vmatprep.subr.bf16.mxu0 %v9910_v37  ;;  %v10133_v37 = vcombine.low %v5036_v54, %v5040_v35  ;;  %v5132_v54 = vld [vmem:[#allocation11 + $0xc40] sm:$0xff] }
 0x363   :  { %7923 = vmatprep.subr.bf16.mxu1 %v10038_v34  ;;  %v5136_v35 = vld [vmem:[#allocation11 + $0xc60] sm:$0xff] }
 0x364   :  { %v10229_v19 = vcombine.low %v5132_v54, %v5136_v35 }
 0x365   :  { %7883 = vmatpush2.bf16.msra.mxu0 %v9909_v42  ;;  %v5020_v42 = vld [vmem:[#allocation11 + $0x8c0] sm:$0xff] }
 0x366   :  { %7924 = vmatpush2.bf16.msra.mxu1 %v10037_v57  ;;  %7884 = vmatprep.subr.bf16.mxu0 %v9902_v45  ;;  %v5024_v57 = vld [vmem:[#allocation11 + $0x8e0] sm:$0xff]  ;;  %v10254_v45 = vcombine.high %v5156_v44, %v5160_v41 }
 0x367   :  { %7925 = vmatprep.subr.bf16.mxu1 %v10030_v46  ;;  %v5148_v46 = vld [vmem:[#allocation11 + $0xcc0] sm:$0xff]  ;;  %v10118_v63 = vcombine.high %v5020_v42, %v5024_v57  ;;  %v10117_v27 = vcombine.low %v5020_v42, %v5024_v57 }
 0x368   :  { %v10246_v59 = vcombine.high %v5148_v46, %v5152_v47  ;;  %v10245_v2 = vcombine.low %v5148_v46, %v5152_v47  ;;  %v5244_v44 = vld [vmem:[#allocation11 + $0xfc0] sm:$0xff] }
 0x369   :  { %7885 = vmatpush2.bf16.msra.mxu0 %v9901_v53  ;;  %v11095_v53 = vld [vmem:[#allocation11 + $0x5c8] sm:$0xff]  ;;  %v5248_v41 = vld [vmem:[#allocation11 + $0xfe0] sm:$0xff] }
 0x36a   :  { %7926 = vmatpush2.bf16.msra.mxu1 %v10029_v43  ;;  %7936 = vmatprep.subr.bf16.mxu0 %v10150_v56  ;;  %v5012_v43 = vld [vmem:[#allocation11 + $0x880] sm:$0xff]  ;;  %v10023_v62 = vcombine.low %v11095_v53, %v11097_v55 }
 0x36b   :  { %7977 = vmatprep.subr.bf16.mxu1 %v10278_v26  ;;  %v5016_v56 = vld [vmem:[#allocation11 + $0x8a0] sm:$0xff] }
 0x36c   :  { %v11086_v7 = vpop.f32.mrf.mxu0  ;;  %7887 = vmatmul.mubr.bf16.vlgmr.msra.gmra.mxu0 %v11082_v3  ;;  %v5144_v26 = vld [vmem:[#allocation11 + $0xca0] sm:$0xff]  ;;  %v10110_v1 = vcombine.high %v5012_v43, %v5016_v56 }
 0x36d   :  { %v11090_v13 = vpop.f32.mrf.mxu1  ;;  %7928 = vmatmul.mubr.bf16.vlgmr.msra.gmra.mxu1 %v11084_v6  ;;  %7937 = vmatpush1.bf16.msra.mxu0 %v10149_v5  ;;  %v5004_v5 = vld [vmem:[#allocation11 + $0x840] sm:$0xff]  ;;  %v10237_v28 = vcombine.low %v5140_v0, %v5144_v26 }
 0x36e   :  { %v4514_v11 = vpop.f32.mrf.mxu0  ;;  %7938 = vmatprep.subr.bf16.mxu0 %v10142_v32  ;;  %7978 = vmatpush1.bf16.msra.mxu1 %v10277_v4  ;;  %v5008_v32 = vld [vmem:[#allocation11 + $0x860] sm:$0xff]  ;;  %v10238_v4 = vcombine.high %v5140_v0, %v5144_v26 }
 0x36f   :  { %v4515_v16 = vadd.f32 %v4514_v11, %v4474_v8  ;;  %v4555_v18 = vpop.f32.mrf.mxu1  ;;  %7979 = vmatprep.subr.bf16.mxu1 %v10270_v20  ;;  %v10109_v20 = vcombine.low %v5012_v43, %v5016_v56  ;;  %v10102_v9 = vcombine.high %v5004_v5, %v5008_v32  ;;  %v4996_v8 = vld [vmem:[#allocation11 + $0x800] sm:$0xff]  ;;  %v10230_v11 = vcombine.high %v5132_v54, %v5136_v35 }
 0x370   :  { %v4516_v30 = vpop.f32.mrf.mxu0  ;;  %v5100_v46 = vld [vmem:[#allocation11 + $0xb40] sm:$0xff] }
 0x371   :  { %v4556_v60 = vadd.f32 %v4555_v18, %v4515_v16  ;;  %v4557_v31 = vpop.f32.mrf.mxu1  ;;  %7939 = vmatpush1.bf16.msra.mxu0 %v10141_v10  ;;  %v5000_v10 = vld [vmem:[#allocation11 + $0x820] sm:$0xff]  ;;  %v10101_v16 = vcombine.low %v5004_v5, %v5008_v32 }
 0x372   :  { %v4517_v34 = vpop.f32.mrf.mxu0  ;;  %7940 = vmatprep.subr.bf16.mxu0 %v10134_v14  ;;  %7980 = vmatpush1.bf16.msra.mxu1 %v10269_v15  ;;  %v5124_v14 = vld [vmem:[#allocation11 + $0xc00] sm:$0xff]  ;;  %v10094_v18 = vcombine.high %v4996_v8, %v5000_v10 }
 0x373   :  { %v4729_v50 = vmax.f32 %v4556_v60, 0.0  ;;  %v4558_v40 = vpop.f32.mrf.mxu1  ;;  %7981 = vmatprep.subr.bf16.mxu1 %v10262_v29  ;;  %v5128_v15 = vld [vmem:[#allocation11 + $0xc20] sm:$0xff]  ;;  %v10093_v60 = vcombine.low %v4996_v8, %v5000_v10 }
 0x374   :  { %v5120_v29 = vld [vmem:[#allocation11 + $0xbe0] sm:$0xff]  ;;  %v10222_v30 = vcombine.high %v5124_v14, %v5128_v15 }
 0x375   :  { %v11093_v51 = vpack.c.bf16 %v4729_v50, %v4729_v50  ;;  %7941 = vmatpush1.bf16.msra.mxu0 %v10133_v37  ;;  %v10214_v31 = vcombine.high %v5116_v22, %v5120_v29  ;;  %v10221_v37 = vcombine.low %v5124_v14, %v5128_v15  ;;  %v5108_v34 = vld [vmem:[#allocation11 + $0xb80] sm:$0xff]  ;;  %v10213_v42 = vcombine.low %v5116_v22, %v5120_v29 }
 0x376   :  { %7942 = vmatprep.subr.bf16.mxu0 %v10126_v36  ;;  %7982 = vmatpush1.bf16.msra.mxu1 %v10261_v38  ;;  %v5112_v36 = vld [vmem:[#allocation11 + $0xba0] sm:$0xff]  ;;  %v10342_v38 = vcombine.high %v5244_v44, %v5248_v41 }
 0x377   :  { %7968 = vmatprep.mubr.bf16.mxu0 %v11093_v51  ;;  %7983 = vmatprep.subr.bf16.mxu1 %v10254_v45  ;;  %v5236_v50 = vld [vmem:[#allocation11 + $0xf80] sm:$0xff]  ;;  %v10206_v57 = vcombine.high %v5108_v34, %v5112_v36  ;;  %v10341_v45 = vcombine.low %v5244_v44, %v5248_v41  ;;  %v10205_v43 = vcombine.low %v5108_v34, %v5112_v36 }
 0x378   :  { %v5240_v40 = vld [vmem:[#allocation11 + $0xfa0] sm:$0xff]  ;;  %v4513_v36 = vadd.f32 %v11086_v7, %v11072_v33  ;;  %v4801_v33 = vld [vmem:[#allocation11 + $0x1e8] sm:$0xff] }
 0x379   :  { %7943 = vmatpush1.bf16.msra.mxu0 %v10125_v48  ;;  %v5104_v47 = vld [vmem:[#allocation11 + $0xb60] sm:$0xff]  ;;  %v10334_v48 = vcombine.high %v5236_v50, %v5240_v40 }
 0x37a   :  { %7944 = vmatprep.subr.bf16.mxu0 %v10118_v63  ;;  %7984 = vmatpush1.bf16.msra.mxu1 %v10253_v49  ;;  %v5228_v63 = vld [vmem:[#allocation11 + $0xf40] sm:$0xff]  ;;  %v10198_v56 = vcombine.high %v5100_v46, %v5104_v47  ;;  %v10197_v5 = vcombine.low %v5100_v46, %v5104_v47 }
 0x37b   :  { %7985 = vmatprep.subr.bf16.mxu1 %v10246_v59  ;;  %v5232_v49 = vld [vmem:[#allocation11 + $0xf60] sm:$0xff]  ;;  %v10333_v59 = vcombine.low %v5236_v50, %v5240_v40 }
 0x37c   :  { %v5092_v0 = vld [vmem:[#allocation11 + $0xb00] sm:$0xff] }
 0x37d   :  { %7945 = vmatpush1.bf16.msra.mxu0 %v10117_v27  ;;  %v5096_v26 = vld [vmem:[#allocation11 + $0xb20] sm:$0xff]  ;;  %v10326_v27 = vcombine.high %v5228_v63, %v5232_v49 }
 0x37e   :  { %7946 = vmatprep.subr.bf16.mxu0 %v10110_v1  ;;  %7986 = vmatpush1.bf16.msra.mxu1 %v10245_v2  ;;  %v5220_v1 = vld [vmem:[#allocation11 + $0xf00] sm:$0xff]  ;;  %v10190_v32 = vcombine.high %v5092_v0, %v5096_v26  ;;  %v10189_v8 = vcombine.low %v5092_v0, %v5096_v26 }
 0x37f   :  { %7987 = vmatprep.subr.bf16.mxu1 %v10238_v4  ;;  %v5224_v2 = vld [vmem:[#allocation11 + $0xf20] sm:$0xff]  ;;  %v10325_v4 = vcombine.low %v5228_v63, %v5232_v49 }
 0x380   :  { %v5084_v54 = vld [vmem:[#allocation11 + $0xac0] sm:$0xff] }
 0x381   :  { %7947 = vmatpush1.bf16.msra.mxu0 %v10109_v20  ;;  %v5088_v35 = vld [vmem:[#allocation11 + $0xae0] sm:$0xff]  ;;  %v10318_v20 = vcombine.high %v5220_v1, %v5224_v2 }
 0x382   :  { %7948 = vmatprep.subr.bf16.mxu0 %v10102_v9  ;;  %7988 = vmatpush1.bf16.msra.mxu1 %v10237_v28  ;;  %v5212_v9 = vld [vmem:[#allocation11 + $0xec0] sm:$0xff]  ;;  %v10182_v10 = vcombine.high %v5084_v54, %v5088_v35  ;;  %v10181_v22 = vcombine.low %v5084_v54, %v5088_v35  ;;  %v4785_v54 = vld [vmem:[#allocation11 + $0x168] sm:$0xff] }
 0x383   :  { %7989 = vmatprep.subr.bf16.mxu1 %v10230_v11  ;;  %v5216_v28 = vld [vmem:[#allocation11 + $0xee0] sm:$0xff]  ;;  %v10317_v11 = vcombine.low %v5220_v1, %v5224_v2  ;;  %v4793_v1 = vld [vmem:[#allocation11 + $0x1a8] sm:$0xff] }
 0x384   :  { %v5076_v14 = vld [vmem:[#allocation11 + $0xa80] sm:$0xff] }
 0x385   :  { %7949 = vmatpush1.bf16.msra.mxu0 %v10101_v16  ;;  %v5080_v15 = vld [vmem:[#allocation11 + $0xaa0] sm:$0xff]  ;;  %v10310_v16 = vcombine.high %v5212_v9, %v5216_v28 }
 0x386   :  { %7950 = vmatprep.subr.bf16.mxu0 %v10094_v18  ;;  %7990 = vmatpush1.bf16.msra.mxu1 %v10229_v19  ;;  %v5204_v18 = vld [vmem:[#allocation11 + $0xe80] sm:$0xff]  ;;  %v10174_v29 = vcombine.high %v5076_v14, %v5080_v15  ;;  %v10173_v34 = vcombine.low %v5076_v14, %v5080_v15  ;;  %v4777_v14 = vld [vmem:[#allocation11 + $0x128] sm:$0xff] }
 0x387   :  { %7991 = vmatprep.subr.bf16.mxu1 %v10222_v30  ;;  %v5208_v19 = vld [vmem:[#allocation11 + $0xea0] sm:$0xff]  ;;  %v10309_v30 = vcombine.low %v5212_v9, %v5216_v28 }
 0x388   :  { %v5068_v44 = vld [vmem:[#allocation11 + $0xa40] sm:$0xff]  ;;  %v10301_v50 = vcombine.low %v5204_v18, %v5208_v19 }
 0x389   :  { %7951 = vmatpush1.bf16.msra.mxu0 %v10093_v60  ;;  %v5072_v41 = vld [vmem:[#allocation11 + $0xa60] sm:$0xff]  ;;  %v10302_v60 = vcombine.high %v5204_v18, %v5208_v19 }
 0x38a   :  { %7952 = vmatprep.subr.bf16.mxu0 %v10214_v31  ;;  %7992 = vmatpush1.bf16.msra.mxu1 %v10221_v37  ;;  %v5196_v31 = vld [vmem:[#allocation11 + $0xe40] sm:$0xff]  ;;  %v10165_v47 = vcombine.low %v5068_v44, %v5072_v41 }
 0x38b   :  { %7993 = vmatprep.subr.bf16.mxu1 %v10342_v38  ;;  %v5200_v37 = vld [vmem:[#allocation11 + $0xe60] sm:$0xff]  ;;  %v10166_v38 = vcombine.high %v5068_v44, %v5072_v41  ;;  %v4769_v44 = vld [vmem:[#allocation11 + $0xe8] sm:$0xff] }
 0x38c   :  { %v5060_v40 = vld [vmem:[#allocation11 + $0xa00] sm:$0xff]  ;;  %v10293_v49 = vcombine.low %v5196_v31, %v5200_v37 }
 0x38d   :  { %7953 = vmatpush2.bf16.msra.mxu0 %v10213_v42  ;;  %v5064_v42 = vld [vmem:[#allocation11 + $0xa20] sm:$0xff] }
 0x38e   :  { %7954 = vmatprep.subr.bf16.mxu0 %v10206_v57  ;;  %7994 = vmatpush2.bf16.msra.mxu1 %v10341_v45  ;;  %v10294_v57 = vcombine.high %v5196_v31, %v5200_v37  ;;  %v5188_v45 = vld [vmem:[#allocation11 + $0xe00] sm:$0xff]  ;;  %v10158_v63 = vcombine.high %v5060_v40, %v5064_v42  ;;  %v4757_v31 = vld [vmem:[#allocation11 + $0x88] sm:$0xff] }
 0x38f   :  { %7995 = vmatprep.subr.bf16.mxu1 %v10334_v48  ;;  %v5192_v46 = vld [vmem:[#allocation11 + $0xe20] sm:$0xff]  ;;  %v4554_v48 = vadd.f32 %v11090_v13, %v4513_v36  ;;  %v10024_v13 = vcombine.high %v11095_v53, %v11097_v55  ;;  %v4761_v37 = vld [vmem:[#allocation11 + $0xa8] sm:$0xff] }
 0x390   :  { %v10286_v7 = vcombine.high %v5188_v45, %v5192_v46  ;;  %v10285_v26 = vcombine.low %v5188_v45, %v5192_v46  ;;  %v9856_v36 = vcombine.high %v4757_v31, %v4761_v37  ;;  %v4745_v45 = vld [vmem:[#allocation11 + $0x28] sm:$0xff] }
 0x391   :  { %7955 = vmatpush2.bf16.msra.mxu0 %v10205_v43  ;;  %v4797_v43 = vld [vmem:[#allocation11 + $0x1c8] sm:$0xff] }
 0x392   :  { %7956 = vmatprep.subr.bf16.mxu0 %v10198_v56  ;;  %7996 = vmatpush2.bf16.msra.mxu1 %v10333_v59  ;;  %v10157_v56 = vcombine.low %v5060_v40, %v5064_v42  ;;  %v4728_v59 = vmax.f32 %v4554_v48, 0.0  ;;  %v9896_v0 = vcombine.high %v4797_v43, %v4801_v33  ;;  %v9895_v2 = vcombine.low %v4797_v43, %v4801_v33  ;;  %v4861_v48 = vld [vmem:[#allocation11 + $0x3c8] sm:$0xff] }
 0x393   :  { %7997 = vmatprep.subr.bf16.mxu1 %v10326_v27  ;;  %v4789_v27 = vld [vmem:[#allocation11 + $0x188] sm:$0xff]  ;;  %v9855_v40 = vcombine.low %v4757_v31, %v4761_v37  ;;  %v10582_v37 = vld [vmem:[#allocation10] sm:$0xff] }
 0x394   :  { %v9887_v9 = vcombine.low %v4789_v27, %v4793_v1  ;;  %v4853_v33 = vld [vmem:[#allocation11 + $0x388] sm:$0xff] }
 0x395   :  { %7957 = vmatpush2.bf16.msra.mxu0 %v10197_v5  ;;  %v11107_v5 = vpack.c.bf16 %v4728_v59, %v4728_v59 }
 0x396   :  { %7958 = vmatprep.subr.bf16.mxu0 %v10190_v32  ;;  %7998 = vmatpush2.bf16.msra.mxu1 %v10325_v4  ;;  %v9888_v32 = vcombine.high %v4789_v27, %v4793_v1  ;;  %v4781_v4 = vld [vmem:[#allocation11 + $0x148] sm:$0xff] }
 0x397   :  { %7999 = vmatprep.subr.bf16.mxu1 %v10318_v20  ;;  %v9879_v18 = vcombine.low %v4781_v4, %v4785_v54 }
 0x399   :  { %7959 = vmatpush2.bf16.msra.mxu0 %v10189_v8  ;;  %v9880_v8 = vcombine.high %v4781_v4, %v4785_v54  ;;  %v4829_v54 = vld [vmem:[#allocation11 + $0x2c8] sm:$0xff] }
 0x39a   :  { %7960 = vmatprep.subr.bf16.mxu0 %v10182_v10  ;;  %8000 = vmatpush2.bf16.msra.mxu1 %v10317_v11  ;;  %v4773_v11 = vld [vmem:[#allocation11 + $0x108] sm:$0xff] }
 0x39b   :  { %8001 = vmatprep.subr.bf16.mxu1 %v10310_v16  ;;  %v9871_v41 = vcombine.low %v4773_v11, %v4777_v14 }
 0x39d   :  { %7961 = vmatpush2.bf16.msra.mxu0 %v10181_v22  ;;  %v9872_v22 = vcombine.high %v4773_v11, %v4777_v14  ;;  %v4821_v14 = vld [vmem:[#allocation11 + $0x288] sm:$0xff] }
 0x39e   :  { %7962 = vmatprep.subr.bf16.mxu0 %v10174_v29  ;;  %8002 = vmatpush2.bf16.msra.mxu1 %v10309_v30  ;;  %v4765_v30 = vld [vmem:[#allocation11 + $0xc8] sm:$0xff] }
 0x39f   :  { %8003 = vmatprep.subr.bf16.mxu1 %v10302_v60  ;;  %v9864_v60 = vcombine.high %v4765_v30, %v4769_v44 }
 0x3a1   :  { %7963 = vmatpush2.bf16.msra.mxu0 %v10173_v34  ;;  %v9863_v34 = vcombine.low %v4765_v30, %v4769_v44  ;;  %v4805_v44 = vld [vmem:[#allocation11 + $0x208] sm:$0xff] }
 0x3a2   :  { %7964 = vmatprep.subr.bf16.mxu0 %v10166_v38  ;;  %8004 = vmatpush2.bf16.msra.mxu1 %v10301_v50  ;;  %v4749_v38 = vld [vmem:[#allocation11 + $0x48] sm:$0xff] }
 0x3a3   :  { %8005 = vmatprep.subr.bf16.mxu1 %v10294_v57  ;;  %v4753_v50 = vld [vmem:[#allocation11 + $0x68] sm:$0xff] }
 0x3a4   :  { %v9848_v42 = vcombine.high %v4749_v38, %v4753_v50  ;;  %v4741_v57 = vld [vmem:[#allocation11 + $0x8] sm:$0xff]  ;;  %v9847_v46 = vcombine.low %v4749_v38, %v4753_v50  ;;  %v1499_v50 = vrot.slane %v10582_v37, %v10971_v52 }
 0x3a5   :  { %7965 = vmatpush2.bf16.msra.mxu0 %v10165_v47  ;;  %v9840_v47 = vcombine.high %v4741_v57, %v4745_v45  ;;  %v5057_v38 = vld [vmem:[#allocation11 + $0x9e8] sm:$0xff] }
 0x3a6   :  { %7966 = vmatprep.subr.bf16.mxu0 %v10158_v63  ;;  %8006 = vmatpush2.bf16.msra.mxu1 %v10293_v49  ;;  %v4865_v63 = vld [vmem:[#allocation11 + $0x3e8] sm:$0xff]  ;;  %v9839_v49 = vcombine.low %v4741_v57, %v4745_v45 }
 0x3a7   :  { %8007 = vmatprep.subr.bf16.mxu1 %v10286_v7  ;;  %v9960_v43 = vcombine.high %v4861_v48, %v4865_v63  ;;  %v4857_v7 = vld [vmem:[#allocation11 + $0x3a8] sm:$0xff] }
 0x3a8   :  { %v9952_v59 = vcombine.high %v4853_v33, %v4857_v7  ;;  %v9951_v27 = vcombine.low %v4853_v33, %v4857_v7  ;;  %v5045_v45 = vld [vmem:[#allocation11 + $0x988] sm:$0xff] }
 0x3a9   :  { %7967 = vmatpush2.bf16.msra.mxu0 %v10157_v56  ;;  %v9959_v56 = vcombine.low %v4861_v48, %v4865_v63  ;;  %v5041_v33 = vld [vmem:[#allocation11 + $0x968] sm:$0xff] }
 0x3aa   :  { %8018 = vmatprep.subr.bf16.mxu0 %v9896_v0  ;;  %8008 = vmatpush2.bf16.msra.mxu1 %v10285_v26  ;;  %v4845_v0 = vld [vmem:[#allocation11 + $0x348] sm:$0xff] }
 0x3ab   :  { %8059 = vmatprep.subr.bf16.mxu1 %v10024_v13  ;;  %v4849_v26 = vld [vmem:[#allocation11 + $0x368] sm:$0xff] }
 0x3ac   :  { %v11109_v35 = vpop.f32.mrf.mxu0  ;;  %7969 = vmatmul.mubr.bf16.vlgmr.msra.gmra.mxu0 %v11107_v5  ;;  %v9944_v1 = vcombine.high %v4845_v0, %v4849_v26  ;;  %v4837_v13 = vld [vmem:[#allocation11 + $0x308] sm:$0xff] }
 0x3ad   :  { %v11112_v20 = vpop.f32.mrf.mxu1  ;;  %8019 = vmatpush1.bf16.msra.mxu0 %v9895_v2  ;;  %8050 = vmatprep.mubr.bf16.mxu0 %v11063_v39  ;;  %v4841_v2 = vld [vmem:[#allocation11 + $0x328] sm:$0xff] }
 0x3ae   :  { %v11115_v28 = vpop.f32.mrf.mxu0  ;;  %8020 = vmatprep.subr.bf16.mxu0 %v9888_v32  ;;  %v9943_v32 = vcombine.low %v4845_v0, %v4849_v26  ;;  %v9936_v4 = vcombine.high %v4837_v13, %v4841_v2 }
 0x3af   :  { %v11117_v10 = vpop.f32.mrf.mxu1 }
 0x3b0   :  { %v4598_v15 = vpop.f32.mrf.mxu0 }
 0x3b1   :  { %v4639_v16 = vpop.f32.mrf.mxu1  ;;  %8021 = vmatpush1.bf16.msra.mxu0 %v9887_v9  ;;  %v4833_v9 = vld [vmem:[#allocation11 + $0x2e8] sm:$0xff] }
 0x3b2   :  { %v4599_v19 = vpop.f32.mrf.mxu0  ;;  %8022 = vmatprep.subr.bf16.mxu0 %v9880_v8  ;;  %v9935_v8 = vcombine.low %v4837_v13, %v4841_v2  ;;  %v9928_v11 = vcombine.high %v4829_v54, %v4833_v9  ;;  %v4825_v15 = vld [vmem:[#allocation11 + $0x2a8] sm:$0xff]  ;;  %v9927_v16 = vcombine.low %v4829_v54, %v4833_v9 }
 0x3b3   :  { %v4640_v29 = vpop.f32.mrf.mxu1  ;;  %v4813_v19 = vld [vmem:[#allocation11 + $0x248] sm:$0xff] }
 0x3b4   :  { %v9919_v29 = vcombine.low %v4821_v14, %v4825_v15  ;;  %v5033_v2 = vld [vmem:[#allocation11 + $0x928] sm:$0xff] }
 0x3b5   :  { %8023 = vmatpush1.bf16.msra.mxu0 %v9879_v18  ;;  %v9920_v18 = vcombine.high %v4821_v14, %v4825_v15 }
 0x3b6   :  { %8024 = vmatprep.subr.bf16.mxu0 %v9872_v22  ;;  %v4817_v22 = vld [vmem:[#allocation11 + $0x268] sm:$0xff] }
 0x3b7   :  { %v9912_v30 = vcombine.high %v4813_v19, %v4817_v22 }
 0x3b9   :  { %8025 = vmatpush1.bf16.msra.mxu0 %v9871_v41  ;;  %v4809_v41 = vld [vmem:[#allocation11 + $0x228] sm:$0xff] }
 0x3ba   :  { %8026 = vmatprep.subr.bf16.mxu0 %v9864_v60  ;;  %v9911_v60 = vcombine.low %v4813_v19, %v4817_v22  ;;  %v9904_v31 = vcombine.high %v4805_v44, %v4809_v41  ;;  %v5021_v19 = vld [vmem:[#allocation11 + $0x8c8] sm:$0xff] }
 0x3bb   :  { %v5025_v22 = vld [vmem:[#allocation11 + $0x8e8] sm:$0xff] }
 0x3bd   :  { %8027 = vmatpush1.bf16.msra.mxu0 %v9863_v34  ;;  %v1495_v34 = vrot.slane %v10582_v37, %v10982_v58  ;;  %v4913_v37 = vld [vmem:[#allocation11 + $0x568] sm:$0xff] }
 0x3be   :  { %8028 = vmatprep.subr.bf16.mxu0 %v9856_v36  ;;  %v5053_v36 = vld [vmem:[#allocation11 + $0x9c8] sm:$0xff] }
 0x3bf   :  { %v4595_v57 = vadd.f32 %v11109_v35, %v1495_v34  ;;  %v10151_v48 = vcombine.low %v5053_v36, %v5057_v38  ;;  %v5013_v34 = vld [vmem:[#allocation11 + $0x888] sm:$0xff] }
 0x3c1   :  { %8029 = vmatpush1.bf16.msra.mxu0 %v9855_v40  ;;  %v9903_v40 = vcombine.low %v4805_v44, %v4809_v41 }
 0x3c2   :  { %8030 = vmatprep.subr.bf16.mxu0 %v9848_v42  ;;  %v10152_v42 = vcombine.high %v5053_v36, %v5057_v38  ;;  %v5017_v36 = vld [vmem:[#allocation11 + $0x8a8] sm:$0xff] }
 0x3c5   :  { %8031 = vmatpush1.bf16.msra.mxu0 %v9847_v46  ;;  %v5049_v46 = vld [vmem:[#allocation11 + $0x9a8] sm:$0xff] }
 0x3c6   :  { %8032 = vmatprep.subr.bf16.mxu0 %v9840_v47  ;;  %v4597_v47 = vadd.f32 %v11115_v28, %v1499_v50  ;;  %v10144_v63 = vcombine.high %v5045_v45, %v5049_v46  ;;  %v10143_v35 = vcombine.low %v5045_v45, %v5049_v46  ;;  %v10119_v50 = vcombine.low %v5021_v19, %v5025_v22  ;;  %v4905_v45 = vld [vmem:[#allocation11 + $0x528] sm:$0xff] }
 0x3c7   :  { %v5005_v46 = vld [vmem:[#allocation11 + $0x848] sm:$0xff] }
 0x3c9   :  { %8033 = vmatpush1.bf16.msra.mxu0 %v9839_v49  ;;  %v4636_v49 = vadd.f32 %v11112_v20, %v4595_v57  ;;  %v5029_v20 = vld [vmem:[#allocation11 + $0x908] sm:$0xff] }
 0x3ca   :  { %8034 = vmatprep.subr.bf16.mxu0 %v9960_v43  ;;  %v5037_v43 = vld [vmem:[#allocation11 + $0x948] sm:$0xff]  ;;  %v10127_v44 = vcombine.low %v5029_v20, %v5033_v2 }
 0x3cb   :  { %v10136_v26 = vcombine.high %v5037_v43, %v5041_v33  ;;  %v10135_v9 = vcombine.low %v5037_v43, %v5041_v33  ;;  %v4901_v57 = vld [vmem:[#allocation11 + $0x508] sm:$0xff] }
 0x3cc   :  { %v10000_v53 = vcombine.high %v4901_v57, %v4905_v45  ;;  %v4997_v43 = vld [vmem:[#allocation11 + $0x808] sm:$0xff] }
 0x3cd   :  { %8035 = vmatpush2.bf16.msra.mxu0 %v9959_v56  ;;  %v4638_v56 = vadd.f32 %v11117_v10, %v4597_v47  ;;  %v5009_v47 = vld [vmem:[#allocation11 + $0x868] sm:$0xff] }
 0x3ce   :  { %8036 = vmatprep.subr.bf16.mxu0 %v9952_v59  ;;  %v10104_v55 = vcombine.high %v5005_v46, %v5009_v47  ;;  %v5001_v33 = vld [vmem:[#allocation11 + $0x828] sm:$0xff] }
 0x3d1   :  { %8037 = vmatpush2.bf16.msra.mxu0 %v9951_v27 }
 0x3d2   :  { %8038 = vmatprep.subr.bf16.mxu0 %v9944_v1 }
 0x3d5   :  { %8039 = vmatpush2.bf16.msra.mxu0 %v9943_v32 }
 0x3d6   :  { %8040 = vmatprep.subr.bf16.mxu0 %v9936_v4 }
 0x3d9   :  { %8041 = vmatpush2.bf16.msra.mxu0 %v9935_v8 }
 0x3da   :  { %8042 = vmatprep.subr.bf16.mxu0 %v9928_v11  ;;  %v10128_v11 = vcombine.high %v5029_v20, %v5033_v2 }
 0x3dd   :  { %8043 = vmatpush2.bf16.msra.mxu0 %v9927_v16  ;;  %v4917_v16 = vld [vmem:[#allocation11 + $0x588] sm:$0xff] }
 0x3de   :  { %8044 = vmatprep.subr.bf16.mxu0 %v9920_v18  ;;  %v4921_v18 = vld [vmem:[#allocation11 + $0x5a8] sm:$0xff] }
 0x3df   :  { %v10016_v41 = vcombine.high %v4917_v16, %v4921_v18  ;;  %v10015_v38 = vcombine.low %v4917_v16, %v4921_v18  ;;  %v4873_v16 = vld [vmem:[#allocation11 + $0x428] sm:$0xff] }
 0x3e0   :  { %v5101_v18 = vld [vmem:[#allocation11 + $0xb48] sm:$0xff] }
 0x3e1   :  { %8045 = vmatpush2.bf16.msra.mxu0 %v9919_v29 }
 0x3e2   :  { %8046 = vmatprep.subr.bf16.mxu0 %v9912_v30 }
 0x3e5   :  { %8047 = vmatpush2.bf16.msra.mxu0 %v9911_v60  ;;  %v10120_v60 = vcombine.high %v5021_v19, %v5025_v22  ;;  %v5105_v19 = vld [vmem:[#allocation11 + $0xb68] sm:$0xff] }
 0x3e6   :  { %8048 = vmatprep.subr.bf16.mxu0 %v9904_v31  ;;  %v4909_v31 = vld [vmem:[#allocation11 + $0x548] sm:$0xff] }
 0x3e9   :  { %8049 = vmatpush2.bf16.msra.mxu0 %v9903_v40  ;;  %v10008_v40 = vcombine.high %v4909_v31, %v4913_v37 }
 0x3ea   :  { %8100 = vmatprep.subr.bf16.mxu0 %v10152_v42  ;;  %v10112_v42 = vcombine.high %v5013_v34, %v5017_v36 }
 0x3ec   :  { %v4676_v7 = vpop.f32.mrf.mxu0  ;;  %8051 = vmatmul.mubr.bf16.vlgmr.msra.gmra.mxu0 %v11082_v3 }
 0x3ed   :  { %v4677_v59 = vadd.f32 %v4676_v7, %v4636_v49  ;;  %v4717_v0 = vpop.f32.mrf.mxu1  ;;  %8101 = vmatpush1.bf16.msra.mxu0 %v10151_v48  ;;  %8132 = vmatprep.mubr.bf16.mxu0 %v11093_v51  ;;  %v10007_v48 = vcombine.low %v4909_v31, %v4913_v37  ;;  %v4897_v49 = vld [vmem:[#allocation11 + $0x4e8] sm:$0xff]  ;;  %v9999_v7 = vcombine.low %v4901_v57, %v4905_v45 }
 0x3ee   :  { %v4678_v28 = vpop.f32.mrf.mxu0  ;;  %8102 = vmatprep.subr.bf16.mxu0 %v10144_v63  ;;  %v10111_v63 = vcombine.low %v5013_v34, %v5017_v36  ;;  %v4989_v31 = vld [vmem:[#allocation11 + $0x7c8] sm:$0xff] }
 0x3ef   :  { %v4718_v27 = vadd.f32 %v4717_v0, %v4677_v59  ;;  %v4679_v1 = vadd.f32 %v4678_v28, %v4638_v56  ;;  %v4719_v13 = vpop.f32.mrf.mxu1  ;;  %v10103_v56 = vcombine.low %v5005_v46, %v5009_v47  ;;  %v10096_v0 = vcombine.high %v4997_v43, %v5001_v33  ;;  %v4889_v28 = vld [vmem:[#allocation11 + $0x4a8] sm:$0xff] }
 0x3f0   :  { %v4680_v32 = vpop.f32.mrf.mxu0  ;;  %v4993_v37 = vld [vmem:[#allocation11 + $0x7e8] sm:$0xff] }
 0x3f1   :  { %v4720_v4 = vadd.f32 %v4719_v13, %v4679_v1  ;;  %v4721_v54 = vpop.f32.mrf.mxu1  ;;  %8103 = vmatpush1.bf16.msra.mxu0 %v10143_v35  ;;  %v4730_v10 = vmax.f32 %v4718_v27, 0.0  ;;  %v4885_v35 = vld [vmem:[#allocation11 + $0x488] sm:$0xff]  ;;  %v10095_v13 = vcombine.low %v4997_v43, %v5001_v33 }
 0x3f2   :  { %v4681_v8 = vpop.f32.mrf.mxu0  ;;  %8104 = vmatprep.subr.bf16.mxu0 %v10136_v26  ;;  %v5117_v26 = vld [vmem:[#allocation11 + $0xbc8] sm:$0xff]  ;;  %v9984_v20 = vcombine.high %v4885_v35, %v4889_v28 }
 0x3f3   :  { %v4731_v14 = vmax.f32 %v4720_v4, 0.0  ;;  %v4722_v15 = vpop.f32.mrf.mxu1  ;;  %v11129_v30 = vpack.c.bf16 %v4730_v10, %v4730_v10  ;;  %v5121_v27 = vld [vmem:[#allocation11 + $0xbe8] sm:$0xff]  ;;  %v9983_v10 = vcombine.low %v4885_v35, %v4889_v28 }
 0x3f4   :  { %v10216_v2 = vcombine.high %v5117_v26, %v5121_v27  ;;  %v4877_v32 = vld [vmem:[#allocation11 + $0x448] sm:$0xff]  ;;  %v10215_v8 = vcombine.low %v5117_v26, %v5121_v27 }
 0x3f5   :  { %v11127_v29 = vpack.c.bf16 %v4731_v14, %v4731_v14  ;;  %8105 = vmatpush1.bf16.msra.mxu0 %v10135_v9  ;;  %v4881_v4 = vld [vmem:[#allocation11 + $0x468] sm:$0xff] }
 0x3f6   :  { %8106 = vmatprep.subr.bf16.mxu0 %v10128_v11  ;;  %v5109_v54 = vld [vmem:[#allocation11 + $0xb88] sm:$0xff]  ;;  %v9976_v11 = vcombine.high %v4877_v32, %v4881_v4  ;;  %v9975_v22 = vcombine.low %v4877_v32, %v4881_v4 }
 0x3f7   :  { %8009 = vmatprep.mubr.bf16.mxu1 %v11127_v29  ;;  %v5113_v9 = vld [vmem:[#allocation11 + $0xba8] sm:$0xff] }
 0x3f8   :  { %8010 = vmatmul.mubr.bf16.vlgmr.msra.gmra.mxu1 %v11129_v30  ;;  %v10208_v14 = vcombine.high %v5109_v54, %v5113_v9  ;;  %v4869_v15 = vld [vmem:[#allocation11 + $0x408] sm:$0xff] }
 0x3f9   :  { %8060 = vmatpush1.bf16.msra.mxu1 %v10023_v62  ;;  %8091 = vmatprep.mubr.bf16.mxu1 %v11066_v17  ;;  %v4893_v62 = vld [vmem:[#allocation11 + $0x4c8] sm:$0xff] }
 0x3fa   :  { %8107 = vmatpush1.bf16.msra.mxu0 %v10127_v44  ;;  %8061 = vmatprep.subr.bf16.mxu1 %v10016_v41  ;;  %v9992_v59 = vcombine.high %v4893_v62, %v4897_v49  ;;  %v9991_v1 = vcombine.low %v4893_v62, %v4897_v49  ;;  %v10207_v44 = vcombine.low %v5109_v54, %v5113_v9  ;;  %v5093_v34 = vld [vmem:[#allocation11 + $0xb08] sm:$0xff] }
 0x3fb   :  { %8108 = vmatprep.subr.bf16.mxu0 %v10120_v60  ;;  %v9968_v41 = vcombine.high %v4869_v15, %v4873_v16  ;;  %v10200_v60 = vcombine.high %v5101_v18, %v5105_v19  ;;  %v5097_v36 = vld [vmem:[#allocation11 + $0xb28] sm:$0xff] }
 0x3fc   :  { %v4981_v57 = vld [vmem:[#allocation11 + $0x788] sm:$0xff] }
 0x3fd   :  { %8062 = vmatpush1.bf16.msra.mxu1 %v10015_v38  ;;  %v9967_v38 = vcombine.low %v4869_v15, %v4873_v16  ;;  %v4985_v45 = vld [vmem:[#allocation11 + $0x7a8] sm:$0xff] }
 0x3fe   :  { %8109 = vmatpush1.bf16.msra.mxu0 %v10119_v50  ;;  %8063 = vmatprep.subr.bf16.mxu1 %v10008_v40  ;;  %v10199_v50 = vcombine.low %v5101_v18, %v5105_v19  ;;  %v10088_v40 = vcombine.high %v4989_v31, %v4993_v37  ;;  %v5085_v46 = vld [vmem:[#allocation11 + $0xac8] sm:$0xff]  ;;  %v4798_v18 = vld [vmem:[#allocation11 + $0x1d0] sm:$0xff] }
 0x3ff   :  { %8110 = vmatprep.subr.bf16.mxu0 %v10112_v42  ;;  %v10192_v42 = vcombine.high %v5093_v34, %v5097_v36  ;;  %v5089_v47 = vld [vmem:[#allocation11 + $0xae8] sm:$0xff]  ;;  %v4802_v19 = vld [vmem:[#allocation11 + $0x1f0] sm:$0xff] }
 0x400   :  { %v4973_v62 = vld [vmem:[#allocation11 + $0x748] sm:$0xff] }
 0x401   :  { %8064 = vmatpush1.bf16.msra.mxu1 %v10007_v48  ;;  %v10087_v48 = vcombine.low %v4989_v31, %v4993_v37  ;;  %v4977_v49 = vld [vmem:[#allocation11 + $0x768] sm:$0xff]  ;;  %v9898_v31 = vcombine.high %v4798_v18, %v4802_v19 }
 0x402   :  { %8111 = vmatpush1.bf16.msra.mxu0 %v10111_v63  ;;  %8065 = vmatprep.subr.bf16.mxu1 %v10000_v53  ;;  %v10191_v63 = vcombine.low %v5093_v34, %v5097_v36  ;;  %v10080_v53 = vcombine.high %v4981_v57, %v4985_v45  ;;  %v5077_v43 = vld [vmem:[#allocation11 + $0xa88] sm:$0xff]  ;;  %v4790_v36 = vld [vmem:[#allocation11 + $0x190] sm:$0xff] }
 0x403   :  { %8112 = vmatprep.subr.bf16.mxu0 %v10104_v55  ;;  %v10184_v55 = vcombine.high %v5085_v46, %v5089_v47  ;;  %v5081_v33 = vld [vmem:[#allocation11 + $0xaa8] sm:$0xff] }
 0x404   :  { %v4965_v35 = vld [vmem:[#allocation11 + $0x708] sm:$0xff] }
 0x405   :  { %8066 = vmatpush1.bf16.msra.mxu1 %v9999_v7  ;;  %v10079_v7 = vcombine.low %v4981_v57, %v4985_v45  ;;  %v4969_v28 = vld [vmem:[#allocation11 + $0x728] sm:$0xff] }
 0x406   :  { %8113 = vmatpush1.bf16.msra.mxu0 %v10103_v56  ;;  %8067 = vmatprep.subr.bf16.mxu1 %v9992_v59  ;;  %v10183_v56 = vcombine.low %v5085_v46, %v5089_v47  ;;  %v10072_v59 = vcombine.high %v4973_v62, %v4977_v49  ;;  %v5069_v26 = vld [vmem:[#allocation11 + $0xa48] sm:$0xff] }
 0x407   :  { %8114 = vmatprep.subr.bf16.mxu0 %v10096_v0  ;;  %v10176_v0 = vcombine.high %v5077_v43, %v5081_v33  ;;  %v5073_v27 = vld [vmem:[#allocation11 + $0xa68] sm:$0xff] }
 0x408   :  { %v4957_v32 = vld [vmem:[#allocation11 + $0x6c8] sm:$0xff] }
 0x409   :  { %8068 = vmatpush1.bf16.msra.mxu1 %v9991_v1  ;;  %v10071_v1 = vcombine.low %v4973_v62, %v4977_v49  ;;  %v4961_v4 = vld [vmem:[#allocation11 + $0x6e8] sm:$0xff] }
 0x40a   :  { %8115 = vmatpush1.bf16.msra.mxu0 %v10095_v13  ;;  %8069 = vmatprep.subr.bf16.mxu1 %v9984_v20  ;;  %v10175_v13 = vcombine.low %v5077_v43, %v5081_v33  ;;  %v10064_v20 = vcombine.high %v4965_v35, %v4969_v28  ;;  %v5061_v54 = vld [vmem:[#allocation11 + $0xa08] sm:$0xff] }
 0x40b   :  { %8116 = vmatprep.subr.bf16.mxu0 %v10216_v2  ;;  %v10168_v2 = vcombine.high %v5069_v26, %v5073_v27  ;;  %v5065_v9 = vld [vmem:[#allocation11 + $0xa28] sm:$0xff] }
 0x40c   :  { %v4949_v15 = vld [vmem:[#allocation11 + $0x688] sm:$0xff] }
 0x40d   :  { %8070 = vmatpush1.bf16.msra.mxu1 %v9983_v10  ;;  %v10063_v10 = vcombine.low %v4965_v35, %v4969_v28  ;;  %v4953_v16 = vld [vmem:[#allocation11 + $0x6a8] sm:$0xff] }
 0x40e   :  { %8117 = vmatpush2.bf16.msra.mxu0 %v10215_v8  ;;  %8071 = vmatprep.subr.bf16.mxu1 %v9976_v11  ;;  %v10167_v8 = vcombine.low %v5069_v26, %v5073_v27  ;;  %v10056_v11 = vcombine.high %v4957_v32, %v4961_v4  ;;  %v4941_v37 = vld [vmem:[#allocation11 + $0x648] sm:$0xff]  ;;  %v4774_v27 = vld [vmem:[#allocation11 + $0x110] sm:$0xff] }
 0x40f   :  { %8118 = vmatprep.subr.bf16.mxu0 %v10208_v14  ;;  %v10160_v14 = vcombine.high %v5061_v54, %v5065_v9  ;;  %v4945_v34 = vld [vmem:[#allocation11 + $0x668] sm:$0xff] }
 0x410   :  { %v10040_v45 = vcombine.high %v4941_v37, %v4945_v34  ;;  %v4933_v47 = vld [vmem:[#allocation11 + $0x608] sm:$0xff]  ;;  %v10039_v43 = vcombine.low %v4941_v37, %v4945_v34 }
 0x411   :  { %8072 = vmatpush1.bf16.msra.mxu1 %v9975_v22  ;;  %v10055_v22 = vcombine.low %v4957_v32, %v4961_v4  ;;  %v5181_v35 = vld [vmem:[#allocation11 + $0xdc8] sm:$0xff] }
 0x412   :  { %8119 = vmatpush2.bf16.msra.mxu0 %v10207_v44  ;;  %8073 = vmatprep.subr.bf16.mxu1 %v9968_v41  ;;  %v10159_v44 = vcombine.low %v5061_v54, %v5065_v9  ;;  %v10048_v41 = vcombine.high %v4949_v15, %v4953_v16  ;;  %v5185_v28 = vld [vmem:[#allocation11 + $0xde8] sm:$0xff] }
 0x413   :  { %8120 = vmatprep.subr.bf16.mxu0 %v10200_v60  ;;  %v5252_v60 = vld [vmem:[#allocation13] sm:$0xff]  ;;  %v10280_v54 = vcombine.high %v5181_v35, %v5185_v28 }
 0x414   :  { %v5261_v57 = vrot.slane %v5252_v60, %v10936_v24 }
 0x415   :  { %8074 = vmatpush1.bf16.msra.mxu1 %v9967_v38  ;;  %v4794_v38 = vld [vmem:[#allocation11 + $0x1b0] sm:$0xff] }
 0x416   :  { %8121 = vmatpush2.bf16.msra.mxu0 %v10199_v50  ;;  %8075 = vmatprep.subr.bf16.mxu1 %v10088_v40  ;;  %v10047_v50 = vcombine.low %v4949_v15, %v4953_v16  ;;  %v5257_v40 = vrot.slane %v5252_v60, %v10928_v21  ;;  %v9890_v46 = vcombine.high %v4790_v36, %v4794_v38  ;;  %v4770_v15 = vld [vmem:[#allocation11 + $0xf0] sm:$0xff] }
 0x417   :  { %8122 = vmatprep.subr.bf16.mxu0 %v10192_v42  ;;  %v9897_v42 = vcombine.low %v4798_v18, %v4802_v19  ;;  %v9889_v33 = vcombine.low %v4790_v36, %v4794_v38  ;;  %v10279_v16 = vcombine.low %v5181_v35, %v5185_v28  ;;  %v4758_v60 = vld [vmem:[#allocation11 + $0x90] sm:$0xff] }
 0x419   :  { %8076 = vmatpush2.bf16.msra.mxu1 %v10087_v48  ;;  %v4937_v48 = vld [vmem:[#allocation11 + $0x628] sm:$0xff] }
 0x41a   :  { %8123 = vmatpush2.bf16.msra.mxu0 %v10191_v63  ;;  %8077 = vmatprep.subr.bf16.mxu1 %v10080_v53  ;;  %v4782_v53 = vld [vmem:[#allocation11 + $0x150] sm:$0xff] }
 0x41b   :  { %8124 = vmatprep.subr.bf16.mxu0 %v10184_v55  ;;  %v4786_v55 = vld [vmem:[#allocation11 + $0x170] sm:$0xff] }
 0x41c   :  { %v9881_v4 = vcombine.low %v4782_v53, %v4786_v55 }
 0x41d   :  { %8078 = vmatpush2.bf16.msra.mxu1 %v10079_v7  ;;  %v10032_v7 = vcombine.high %v4933_v47, %v4937_v48 }
 0x41e   :  { %8125 = vmatpush2.bf16.msra.mxu0 %v10183_v56  ;;  %8079 = vmatprep.subr.bf16.mxu1 %v10072_v59 }
 0x41f   :  { %8126 = vmatprep.subr.bf16.mxu0 %v10176_v0  ;;  %v9882_v0 = vcombine.high %v4782_v53, %v4786_v55  ;;  %v5153_v53 = vld [vmem:[#allocation11 + $0xce8] sm:$0xff]  ;;  %v4742_v55 = vld [vmem:[#allocation11 + $0x10] sm:$0xff] }
 0x421   :  { %8080 = vmatpush2.bf16.msra.mxu1 %v10071_v1  ;;  %v4778_v1 = vld [vmem:[#allocation11 + $0x130] sm:$0xff] }
 0x422   :  { %8127 = vmatpush2.bf16.msra.mxu0 %v10175_v13  ;;  %8081 = vmatprep.subr.bf16.mxu1 %v10064_v20  ;;  %v9873_v18 = vcombine.low %v4774_v27, %v4778_v1 }
 0x423   :  { %8128 = vmatprep.subr.bf16.mxu0 %v10168_v2  ;;  %v10031_v2 = vcombine.low %v4933_v47, %v4937_v48 }
 0x425   :  { %8082 = vmatpush2.bf16.msra.mxu1 %v10063_v10  ;;  %v9874_v10 = vcombine.high %v4774_v27, %v4778_v1  ;;  %v5133_v1 = vld [vmem:[#allocation11 + $0xc48] sm:$0xff] }
 0x426   :  { %8129 = vmatpush2.bf16.msra.mxu0 %v10167_v8  ;;  %8083 = vmatprep.subr.bf16.mxu1 %v10056_v11  ;;  %v5173_v8 = vld [vmem:[#allocation11 + $0xd88] sm:$0xff] }
 0x427   :  { %8130 = vmatprep.subr.bf16.mxu0 %v10160_v14  ;;  %v5177_v11 = vld [vmem:[#allocation11 + $0xda8] sm:$0xff]  ;;  %v4766_v14 = vld [vmem:[#allocation11 + $0xd0] sm:$0xff] }
 0x428   :  { %v10272_v19 = vcombine.high %v5173_v8, %v5177_v11  ;;  %v10271_v37 = vcombine.low %v5173_v8, %v5177_v11  ;;  %v9865_v34 = vcombine.low %v4766_v14, %v4770_v15  ;;  %v5125_v8 = vld [vmem:[#allocation11 + $0xc08] sm:$0xff] }
 0x429   :  { %8084 = vmatpush2.bf16.msra.mxu1 %v10055_v22  ;;  %v9866_v22 = vcombine.high %v4766_v14, %v4770_v15  ;;  %v5129_v11 = vld [vmem:[#allocation11 + $0xc28] sm:$0xff]  ;;  %v4846_v14 = vld [vmem:[#allocation11 + $0x350] sm:$0xff] }
 0x42a   :  { %8131 = vmatpush2.bf16.msra.mxu0 %v10159_v44  ;;  %8085 = vmatprep.subr.bf16.mxu1 %v10048_v41  ;;  %v5165_v44 = vld [vmem:[#allocation11 + $0xd48] sm:$0xff]  ;;  %v4850_v15 = vld [vmem:[#allocation11 + $0x370] sm:$0xff] }
 0x42b   :  { %8182 = vmatprep.subr.bf16.mxu0 %v9898_v31  ;;  %v5169_v41 = vld [vmem:[#allocation11 + $0xd68] sm:$0xff]  ;;  %v4762_v31 = vld [vmem:[#allocation11 + $0xb0] sm:$0xff] }
 0x42c   :  { %v7888_v63 = vpop.f32.mrf.mxu0  ;;  %v10264_v36 = vcombine.high %v5165_v44, %v5169_v41  ;;  %v9858_v38 = vcombine.high %v4758_v60, %v4762_v31 }
 0x42d   :  { %v7889_v62 = vadd.f32 %v7888_v63, %v5257_v40  ;;  %v7929_v49 = vpop.f32.mrf.mxu1  ;;  %8086 = vmatpush2.bf16.msra.mxu1 %v10047_v50  ;;  %8133 = vmatmul.mubr.bf16.vlgmr.msra.gmra.mxu0 %v11107_v5  ;;  %v5157_v50 = vld [vmem:[#allocation11 + $0xd08] sm:$0xff] }
 0x42e   :  { %8183 = vmatpush1.bf16.msra.mxu0 %v9897_v42  ;;  %8214 = vmatprep.mubr.bf16.mxu0 %v11063_v39  ;;  %v7890_v21 = vpop.f32.mrf.mxu0  ;;  %v5161_v40 = vld [vmem:[#allocation11 + $0xd28] sm:$0xff]  ;;  %v4750_v42 = vld [vmem:[#allocation11 + $0x50] sm:$0xff] }
 0x42f   :  { %v11141_v24 = vadd.f32 %v7929_v49, %v7889_v62  ;;  %v7891_v56 = vadd.f32 %v7890_v21, %v5261_v57  ;;  %v7931_v59 = vpop.f32.mrf.mxu1  ;;  %8087 = vmatprep.subr.bf16.mxu1 %v10040_v45  ;;  %8184 = vmatprep.subr.bf16.mxu0 %v9890_v46  ;;  %v4754_v57 = vld [vmem:[#allocation11 + $0x70] sm:$0xff]  ;;  %v10263_v45 = vcombine.low %v5165_v44, %v5169_v41  ;;  %v5149_v63 = vld [vmem:[#allocation11 + $0xcc8] sm:$0xff] }
 0x430   :  { %v7892_v26 = vpop.f32.mrf.mxu0  ;;  %v9857_v46 = vcombine.low %v4758_v60, %v4762_v31  ;;  %v10256_v47 = vcombine.high %v5157_v50, %v5161_v40  ;;  %v9850_v48 = vcombine.high %v4750_v42, %v4754_v57  ;;  %v4746_v62 = vld [vmem:[#allocation11 + $0x30] sm:$0xff]  ;;  %v10255_v49 = vcombine.low %v5157_v50, %v5161_v40  ;;  %v5245_v44 = vld [vmem:[#allocation11 + $0xfc8] sm:$0xff] }
 0x431   :  { %v11143_v13 = vadd.f32 %v7931_v59, %v7891_v56  ;;  %v7933_v20 = vpop.f32.mrf.mxu1  ;;  %8088 = vmatpush2.bf16.msra.mxu1 %v10039_v43  ;;  %v9849_v43 = vcombine.low %v4750_v42, %v4754_v57  ;;  %v10248_v21 = vcombine.high %v5149_v63, %v5153_v53  ;;  %v5145_v56 = vld [vmem:[#allocation11 + $0xca8] sm:$0xff]  ;;  %v4862_v59 = vld [vmem:[#allocation11 + $0x3d0] sm:$0xff]  ;;  %v10247_v35 = vcombine.low %v5149_v63, %v5153_v53 }
 0x432   :  { %8185 = vmatpush1.bf16.msra.mxu0 %v9889_v33  ;;  %v7893_v32 = vpop.f32.mrf.mxu0  ;;  %8089 = vmatprep.subr.bf16.mxu1 %v10032_v7  ;;  %v9842_v33 = vcombine.high %v4742_v55, %v4746_v62  ;;  %v5141_v7 = vld [vmem:[#allocation11 + $0xc88] sm:$0xff]  ;;  %v9841_v28 = vcombine.low %v4742_v55, %v4746_v62  ;;  %v4838_v60 = vld [vmem:[#allocation11 + $0x310] sm:$0xff] }
 0x433   :  { %v7934_v9 = vpop.f32.mrf.mxu1  ;;  %8186 = vmatprep.subr.bf16.mxu0 %v9882_v0  ;;  %v4866_v0 = vld [vmem:[#allocation11 + $0x3f0] sm:$0xff]  ;;  %v10240_v26 = vcombine.high %v5141_v7, %v5145_v56  ;;  %v5137_v20 = vld [vmem:[#allocation11 + $0xc68] sm:$0xff] }
 0x434   :  { %v9962_v27 = vcombine.high %v4862_v59, %v4866_v0  ;;  %v4858_v32 = vld [vmem:[#allocation11 + $0x3b0] sm:$0xff]  ;;  %v10232_v9 = vcombine.high %v5133_v1, %v5137_v20  ;;  %v5249_v41 = vld [vmem:[#allocation11 + $0xfe8] sm:$0xff] }
 0x435   :  { %8090 = vmatpush2.bf16.msra.mxu1 %v10031_v2  ;;  %v4854_v2 = vld [vmem:[#allocation11 + $0x390] sm:$0xff]  ;;  %v5237_v50 = vld [vmem:[#allocation11 + $0xf88] sm:$0xff] }
 0x436   :  { %8187 = vmatpush1.bf16.msra.mxu0 %v9881_v4  ;;  %8141 = vmatprep.subr.bf16.mxu1 %v10280_v54  ;;  %v10239_v4 = vcombine.low %v5141_v7, %v5145_v56  ;;  %v9961_v54 = vcombine.low %v4862_v59, %v4866_v0  ;;  %v4842_v31 = vld [vmem:[#allocation11 + $0x330] sm:$0xff]  ;;  %v5241_v40 = vld [vmem:[#allocation11 + $0xfa8] sm:$0xff] }
 0x437   :  { %8188 = vmatprep.subr.bf16.mxu0 %v9874_v10  ;;  %v9954_v10 = vcombine.high %v4854_v2, %v4858_v32  ;;  %v4830_v42 = vld [vmem:[#allocation11 + $0x2d0] sm:$0xff]  ;;  %v5229_v63 = vld [vmem:[#allocation11 + $0xf48] sm:$0xff] }
 0x438   :  { %8092 = vmatmul.mubr.bf16.vlgmr.msra.gmra.mxu1 %v11084_v6  ;;  %v4834_v57 = vld [vmem:[#allocation11 + $0x2f0] sm:$0xff]  ;;  %v5233_v53 = vld [vmem:[#allocation11 + $0xf68] sm:$0xff] }
 0x439   :  { %8142 = vmatpush1.bf16.msra.mxu1 %v10279_v16  ;;  %8173 = vmatprep.mubr.bf16.mxu1 %v11127_v29  ;;  %v10231_v16 = vcombine.low %v5133_v1, %v5137_v20  ;;  %v4822_v55 = vld [vmem:[#allocation11 + $0x290] sm:$0xff]  ;;  %v5221_v7 = vld [vmem:[#allocation11 + $0xf08] sm:$0xff] }
 0x43a   :  { %8189 = vmatpush1.bf16.msra.mxu0 %v9873_v18  ;;  %8143 = vmatprep.subr.bf16.mxu1 %v10272_v19  ;;  %v9953_v18 = vcombine.low %v4854_v2, %v4858_v32  ;;  %v10224_v19 = vcombine.high %v5125_v8, %v5129_v11  ;;  %v4826_v62 = vld [vmem:[#allocation11 + $0x2b0] sm:$0xff]  ;;  %v5225_v56 = vld [vmem:[#allocation11 + $0xf28] sm:$0xff] }
 0x43b   :  { %8190 = vmatprep.subr.bf16.mxu0 %v9866_v22  ;;  %v9946_v22 = vcombine.high %v4846_v14, %v4850_v15  ;;  %v4814_v59 = vld [vmem:[#allocation11 + $0x250] sm:$0xff]  ;;  %v5213_v1 = vld [vmem:[#allocation11 + $0xec8] sm:$0xff] }
 0x43c   :  { %v4818_v0 = vld [vmem:[#allocation11 + $0x270] sm:$0xff]  ;;  %v5217_v20 = vld [vmem:[#allocation11 + $0xee8] sm:$0xff] }
 0x43d   :  { %8144 = vmatpush1.bf16.msra.mxu1 %v10271_v37  ;;  %v10223_v37 = vcombine.low %v5125_v8, %v5129_v11  ;;  %v4806_v2 = vld [vmem:[#allocation11 + $0x210] sm:$0xff]  ;;  %v5205_v8 = vld [vmem:[#allocation11 + $0xe88] sm:$0xff] }
 0x43e   :  { %8191 = vmatpush1.bf16.msra.mxu0 %v9865_v34  ;;  %8145 = vmatprep.subr.bf16.mxu1 %v10264_v36  ;;  %v9945_v34 = vcombine.low %v4846_v14, %v4850_v15  ;;  %v10344_v36 = vcombine.high %v5245_v44, %v5249_v41  ;;  %v4810_v32 = vld [vmem:[#allocation11 + $0x230] sm:$0xff]  ;;  %v5209_v11 = vld [vmem:[#allocation11 + $0xea8] sm:$0xff] }
 0x43f   :  { %8192 = vmatprep.subr.bf16.mxu0 %v9858_v38  ;;  %v9938_v38 = vcombine.high %v4838_v60, %v4842_v31  ;;  %v5054_v14 = vld [vmem:[#allocation11 + $0x9d0] sm:$0xff] }
 0x440   :  { %v5058_v15 = vld [vmem:[#allocation11 + $0x9f0] sm:$0xff] }
 0x441   :  { %8146 = vmatpush1.bf16.msra.mxu1 %v10263_v45  ;;  %v10343_v45 = vcombine.low %v5245_v44, %v5249_v41  ;;  %v5197_v44 = vld [vmem:[#allocation11 + $0xe48] sm:$0xff] }
 0x442   :  { %8193 = vmatpush1.bf16.msra.mxu0 %v9857_v46  ;;  %8147 = vmatprep.subr.bf16.mxu1 %v10256_v47  ;;  %v9937_v46 = vcombine.low %v4838_v60, %v4842_v31  ;;  %v10336_v47 = vcombine.high %v5237_v50, %v5241_v40  ;;  %v5201_v41 = vld [vmem:[#allocation11 + $0xe68] sm:$0xff]  ;;  %v5046_v60 = vld [vmem:[#allocation11 + $0x990] sm:$0xff] }
 0x443   :  { %8194 = vmatprep.subr.bf16.mxu0 %v9850_v48  ;;  %v9930_v48 = vcombine.high %v4830_v42, %v4834_v57  ;;  %v5050_v31 = vld [vmem:[#allocation11 + $0x9b0] sm:$0xff] }
 0x445   :  { %8148 = vmatpush1.bf16.msra.mxu1 %v10255_v49  ;;  %v10335_v49 = vcombine.low %v5237_v50, %v5241_v40  ;;  %v5189_v50 = vld [vmem:[#allocation11 + $0xe08] sm:$0xff] }
 0x446   :  { %8195 = vmatpush1.bf16.msra.mxu0 %v9849_v43  ;;  %8149 = vmatprep.subr.bf16.mxu1 %v10248_v21  ;;  %v9929_v43 = vcombine.low %v4830_v42, %v4834_v57  ;;  %v10328_v21 = vcombine.high %v5229_v63, %v5233_v53  ;;  %v5193_v40 = vld [vmem:[#allocation11 + $0xe28] sm:$0xff]  ;;  %v5038_v57 = vld [vmem:[#allocation11 + $0x950] sm:$0xff] }
 0x447   :  { %8196 = vmatprep.subr.bf16.mxu0 %v9842_v33  ;;  %v9922_v33 = vcombine.high %v4822_v55, %v4826_v62 }
 0x449   :  { %8150 = vmatpush1.bf16.msra.mxu1 %v10247_v35  ;;  %v10327_v35 = vcombine.low %v5229_v63, %v5233_v53  ;;  %v10145_v63 = vcombine.low %v5046_v60, %v5050_v31  ;;  %v10288_v53 = vcombine.high %v5189_v50, %v5193_v40 }
 0x44a   :  { %8197 = vmatpush1.bf16.msra.mxu0 %v9841_v28  ;;  %8151 = vmatprep.subr.bf16.mxu1 %v10240_v26  ;;  %v9921_v28 = vcombine.low %v4822_v55, %v4826_v62  ;;  %v10320_v26 = vcombine.high %v5221_v7, %v5225_v56 }
 0x44b   :  { %8198 = vmatprep.subr.bf16.mxu0 %v9962_v27  ;;  %v9914_v27 = vcombine.high %v4814_v59, %v4818_v0 }
 0x44d   :  { %8152 = vmatpush1.bf16.msra.mxu1 %v10239_v4  ;;  %v10319_v4 = vcombine.low %v5221_v7, %v5225_v56  ;;  %v10287_v7 = vcombine.low %v5189_v50, %v5193_v40 }
 0x44e   :  { %8199 = vmatpush2.bf16.msra.mxu0 %v9961_v54  ;;  %8153 = vmatprep.subr.bf16.mxu1 %v10232_v9  ;;  %v9913_v54 = vcombine.low %v4814_v59, %v4818_v0  ;;  %v10312_v9 = vcombine.high %v5213_v1, %v5217_v20 }
 0x44f   :  { %8200 = vmatprep.subr.bf16.mxu0 %v9954_v10  ;;  %v9906_v10 = vcombine.high %v4806_v2, %v4810_v32 }
 0x451   :  { %8154 = vmatpush1.bf16.msra.mxu1 %v10231_v16  ;;  %v10311_v16 = vcombine.low %v5213_v1, %v5217_v20 }
 0x452   :  { %8201 = vmatpush2.bf16.msra.mxu0 %v9953_v18  ;;  %8155 = vmatprep.subr.bf16.mxu1 %v10224_v19  ;;  %v9905_v18 = vcombine.low %v4806_v2, %v4810_v32  ;;  %v10304_v19 = vcombine.high %v5205_v8, %v5209_v11 }
 0x453   :  { %8202 = vmatprep.subr.bf16.mxu0 %v9946_v22  ;;  %v10154_v22 = vcombine.high %v5054_v14, %v5058_v15 }
 0x455   :  { %8156 = vmatpush1.bf16.msra.mxu1 %v10223_v37  ;;  %v10303_v37 = vcombine.low %v5205_v8, %v5209_v11 }
 0x456   :  { %8203 = vmatpush2.bf16.msra.mxu0 %v9945_v34  ;;  %8157 = vmatprep.subr.bf16.mxu1 %v10344_v36  ;;  %v10153_v34 = vcombine.low %v5054_v14, %v5058_v15  ;;  %v10296_v36 = vcombine.high %v5197_v44, %v5201_v41 }
 0x457   :  { %8204 = vmatprep.subr.bf16.mxu0 %v9938_v38  ;;  %v10146_v38 = vcombine.high %v5046_v60, %v5050_v31 }
 0x459   :  { %8158 = vmatpush2.bf16.msra.mxu1 %v10343_v45  ;;  %v5042_v45 = vld [vmem:[#allocation11 + $0x970] sm:$0xff] }
 0x45a   :  { %8205 = vmatpush2.bf16.msra.mxu0 %v9937_v46  ;;  %8159 = vmatprep.subr.bf16.mxu1 %v10336_v47  ;;  %v10295_v47 = vcombine.low %v5197_v44, %v5201_v41  ;;  %v10138_v62 = vcombine.high %v5038_v57, %v5042_v45  ;;  %v10137_v59 = vcombine.low %v5038_v57, %v5042_v45  ;;  %v4886_v45 = vld [vmem:[#allocation11 + $0x490] sm:$0xff] }
 0x45b   :  { %8206 = vmatprep.subr.bf16.mxu0 %v9930_v48 }
 0x45d   :  { %8160 = vmatpush2.bf16.msra.mxu1 %v10335_v49  ;;  %v4926_v49 = vld [vmem:[#allocation11 + $0x5d0] sm:$0xff] }
 0x45e   :  { %8207 = vmatpush2.bf16.msra.mxu0 %v9929_v43  ;;  %8161 = vmatprep.subr.bf16.mxu1 %v10328_v21  ;;  %v4930_v43 = vld [vmem:[#allocation11 + $0x5f0] sm:$0xff] }
 0x45f   :  { %8208 = vmatprep.subr.bf16.mxu0 %v9922_v33  ;;  %v5030_v21 = vld [vmem:[#allocation11 + $0x910] sm:$0xff]  ;;  %v10026_v0 = vcombine.high %v4926_v49, %v4930_v43  ;;  %v10025_v1 = vcombine.low %v4926_v49, %v4930_v43 }
 0x460   :  { %v5034_v33 = vld [vmem:[#allocation11 + $0x930] sm:$0xff] }
 0x461   :  { %8162 = vmatpush2.bf16.msra.mxu1 %v10327_v35  ;;  %v10130_v35 = vcombine.high %v5030_v21, %v5034_v33  ;;  %v10129_v20 = vcombine.low %v5030_v21, %v5034_v33  ;;  %v4882_v21 = vld [vmem:[#allocation11 + $0x470] sm:$0xff] }
 0x462   :  { %8209 = vmatpush2.bf16.msra.mxu0 %v9921_v28  ;;  %8163 = vmatprep.subr.bf16.mxu1 %v10320_v26  ;;  %v4918_v28 = vld [vmem:[#allocation11 + $0x590] sm:$0xff] }
 0x463   :  { %8210 = vmatprep.subr.bf16.mxu0 %v9914_v27  ;;  %v5022_v26 = vld [vmem:[#allocation11 + $0x8d0] sm:$0xff] }
 0x464   :  { %v5026_v27 = vld [vmem:[#allocation11 + $0x8f0] sm:$0xff] }
 0x465   :  { %8164 = vmatpush2.bf16.msra.mxu1 %v10319_v4  ;;  %v10122_v32 = vcombine.high %v5022_v26, %v5026_v27  ;;  %v4910_v4 = vld [vmem:[#allocation11 + $0x550] sm:$0xff]  ;;  %v10121_v11 = vcombine.low %v5022_v26, %v5026_v27 }
 0x466   :  { %8211 = vmatpush2.bf16.msra.mxu0 %v9913_v54  ;;  %8165 = vmatprep.subr.bf16.mxu1 %v10312_v9  ;;  %v4914_v54 = vld [vmem:[#allocation11 + $0x570] sm:$0xff] }
 0x467   :  { %8212 = vmatprep.subr.bf16.mxu0 %v9906_v10  ;;  %v5014_v9 = vld [vmem:[#allocation11 + $0x890] sm:$0xff]  ;;  %v10010_v14 = vcombine.high %v4910_v4, %v4914_v54  ;;  %v10009_v44 = vcombine.low %v4910_v4, %v4914_v54 }
 0x468   :  { %v5018_v10 = vld [vmem:[#allocation11 + $0x8b0] sm:$0xff] }
 0x469   :  { %8166 = vmatpush2.bf16.msra.mxu1 %v10311_v16  ;;  %v10114_v15 = vcombine.high %v5014_v9, %v5018_v10  ;;  %v4902_v16 = vld [vmem:[#allocation11 + $0x510] sm:$0xff]  ;;  %v10113_v41 = vcombine.low %v5014_v9, %v5018_v10 }
 0x46a   :  { %8213 = vmatpush2.bf16.msra.mxu0 %v9905_v18  ;;  %8167 = vmatprep.subr.bf16.mxu1 %v10304_v19  ;;  %v4906_v18 = vld [vmem:[#allocation11 + $0x530] sm:$0xff] }
 0x46b   :  { %8264 = vmatprep.subr.bf16.mxu0 %v10154_v22  ;;  %v5006_v19 = vld [vmem:[#allocation11 + $0x850] sm:$0xff]  ;;  %v10002_v60 = vcombine.high %v4902_v16, %v4906_v18  ;;  %v10001_v50 = vcombine.low %v4902_v16, %v4906_v18 }
 0x46c   :  { %v7970_v42 = vpop.f32.mrf.mxu0  ;;  %v5010_v22 = vld [vmem:[#allocation11 + $0x870] sm:$0xff] }
 0x46d   :  { %v11148_v46 = vadd.f32 %v7970_v42, %v11141_v24  ;;  %8168 = vmatpush2.bf16.msra.mxu1 %v10303_v37  ;;  %8215 = vmatmul.mubr.bf16.vlgmr.msra.gmra.mxu0 %v11082_v3  ;;  %v10106_v31 = vcombine.high %v5006_v19, %v5010_v22  ;;  %v4894_v37 = vld [vmem:[#allocation11 + $0x4d0] sm:$0xff]  ;;  %v10105_v40 = vcombine.low %v5006_v19, %v5010_v22 }
 0x46e   :  { %8265 = vmatpush1.bf16.msra.mxu0 %v10153_v34  ;;  %8296 = vmatprep.mubr.bf16.mxu0 %v11093_v51  ;;  %v7972_v48 = vpop.f32.mrf.mxu0  ;;  %v4898_v34 = vld [vmem:[#allocation11 + $0x4f0] sm:$0xff] }
 0x46f   :  { %v11153_v55 = vadd.f32 %v7972_v48, %v11143_v13  ;;  %8169 = vmatprep.subr.bf16.mxu1 %v10296_v36  ;;  %8266 = vmatprep.subr.bf16.mxu0 %v10146_v38  ;;  %v4922_v13 = vld [vmem:[#allocation11 + $0x5b0] sm:$0xff]  ;;  %v9994_v42 = vcombine.high %v4894_v37, %v4898_v34 }
 0x470   :  { %v7974_v24 = vpop.f32.mrf.mxu0  ;;  %v10018_v2 = vcombine.high %v4918_v28, %v4922_v13  ;;  %v10017_v8 = vcombine.low %v4918_v28, %v4922_v13  ;;  %v4998_v36 = vld [vmem:[#allocation11 + $0x810] sm:$0xff] }
 0x471   :  { %8170 = vmatpush2.bf16.msra.mxu1 %v10295_v47  ;;  %v5002_v38 = vld [vmem:[#allocation11 + $0x830] sm:$0xff] }
 0x472   :  { %8267 = vmatpush1.bf16.msra.mxu0 %v10145_v63  ;;  %v7975_v56 = vpop.f32.mrf.mxu0  ;;  %8171 = vmatprep.subr.bf16.mxu1 %v10288_v53  ;;  %v10098_v57 = vcombine.high %v4998_v36, %v5002_v38  ;;  %v4890_v47 = vld [vmem:[#allocation11 + $0x4b0] sm:$0xff]  ;;  %v9993_v53 = vcombine.low %v4894_v37, %v4898_v34 }
 0x473   :  { %8268 = vmatprep.subr.bf16.mxu0 %v10138_v62  ;;  %v5118_v48 = vld [vmem:[#allocation11 + $0xbd0] sm:$0xff]  ;;  %v10097_v62 = vcombine.low %v4998_v36, %v5002_v38  ;;  %v9986_v49 = vcombine.high %v4886_v45, %v4890_v47  ;;  %v9985_v56 = vcombine.low %v4886_v45, %v4890_v47 }
 0x474   :  { %v5122_v63 = vld [vmem:[#allocation11 + $0xbf0] sm:$0xff] }
 0x475   :  { %8172 = vmatpush2.bf16.msra.mxu1 %v10287_v7  ;;  %v10218_v43 = vcombine.high %v5118_v48, %v5122_v63  ;;  %v4878_v24 = vld [vmem:[#allocation11 + $0x450] sm:$0xff] }
 0x476   :  { %8269 = vmatpush1.bf16.msra.mxu0 %v10137_v59  ;;  %8223 = vmatprep.subr.bf16.mxu1 %v10026_v0  ;;  %v5110_v33 = vld [vmem:[#allocation11 + $0xb90] sm:$0xff]  ;;  %v10217_v59 = vcombine.low %v5118_v48, %v5122_v63  ;;  %v9978_v0 = vcombine.high %v4878_v24, %v4882_v21 }
 0x477   :  { %8270 = vmatprep.subr.bf16.mxu0 %v10130_v35  ;;  %v5114_v7 = vld [vmem:[#allocation11 + $0xbb0] sm:$0xff] }
 0x478   :  { %8174 = vmatmul.mubr.bf16.vlgmr.msra.gmra.mxu1 %v11129_v30  ;;  %v10210_v35 = vcombine.high %v5110_v33, %v5114_v7  ;;  %v4870_v28 = vld [vmem:[#allocation11 + $0x410] sm:$0xff] }
 0x479   :  { %8224 = vmatpush1.bf16.msra.mxu1 %v10025_v1  ;;  %8255 = vmatprep.mubr.bf16.mxu1 %v11066_v17  ;;  %v4874_v13 = vld [vmem:[#allocation11 + $0x430] sm:$0xff]  ;;  %v9977_v1 = vcombine.low %v4878_v24, %v4882_v21 }
 0x47a   :  { %8271 = vmatpush1.bf16.msra.mxu0 %v10129_v20  ;;  %8225 = vmatprep.subr.bf16.mxu1 %v10018_v2  ;;  %v5102_v26 = vld [vmem:[#allocation11 + $0xb50] sm:$0xff]  ;;  %v10209_v20 = vcombine.low %v5110_v33, %v5114_v7  ;;  %v9970_v2 = vcombine.high %v4870_v28, %v4874_v13 }
 0x47b   :  { %8272 = vmatprep.subr.bf16.mxu0 %v10122_v32  ;;  %v5106_v27 = vld [vmem:[#allocation11 + $0xb70] sm:$0xff] }
 0x47c   :  { %v10202_v32 = vcombine.high %v5102_v26, %v5106_v27  ;;  %v4990_v4 = vld [vmem:[#allocation11 + $0x7d0] sm:$0xff] }
 0x47d   :  { %8226 = vmatpush1.bf16.msra.mxu1 %v10017_v8  ;;  %v4994_v54 = vld [vmem:[#allocation11 + $0x7f0] sm:$0xff]  ;;  %v9969_v8 = vcombine.low %v4870_v28, %v4874_v13 }
 0x47e   :  { %8273 = vmatpush1.bf16.msra.mxu0 %v10121_v11  ;;  %8227 = vmatprep.subr.bf16.mxu1 %v10010_v14  ;;  %v5094_v9 = vld [vmem:[#allocation11 + $0xb10] sm:$0xff]  ;;  %v10201_v11 = vcombine.low %v5102_v26, %v5106_v27  ;;  %v10090_v14 = vcombine.high %v4990_v4, %v4994_v54  ;;  %v4799_v26 = vld [vmem:[#allocation11 + $0x1d8] sm:$0xff] }
 0x47f   :  { %8274 = vmatprep.subr.bf16.mxu0 %v10114_v15  ;;  %v5098_v10 = vld [vmem:[#allocation11 + $0xb30] sm:$0xff]  ;;  %v4803_v27 = vld [vmem:[#allocation11 + $0x1f8] sm:$0xff] }
 0x480   :  { %v10194_v15 = vcombine.high %v5094_v9, %v5098_v10  ;;  %v4982_v16 = vld [vmem:[#allocation11 + $0x790] sm:$0xff] }
 0x481   :  { %8228 = vmatpush1.bf16.msra.mxu1 %v10009_v44  ;;  %v4986_v18 = vld [vmem:[#allocation11 + $0x7b0] sm:$0xff]  ;;  %v10089_v44 = vcombine.low %v4990_v4, %v4994_v54 }
 0x482   :  { %8275 = vmatpush1.bf16.msra.mxu0 %v10113_v41  ;;  %8229 = vmatprep.subr.bf16.mxu1 %v10002_v60  ;;  %v5086_v19 = vld [vmem:[#allocation11 + $0xad0] sm:$0xff]  ;;  %v10193_v41 = vcombine.low %v5094_v9, %v5098_v10  ;;  %v10082_v60 = vcombine.high %v4982_v16, %v4986_v18  ;;  %v4791_v9 = vld [vmem:[#allocation11 + $0x198] sm:$0xff] }
 0x483   :  { %8276 = vmatprep.subr.bf16.mxu0 %v10106_v31  ;;  %v5090_v22 = vld [vmem:[#allocation11 + $0xaf0] sm:$0xff]  ;;  %v4795_v10 = vld [vmem:[#allocation11 + $0x1b8] sm:$0xff] }
 0x484   :  { %v10186_v31 = vcombine.high %v5086_v19, %v5090_v22  ;;  %v4974_v37 = vld [vmem:[#allocation11 + $0x750] sm:$0xff] }
 0x485   :  { %8230 = vmatpush1.bf16.msra.mxu1 %v10001_v50  ;;  %v4978_v34 = vld [vmem:[#allocation11 + $0x770] sm:$0xff]  ;;  %v10081_v50 = vcombine.low %v4982_v16, %v4986_v18 }
 0x486   :  { %8277 = vmatpush1.bf16.msra.mxu0 %v10105_v40  ;;  %8231 = vmatprep.subr.bf16.mxu1 %v9994_v42  ;;  %v5078_v36 = vld [vmem:[#allocation11 + $0xa90] sm:$0xff]  ;;  %v10185_v40 = vcombine.low %v5086_v19, %v5090_v22  ;;  %v10074_v42 = vcombine.high %v4974_v37, %v4978_v34  ;;  %v4783_v22 = vld [vmem:[#allocation11 + $0x158] sm:$0xff] }
 0x487   :  { %8278 = vmatprep.subr.bf16.mxu0 %v10098_v57  ;;  %v5082_v38 = vld [vmem:[#allocation11 + $0xab0] sm:$0xff] }
 0x488   :  { %v10178_v57 = vcombine.high %v5078_v36, %v5082_v38  ;;  %v4966_v45 = vld [vmem:[#allocation11 + $0x710] sm:$0xff] }
 0x489   :  { %8232 = vmatpush1.bf16.msra.mxu1 %v9993_v53  ;;  %v4970_v47 = vld [vmem:[#allocation11 + $0x730] sm:$0xff]  ;;  %v10073_v53 = vcombine.low %v4974_v37, %v4978_v34 }
 0x48a   :  { %8279 = vmatpush1.bf16.msra.mxu0 %v10097_v62  ;;  %8233 = vmatprep.subr.bf16.mxu1 %v9986_v49  ;;  %v5070_v48 = vld [vmem:[#allocation11 + $0xa50] sm:$0xff]  ;;  %v10177_v62 = vcombine.low %v5078_v36, %v5082_v38  ;;  %v10066_v49 = vcombine.high %v4966_v45, %v4970_v47 }
 0x48b   :  { %8280 = vmatprep.subr.bf16.mxu0 %v10218_v43  ;;  %v5074_v63 = vld [vmem:[#allocation11 + $0xa70] sm:$0xff] }
 0x48c   :  { %v10170_v43 = vcombine.high %v5070_v48, %v5074_v63  ;;  %v4958_v24 = vld [vmem:[#allocation11 + $0x6d0] sm:$0xff] }
 0x48d   :  { %8234 = vmatpush1.bf16.msra.mxu1 %v9985_v56  ;;  %v4962_v21 = vld [vmem:[#allocation11 + $0x6f0] sm:$0xff]  ;;  %v10065_v56 = vcombine.low %v4966_v45, %v4970_v47 }
 0x48e   :  { %8281 = vmatpush2.bf16.msra.mxu0 %v10217_v59  ;;  %8235 = vmatprep.subr.bf16.mxu1 %v9978_v0  ;;  %v5062_v33 = vld [vmem:[#allocation11 + $0xa10] sm:$0xff]  ;;  %v10169_v59 = vcombine.low %v5070_v48, %v5074_v63  ;;  %v10058_v0 = vcombine.high %v4958_v24, %v4962_v21 }
 0x48f   :  { %8282 = vmatprep.subr.bf16.mxu0 %v10210_v35  ;;  %v5066_v7 = vld [vmem:[#allocation11 + $0xa30] sm:$0xff] }
 0x490   :  { %v10162_v35 = vcombine.high %v5062_v33, %v5066_v7  ;;  %v4950_v28 = vld [vmem:[#allocation11 + $0x690] sm:$0xff] }
 0x491   :  { %8236 = vmatpush1.bf16.msra.mxu1 %v9977_v1  ;;  %v4954_v13 = vld [vmem:[#allocation11 + $0x6b0] sm:$0xff]  ;;  %v10057_v1 = vcombine.low %v4958_v24, %v4962_v21 }
 0x492   :  { %8283 = vmatpush2.bf16.msra.mxu0 %v10209_v20  ;;  %8237 = vmatprep.subr.bf16.mxu1 %v9970_v2  ;;  %v10161_v20 = vcombine.low %v5062_v33, %v5066_v7  ;;  %v10050_v2 = vcombine.high %v4950_v28, %v4954_v13  ;;  %v4942_v4 = vld [vmem:[#allocation11 + $0x650] sm:$0xff] }
 0x493   :  { %8284 = vmatprep.subr.bf16.mxu0 %v10202_v32  ;;  %v9900_v32 = vcombine.high %v4799_v26, %v4803_v27  ;;  %v4946_v54 = vld [vmem:[#allocation11 + $0x670] sm:$0xff] }
 0x494   :  { %v4934_v16 = vld [vmem:[#allocation11 + $0x610] sm:$0xff] }
 0x495   :  { %8238 = vmatpush1.bf16.msra.mxu1 %v9969_v8  ;;  %v10049_v8 = vcombine.low %v4950_v28, %v4954_v13  ;;  %v4938_v18 = vld [vmem:[#allocation11 + $0x630] sm:$0xff] }
 0x496   :  { %8285 = vmatpush2.bf16.msra.mxu0 %v10201_v11  ;;  %8239 = vmatprep.subr.bf16.mxu1 %v10090_v14  ;;  %v9899_v11 = vcombine.low %v4799_v26, %v4803_v27  ;;  %v10042_v14 = vcombine.high %v4942_v4, %v4946_v54  ;;  %v10034_v37 = vcombine.high %v4934_v16, %v4938_v18  ;;  %v5182_v36 = vld [vmem:[#allocation11 + $0xdd0] sm:$0xff] }
 0x497   :  { %8286 = vmatprep.subr.bf16.mxu0 %v10194_v15  ;;  %v9892_v15 = vcombine.high %v4791_v9, %v4795_v10  ;;  %v5186_v38 = vld [vmem:[#allocation11 + $0xdf0] sm:$0xff] }
 0x498   :  { %v10282_v48 = vcombine.high %v5182_v36, %v5186_v38  ;;  %v5174_v63 = vld [vmem:[#allocation11 + $0xd90] sm:$0xff] }
 0x499   :  { %8240 = vmatpush2.bf16.msra.mxu1 %v10089_v44  ;;  %v4787_v44 = vld [vmem:[#allocation11 + $0x178] sm:$0xff]  ;;  %v5166_v7 = vld [vmem:[#allocation11 + $0xd50] sm:$0xff] }
 0x49a   :  { %8287 = vmatpush2.bf16.msra.mxu0 %v10193_v41  ;;  %8241 = vmatprep.subr.bf16.mxu1 %v10082_v60  ;;  %v10041_v41 = vcombine.low %v4942_v4, %v4946_v54  ;;  %v9884_v34 = vcombine.high %v4783_v22, %v4787_v44  ;;  %v9883_v47 = vcombine.low %v4783_v22, %v4787_v44  ;;  %v5162_v4 = vld [vmem:[#allocation11 + $0xd30] sm:$0xff]  ;;  %v4747_v22 = vld [vmem:[#allocation11 + $0x38] sm:$0xff] }
 0x49b   :  { %8288 = vmatprep.subr.bf16.mxu0 %v10186_v31  ;;  %v9891_v31 = vcombine.low %v4791_v9, %v4795_v10  ;;  %v4751_v9 = vld [vmem:[#allocation11 + $0x58] sm:$0xff] }
 0x49d   :  { %8242 = vmatpush2.bf16.msra.mxu1 %v10081_v50 }
 0x49e   :  { %8289 = vmatpush2.bf16.msra.mxu0 %v10185_v40  ;;  %8243 = vmatprep.subr.bf16.mxu1 %v10074_v42  ;;  %v4775_v40 = vld [vmem:[#allocation11 + $0x118] sm:$0xff] }
 0x49f   :  { %8290 = vmatprep.subr.bf16.mxu0 %v10178_v57  ;;  %v4779_v42 = vld [vmem:[#allocation11 + $0x138] sm:$0xff]  ;;  %v10033_v57 = vcombine.low %v4934_v16, %v4938_v18  ;;  %v5150_v16 = vld [vmem:[#allocation11 + $0xcd0] sm:$0xff] }
 0x4a0   :  { %v9875_v24 = vcombine.low %v4775_v40, %v4779_v42  ;;  %v5154_v18 = vld [vmem:[#allocation11 + $0xcf0] sm:$0xff] }
 0x4a1   :  { %8244 = vmatpush2.bf16.msra.mxu1 %v10073_v53  ;;  %v5178_v53 = vld [vmem:[#allocation11 + $0xdb0] sm:$0xff] }
 0x4a2   :  { %8291 = vmatpush2.bf16.msra.mxu0 %v10177_v62  ;;  %8245 = vmatprep.subr.bf16.mxu1 %v10066_v49  ;;  %v4767_v62 = vld [vmem:[#allocation11 + $0xd8] sm:$0xff]  ;;  %v10274_v21 = vcombine.high %v5174_v63, %v5178_v53  ;;  %v10273_v13 = vcombine.low %v5174_v63, %v5178_v53 }
 0x4a3   :  { %8292 = vmatprep.subr.bf16.mxu0 %v10170_v43  ;;  %v4771_v49 = vld [vmem:[#allocation11 + $0xf8] sm:$0xff]  ;;  %v10281_v43 = vcombine.low %v5182_v36, %v5186_v38  ;;  %v5146_v36 = vld [vmem:[#allocation11 + $0xcb0] sm:$0xff] }
 0x4a4   :  { %v9868_v33 = vcombine.high %v4767_v62, %v4771_v49  ;;  %v9867_v27 = vcombine.low %v4767_v62, %v4771_v49  ;;  %v4863_v38 = vld [vmem:[#allocation11 + $0x3d8] sm:$0xff] }
 0x4a5   :  { %8246 = vmatpush2.bf16.msra.mxu1 %v10065_v56  ;;  %v5170_v56 = vld [vmem:[#allocation11 + $0xd70] sm:$0xff]  ;;  %v4859_v63 = vld [vmem:[#allocation11 + $0x3b8] sm:$0xff] }
 0x4a6   :  { %8293 = vmatpush2.bf16.msra.mxu0 %v10169_v59  ;;  %8247 = vmatprep.subr.bf16.mxu1 %v10058_v0  ;;  %v4759_v0 = vld [vmem:[#allocation11 + $0x98] sm:$0xff]  ;;  %v10265_v10 = vcombine.low %v5166_v7, %v5170_v56 }
 0x4a7   :  { %8294 = vmatprep.subr.bf16.mxu0 %v10162_v35  ;;  %v4763_v35 = vld [vmem:[#allocation11 + $0xb8] sm:$0xff] }
 0x4a9   :  { %8248 = vmatpush2.bf16.msra.mxu1 %v10057_v1  ;;  %v10266_v1 = vcombine.high %v5166_v7, %v5170_v56  ;;  %v4851_v7 = vld [vmem:[#allocation11 + $0x378] sm:$0xff] }
 0x4aa   :  { %8295 = vmatpush2.bf16.msra.mxu0 %v10161_v20  ;;  %8249 = vmatprep.subr.bf16.mxu1 %v10050_v2  ;;  %v9860_v2 = vcombine.high %v4759_v0, %v4763_v35 }
 0x4ab   :  { %8346 = vmatprep.subr.bf16.mxu0 %v9900_v32  ;;  %v5158_v32 = vld [vmem:[#allocation11 + $0xd10] sm:$0xff] }
 0x4ac   :  { %v11157_v19 = vpop.f32.mrf.mxu0  ;;  %v10257_v44 = vcombine.low %v5158_v32, %v5162_v4 }
 0x4ad   :  { %8250 = vmatpush2.bf16.msra.mxu1 %v10049_v8  ;;  %8297 = vmatmul.mubr.bf16.vlgmr.msra.gmra.mxu0 %v11107_v5 }
 0x4ae   :  { %8347 = vmatpush1.bf16.msra.mxu0 %v9899_v11  ;;  %8378 = vmatprep.mubr.bf16.mxu0 %v11063_v39  ;;  %v11161_v60 = vpop.f32.mrf.mxu0  ;;  %v9876_v39 = vcombine.high %v4775_v40, %v4779_v42  ;;  %v9859_v11 = vcombine.low %v4759_v0, %v4763_v35  ;;  %v10249_v40 = vcombine.low %v5150_v16, %v5154_v18 }
 0x4af   :  { %8251 = vmatprep.subr.bf16.mxu1 %v10042_v14  ;;  %8348 = vmatprep.subr.bf16.mxu0 %v9892_v15  ;;  %v10258_v14 = vcombine.high %v5158_v32, %v5162_v4 }
 0x4b0   :  { %v8056_v50 = vpop.f32.mrf.mxu0 }
 0x4b1   :  { %8252 = vmatpush2.bf16.msra.mxu1 %v10041_v41  ;;  %v4867_v50 = vld [vmem:[#allocation11 + $0x3f8] sm:$0xff] }
 0x4b2   :  { %8349 = vmatpush1.bf16.msra.mxu0 %v9891_v31  ;;  %v8057_v45 = vpop.f32.mrf.mxu0  ;;  %8253 = vmatprep.subr.bf16.mxu1 %v10034_v37  ;;  %v10250_v31 = vcombine.high %v5150_v16, %v5154_v18  ;;  %v9963_v62 = vcombine.low %v4863_v38, %v4867_v50  ;;  %v5230_v18 = vld [vmem:[#allocation11 + $0xf50] sm:$0xff] }
 0x4b3   :  { %8350 = vmatprep.subr.bf16.mxu0 %v9884_v34  ;;  %v5142_v34 = vld [vmem:[#allocation11 + $0xc90] sm:$0xff]  ;;  %v9964_v45 = vcombine.high %v4863_v38, %v4867_v50  ;;  %v4815_v50 = vld [vmem:[#allocation11 + $0x258] sm:$0xff] }
 0x4b4   :  { %v10241_v53 = vcombine.low %v5142_v34, %v5146_v36  ;;  %v5226_v38 = vld [vmem:[#allocation11 + $0xf30] sm:$0xff] }
 0x4b5   :  { %8254 = vmatpush2.bf16.msra.mxu1 %v10033_v57  ;;  %v10242_v57 = vcombine.high %v5142_v34, %v5146_v36  ;;  %v5222_v36 = vld [vmem:[#allocation11 + $0xf10] sm:$0xff] }
 0x4b6   :  { %8351 = vmatpush1.bf16.msra.mxu0 %v9883_v47  ;;  %8305 = vmatprep.subr.bf16.mxu1 %v10282_v48  ;;  %v5134_v47 = vld [vmem:[#allocation11 + $0xc50] sm:$0xff] }
 0x4b7   :  { %8352 = vmatprep.subr.bf16.mxu0 %v9876_v39  ;;  %v5138_v48 = vld [vmem:[#allocation11 + $0xc70] sm:$0xff]  ;;  %v4855_v39 = vld [vmem:[#allocation11 + $0x398] sm:$0xff] }
 0x4b8   :  { %8256 = vmatmul.mubr.bf16.vlgmr.msra.gmra.mxu1 %v11084_v6  ;;  %v8011_v59 = vpop.f32.mrf.mxu1  ;;  %v10234_v49 = vcombine.high %v5134_v47, %v5138_v48  ;;  %v10233_v56 = vcombine.low %v5134_v47, %v5138_v48  ;;  %v5214_v48 = vld [vmem:[#allocation11 + $0xed0] sm:$0xff] }
 0x4b9   :  { %v11165_v28 = vadd.f32 %v8011_v59, %v11148_v46  ;;  %8306 = vmatpush1.bf16.msra.mxu1 %v10281_v43  ;;  %8337 = vmatprep.mubr.bf16.mxu1 %v11127_v29  ;;  %v4755_v46 = vld [vmem:[#allocation11 + $0x78] sm:$0xff]  ;;  %v9956_v43 = vcombine.high %v4855_v39, %v4859_v63  ;;  %v9955_v59 = vcombine.low %v4855_v39, %v4859_v63  ;;  %v5218_v39 = vld [vmem:[#allocation11 + $0xef0] sm:$0xff] }
 0x4ba   :  { %8353 = vmatpush1.bf16.msra.mxu0 %v9875_v24  ;;  %v8013_v26 = vpop.f32.mrf.mxu1  ;;  %8307 = vmatprep.subr.bf16.mxu1 %v10274_v21  ;;  %v9852_v15 = vcombine.high %v4751_v9, %v4755_v46  ;;  %v9851_v41 = vcombine.low %v4751_v9, %v4755_v46  ;;  %v5126_v24 = vld [vmem:[#allocation11 + $0xc10] sm:$0xff]  ;;  %v4807_v63 = vld [vmem:[#allocation11 + $0x218] sm:$0xff] }
 0x4bb   :  { %v11169_v20 = vadd.f32 %v8013_v26, %v11153_v55  ;;  %8354 = vmatprep.subr.bf16.mxu0 %v9868_v33  ;;  %v4743_v55 = vld [vmem:[#allocation11 + $0x18] sm:$0xff]  ;;  %v5130_v21 = vld [vmem:[#allocation11 + $0xc30] sm:$0xff] }
 0x4bc   :  { %v8015_v54 = vpop.f32.mrf.mxu1  ;;  %v9844_v37 = vcombine.high %v4743_v55, %v4747_v22  ;;  %v9843_v42 = vcombine.low %v4743_v55, %v4747_v22  ;;  %v4847_v33 = vld [vmem:[#allocation11 + $0x358] sm:$0xff]  ;;  %v10226_v0 = vcombine.high %v5126_v24, %v5130_v21  ;;  %v5250_v26 = vld [vmem:[#allocation11 + $0xff0] sm:$0xff] }
 0x4bd   :  { %8308 = vmatpush1.bf16.msra.mxu1 %v10273_v13  ;;  %v9948_v35 = vcombine.high %v4847_v33, %v4851_v7  ;;  %v5246_v13 = vld [vmem:[#allocation11 + $0xfd0] sm:$0xff]  ;;  %v9947_v32 = vcombine.low %v4847_v33, %v4851_v7  ;;  %v4823_v22 = vld [vmem:[#allocation11 + $0x298] sm:$0xff] }
 0x4be   :  { %8355 = vmatpush1.bf16.msra.mxu0 %v9867_v27  ;;  %v8016_v8 = vpop.f32.mrf.mxu1  ;;  %8309 = vmatprep.subr.bf16.mxu1 %v10266_v1  ;;  %v4839_v27 = vld [vmem:[#allocation11 + $0x318] sm:$0xff]  ;;  %v10346_v4 = vcombine.high %v5246_v13, %v5250_v26  ;;  %v5238_v9 = vld [vmem:[#allocation11 + $0xf90] sm:$0xff] }
 0x4bf   :  { %8356 = vmatprep.subr.bf16.mxu0 %v9860_v2  ;;  %v4843_v1 = vld [vmem:[#allocation11 + $0x338] sm:$0xff]  ;;  %v10225_v2 = vcombine.low %v5126_v24, %v5130_v21  ;;  %v5242_v46 = vld [vmem:[#allocation11 + $0xfb0] sm:$0xff] }
 0x4c0   :  { %v9940_v54 = vcombine.high %v4839_v27, %v4843_v1  ;;  %v4835_v8 = vld [vmem:[#allocation11 + $0x2f8] sm:$0xff]  ;;  %v5234_v55 = vld [vmem:[#allocation11 + $0xf70] sm:$0xff] }
 0x4c1   :  { %8310 = vmatpush1.bf16.msra.mxu1 %v10265_v10  ;;  %v4831_v10 = vld [vmem:[#allocation11 + $0x2d8] sm:$0xff]  ;;  %v5206_v21 = vld [vmem:[#allocation11 + $0xe90] sm:$0xff] }
 0x4c2   :  { %8357 = vmatpush1.bf16.msra.mxu0 %v9859_v11  ;;  %8311 = vmatprep.subr.bf16.mxu1 %v10258_v14  ;;  %v10345_v11 = vcombine.low %v5246_v13, %v5250_v26  ;;  %v9939_v14 = vcombine.low %v4839_v27, %v4843_v1  ;;  %v9932_v16 = vcombine.high %v4831_v10, %v4835_v8  ;;  %v5210_v33 = vld [vmem:[#allocation11 + $0xeb0] sm:$0xff]  ;;  %v5055_v7 = vld [vmem:[#allocation11 + $0x9d8] sm:$0xff] }
 0x4c3   :  { %8358 = vmatprep.subr.bf16.mxu0 %v9852_v15  ;;  %v10338_v15 = vcombine.high %v5238_v9, %v5242_v46  ;;  %v5198_v26 = vld [vmem:[#allocation11 + $0xe50] sm:$0xff]  ;;  %v5047_v1 = vld [vmem:[#allocation11 + $0x998] sm:$0xff] }
 0x4c4   :  { %v5202_v27 = vld [vmem:[#allocation11 + $0xe70] sm:$0xff] }
 0x4c5   :  { %8312 = vmatpush1.bf16.msra.mxu1 %v10257_v44  ;;  %v4827_v44 = vld [vmem:[#allocation11 + $0x2b8] sm:$0xff] }
 0x4c6   :  { %8359 = vmatpush1.bf16.msra.mxu0 %v9851_v41  ;;  %8313 = vmatprep.subr.bf16.mxu1 %v10250_v31  ;;  %v10337_v41 = vcombine.low %v5238_v9, %v5242_v46  ;;  %v9931_v31 = vcombine.low %v4831_v10, %v4835_v8  ;;  %v9924_v34 = vcombine.high %v4823_v22, %v4827_v44  ;;  %v5190_v46 = vld [vmem:[#allocation11 + $0xe10] sm:$0xff]  ;;  %v5039_v8 = vld [vmem:[#allocation11 + $0x958] sm:$0xff] }
 0x4c7   :  { %8360 = vmatprep.subr.bf16.mxu0 %v9844_v37  ;;  %v10330_v37 = vcombine.high %v5230_v18, %v5234_v55  ;;  %v5194_v10 = vld [vmem:[#allocation11 + $0xe30] sm:$0xff] }
 0x4c9   :  { %8314 = vmatpush1.bf16.msra.mxu1 %v10249_v40  ;;  %v4819_v40 = vld [vmem:[#allocation11 + $0x278] sm:$0xff] }
 0x4ca   :  { %8361 = vmatpush1.bf16.msra.mxu0 %v9843_v42  ;;  %8315 = vmatprep.subr.bf16.mxu1 %v10242_v57  ;;  %v10329_v42 = vcombine.low %v5230_v18, %v5234_v55  ;;  %v9923_v57 = vcombine.low %v4823_v22, %v4827_v44  ;;  %v9916_v47 = vcombine.high %v4815_v50, %v4819_v40  ;;  %v4927_v44 = vld [vmem:[#allocation11 + $0x5d8] sm:$0xff] }
 0x4cb   :  { %8362 = vmatprep.subr.bf16.mxu0 %v9964_v45  ;;  %v10322_v45 = vcombine.high %v5222_v36, %v5226_v38  ;;  %v10290_v18 = vcombine.high %v5190_v46, %v5194_v10 }
 0x4cd   :  { %8316 = vmatpush1.bf16.msra.mxu1 %v10241_v53  ;;  %v4811_v53 = vld [vmem:[#allocation11 + $0x238] sm:$0xff] }
 0x4ce   :  { %8363 = vmatpush2.bf16.msra.mxu0 %v9963_v62  ;;  %8317 = vmatprep.subr.bf16.mxu1 %v10234_v49  ;;  %v10321_v62 = vcombine.low %v5222_v36, %v5226_v38  ;;  %v9915_v49 = vcombine.low %v4815_v50, %v4819_v40  ;;  %v9908_v24 = vcombine.high %v4807_v63, %v4811_v53  ;;  %v11175_v50 = vld [vmem:[#allocation13] sm:$0xff] }
 0x4cf   :  { %8364 = vmatprep.subr.bf16.mxu0 %v9956_v43  ;;  %v10314_v43 = vcombine.high %v5214_v48, %v5218_v39  ;;  %v10289_v36 = vcombine.low %v5190_v46, %v5194_v10 }
 0x4d1   :  { %8318 = vmatpush1.bf16.msra.mxu1 %v10233_v56  ;;  %v5059_v56 = vld [vmem:[#allocation11 + $0x9f8] sm:$0xff] }
 0x4d2   :  { %8365 = vmatpush2.bf16.msra.mxu0 %v9955_v59  ;;  %8319 = vmatprep.subr.bf16.mxu1 %v10226_v0  ;;  %v10313_v59 = vcombine.low %v5214_v48, %v5218_v39  ;;  %v9907_v0 = vcombine.low %v4807_v63, %v4811_v53  ;;  %v10156_v13 = vcombine.high %v5055_v7, %v5059_v56  ;;  %v5027_v48 = vld [vmem:[#allocation11 + $0x8f8] sm:$0xff] }
 0x4d3   :  { %8366 = vmatprep.subr.bf16.mxu0 %v9948_v35  ;;  %v10306_v35 = vcombine.high %v5206_v21, %v5210_v33  ;;  %v5269_v39 = vrot.slane %v11175_v50, %v10939_v25 }
 0x4d5   :  { %8320 = vmatpush1.bf16.msra.mxu1 %v10225_v2  ;;  %v5051_v2 = vld [vmem:[#allocation11 + $0x9b8] sm:$0xff] }
 0x4d6   :  { %8367 = vmatpush2.bf16.msra.mxu0 %v9947_v32  ;;  %8321 = vmatprep.subr.bf16.mxu1 %v10346_v4  ;;  %v10305_v32 = vcombine.low %v5206_v21, %v5210_v33  ;;  %v10155_v4 = vcombine.low %v5055_v7, %v5059_v56  ;;  %v10148_v9 = vcombine.high %v5047_v1, %v5051_v2  ;;  %v5015_v33 = vld [vmem:[#allocation11 + $0x898] sm:$0xff] }
 0x4d7   :  { %8368 = vmatprep.subr.bf16.mxu0 %v9940_v54  ;;  %v10298_v54 = vcombine.high %v5198_v26, %v5202_v27  ;;  %v5019_v7 = vld [vmem:[#allocation11 + $0x8b8] sm:$0xff]  ;;  %v8055_v56 = vadd.f32 %v11161_v60, %v5269_v39 }
 0x4d8   :  { %v5007_v60 = vld [vmem:[#allocation11 + $0x858] sm:$0xff]  ;;  %v10115_v46 = vcombine.low %v5015_v33, %v5019_v7 }
 0x4d9   :  { %8322 = vmatpush2.bf16.msra.mxu1 %v10345_v11  ;;  %v5043_v11 = vld [vmem:[#allocation11 + $0x978] sm:$0xff] }
 0x4da   :  { %8369 = vmatpush2.bf16.msra.mxu0 %v9939_v14  ;;  %8323 = vmatprep.subr.bf16.mxu1 %v10338_v15  ;;  %v10297_v15 = vcombine.low %v5198_v26, %v5202_v27  ;;  %v10140_v22 = vcombine.high %v5039_v8, %v5043_v11  ;;  %v10116_v26 = vcombine.high %v5015_v33, %v5019_v7  ;;  %v4903_v27 = vld [vmem:[#allocation11 + $0x518] sm:$0xff] }
 0x4db   :  { %8370 = vmatprep.subr.bf16.mxu0 %v9932_v16  ;;  %v10147_v16 = vcombine.low %v5047_v1, %v5051_v2  ;;  %v4907_v1 = vld [vmem:[#allocation11 + $0x538] sm:$0xff] }
 0x4dc   :  { %v10004_v10 = vcombine.high %v4903_v27, %v4907_v1  ;;  %v4991_v7 = vld [vmem:[#allocation11 + $0x7d8] sm:$0xff] }
 0x4dd   :  { %8324 = vmatpush2.bf16.msra.mxu1 %v10337_v41  ;;  %v4931_v41 = vld [vmem:[#allocation11 + $0x5f8] sm:$0xff] }
 0x4de   :  { %8371 = vmatpush2.bf16.msra.mxu0 %v9931_v31  ;;  %8325 = vmatprep.subr.bf16.mxu1 %v10330_v37  ;;  %v5031_v31 = vld [vmem:[#allocation11 + $0x918] sm:$0xff]  ;;  %v10028_v38 = vcombine.high %v4927_v44, %v4931_v41  ;;  %v10027_v63 = vcombine.low %v4927_v44, %v4931_v41 }
 0x4df   :  { %8372 = vmatprep.subr.bf16.mxu0 %v9924_v34  ;;  %v5035_v37 = vld [vmem:[#allocation11 + $0x938] sm:$0xff] }
 0x4e0   :  { %v10131_v53 = vcombine.low %v5031_v31, %v5035_v37  ;;  %v4887_v41 = vld [vmem:[#allocation11 + $0x498] sm:$0xff] }
 0x4e1   :  { %8326 = vmatpush2.bf16.msra.mxu1 %v10329_v42  ;;  %v10132_v42 = vcombine.high %v5031_v31, %v5035_v37  ;;  %v4891_v31 = vld [vmem:[#allocation11 + $0x4b8] sm:$0xff] }
 0x4e2   :  { %8373 = vmatpush2.bf16.msra.mxu0 %v9923_v57  ;;  %8327 = vmatprep.subr.bf16.mxu1 %v10322_v45  ;;  %v4919_v57 = vld [vmem:[#allocation11 + $0x598] sm:$0xff] }
 0x4e3   :  { %8374 = vmatprep.subr.bf16.mxu0 %v9916_v47  ;;  %v4923_v45 = vld [vmem:[#allocation11 + $0x5b8] sm:$0xff] }
 0x4e4   :  { %v5023_v47 = vld [vmem:[#allocation11 + $0x8d8] sm:$0xff] }
 0x4e5   :  { %8328 = vmatpush2.bf16.msra.mxu1 %v10321_v62  ;;  %v10020_v62 = vcombine.high %v4919_v57, %v4923_v45  ;;  %v5119_v37 = vld [vmem:[#allocation11 + $0xbd8] sm:$0xff] }
 0x4e6   :  { %8375 = vmatpush2.bf16.msra.mxu0 %v9915_v49  ;;  %8329 = vmatprep.subr.bf16.mxu1 %v10314_v43  ;;  %v4911_v43 = vld [vmem:[#allocation11 + $0x558] sm:$0xff] }
 0x4e7   :  { %8376 = vmatprep.subr.bf16.mxu0 %v9908_v24  ;;  %v4915_v24 = vld [vmem:[#allocation11 + $0x578] sm:$0xff] }
 0x4e9   :  { %8330 = vmatpush2.bf16.msra.mxu1 %v10313_v59  ;;  %v10019_v59 = vcombine.low %v4919_v57, %v4923_v45  ;;  %v5111_v57 = vld [vmem:[#allocation11 + $0xb98] sm:$0xff] }
 0x4ea   :  { %8377 = vmatpush2.bf16.msra.mxu0 %v9907_v0  ;;  %8331 = vmatprep.subr.bf16.mxu1 %v10306_v35  ;;  %v10012_v35 = vcombine.high %v4911_v43, %v4915_v24  ;;  %v5115_v45 = vld [vmem:[#allocation11 + $0xbb8] sm:$0xff] }
 0x4eb   :  { %8428 = vmatprep.subr.bf16.mxu0 %v10156_v13 }
 0x4ed   :  { %v11171_v14 = vpop.f32.mrf.mxu0  ;;  %8332 = vmatpush2.bf16.msra.mxu1 %v10305_v32  ;;  %8379 = vmatmul.mubr.bf16.vlgmr.msra.gmra.mxu0 %v11082_v3  ;;  %v10139_v3 = vcombine.low %v5039_v8, %v5043_v11  ;;  %v4895_v11 = vld [vmem:[#allocation11 + $0x4d8] sm:$0xff] }
 0x4ee   :  { %8429 = vmatpush1.bf16.msra.mxu0 %v10155_v4  ;;  %8460 = vmatprep.mubr.bf16.mxu0 %v11093_v51  ;;  %v5265_v51 = vrot.slane %v11175_v50, %v10933_v23  ;;  %v10124_v23 = vcombine.high %v5023_v47, %v5027_v48  ;;  %v5011_v4 = vld [vmem:[#allocation11 + $0x878] sm:$0xff] }
 0x4ef   :  { %v8136_v55 = vpop.f32.mrf.mxu0  ;;  %8333 = vmatprep.subr.bf16.mxu1 %v10298_v54  ;;  %8430 = vmatprep.subr.bf16.mxu0 %v10148_v9  ;;  %v10011_v54 = vcombine.low %v4911_v43, %v4915_v24  ;;  %v10108_v8 = vcombine.high %v5007_v60, %v5011_v4  ;;  %v10211_v24 = vcombine.low %v5111_v57, %v5115_v45 }
 0x4f0   :  { %v8053_v49 = vadd.f32 %v11157_v19, %v5265_v51  ;;  %v10123_v19 = vcombine.low %v5023_v47, %v5027_v48  ;;  %v9987_v47 = vcombine.low %v4887_v41, %v4891_v31 }
 0x4f1   :  { %v8138_v34 = vpop.f32.mrf.mxu0  ;;  %8334 = vmatpush2.bf16.msra.mxu1 %v10297_v15  ;;  %v4899_v15 = vld [vmem:[#allocation11 + $0x4f8] sm:$0xff] }
 0x4f2   :  { %8431 = vmatpush1.bf16.msra.mxu0 %v10147_v16  ;;  %8335 = vmatprep.subr.bf16.mxu1 %v10290_v18  ;;  %v4999_v16 = vld [vmem:[#allocation11 + $0x818] sm:$0xff]  ;;  %v9996_v44 = vcombine.high %v4895_v11, %v4899_v15 }
 0x4f3   :  { %v8139_v40 = vpop.f32.mrf.mxu0  ;;  %8432 = vmatprep.subr.bf16.mxu0 %v10140_v22  ;;  %v5003_v18 = vld [vmem:[#allocation11 + $0x838] sm:$0xff]  ;;  %v10107_v22 = vcombine.low %v5007_v60, %v5011_v4 }
 0x4f4   :  { %v5123_v34 = vld [vmem:[#allocation11 + $0xbf8] sm:$0xff] }
 0x4f5   :  { %8336 = vmatpush2.bf16.msra.mxu1 %v10289_v36  ;;  %v9995_v36 = vcombine.low %v4895_v11, %v4899_v15  ;;  %v10220_v51 = vcombine.high %v5119_v37, %v5123_v34  ;;  %v4879_v40 = vld [vmem:[#allocation11 + $0x458] sm:$0xff]  ;;  %v10219_v48 = vcombine.low %v5119_v37, %v5123_v34 }
 0x4f6   :  { %8433 = vmatpush1.bf16.msra.mxu0 %v10139_v3  ;;  %8387 = vmatprep.subr.bf16.mxu1 %v10028_v38  ;;  %v10099_v3 = vcombine.low %v4999_v16, %v5003_v18  ;;  %v9988_v38 = vcombine.high %v4887_v41, %v4891_v31  ;;  %v5083_v11 = vld [vmem:[#allocation11 + $0xab8] sm:$0xff] }
 0x4f7   :  { %8434 = vmatprep.subr.bf16.mxu0 %v10132_v42  ;;  %v4883_v42 = vld [vmem:[#allocation11 + $0x478] sm:$0xff] }
 0x4f8   :  { %v8093_v21 = vpop.f32.mrf.mxu1  ;;  %8338 = vmatmul.mubr.bf16.vlgmr.msra.gmra.mxu1 %v11129_v30  ;;  %v9980_v39 = vcombine.high %v4879_v40, %v4883_v42  ;;  %v9979_v43 = vcombine.low %v4879_v40, %v4883_v42  ;;  %v5075_v41 = vld [vmem:[#allocation11 + $0xa78] sm:$0xff] }
 0x4f9   :  { %v8094_v25 = vadd.f32 %v8093_v21, %v8053_v49  ;;  %8388 = vmatpush1.bf16.msra.mxu1 %v10027_v63  ;;  %8419 = vmatprep.mubr.bf16.mxu1 %v11066_v17  ;;  %v10212_v63 = vcombine.high %v5111_v57, %v5115_v45  ;;  %v5103_v49 = vld [vmem:[#allocation11 + $0xb58] sm:$0xff] }
 0x4fa   :  { %v8095_v0 = vpop.f32.mrf.mxu1  ;;  %8435 = vmatpush1.bf16.msra.mxu0 %v10131_v53  ;;  %8389 = vmatprep.subr.bf16.mxu1 %v10020_v62  ;;  %v4871_v53 = vld [vmem:[#allocation11 + $0x418] sm:$0xff] }
 0x4fb   :  { %v8096_v13 = vadd.f32 %v8095_v0, %v8055_v56  ;;  %8436 = vmatprep.subr.bf16.mxu0 %v10124_v23  ;;  %v11186_v2 = vadd.f32 %v11171_v14, %v8094_v25  ;;  %v10003_v14 = vcombine.low %v4903_v27, %v4907_v1  ;;  %v4875_v62 = vld [vmem:[#allocation11 + $0x438] sm:$0xff] }
 0x4fc   :  { %v8097_v32 = vpop.f32.mrf.mxu1  ;;  %v5107_v23 = vld [vmem:[#allocation11 + $0xb78] sm:$0xff]  ;;  %v9972_v21 = vcombine.high %v4871_v53, %v4875_v62  ;;  %v9971_v0 = vcombine.low %v4871_v53, %v4875_v62 }
 0x4fd   :  { %8390 = vmatpush1.bf16.msra.mxu1 %v10019_v59  ;;  %v11188_v17 = vadd.f32 %v8136_v55, %v8096_v13  ;;  %v10100_v55 = vcombine.high %v4999_v16, %v5003_v18  ;;  %v10204_v33 = vcombine.high %v5103_v49, %v5107_v23  ;;  %v4995_v56 = vld [vmem:[#allocation11 + $0x7f8] sm:$0xff] }
 0x4fe   :  { %v8098_v9 = vpop.f32.mrf.mxu1  ;;  %8437 = vmatpush1.bf16.msra.mxu0 %v10123_v19  ;;  %8391 = vmatprep.subr.bf16.mxu1 %v10012_v35  ;;  %v5095_v25 = vld [vmem:[#allocation11 + $0xb18] sm:$0xff]  ;;  %v10203_v19 = vcombine.low %v5103_v49, %v5107_v23  ;;  %v10092_v35 = vcombine.high %v4991_v7, %v4995_v56  ;;  %v10091_v60 = vcombine.low %v4991_v7, %v4995_v56  ;;  %v10517_v49 = vld [vmem:[#allocation14 + $0x78] sm:$0xff]   ;;  %v8511_v23 = vmax.f32 %v11169_v20, 0.0 }
 0x4ff   :  { %8438 = vmatprep.subr.bf16.mxu0 %v10116_v26  ;;  %v5099_v59 = vld [vmem:[#allocation11 + $0xb38] sm:$0xff] }
 0x500   :  { %v10196_v13 = vcombine.high %v5095_v25, %v5099_v59  ;;  %v4983_v26 = vld [vmem:[#allocation11 + $0x798] sm:$0xff]  ;;  %v10195_v4 = vcombine.low %v5095_v25, %v5099_v59 }
 0x501   :  { %8392 = vmatpush1.bf16.msra.mxu1 %v10011_v54  ;;  %v4987_v27 = vld [vmem:[#allocation11 + $0x7b8] sm:$0xff] }
 0x502   :  { %8439 = vmatpush1.bf16.msra.mxu0 %v10115_v46  ;;  %8393 = vmatprep.subr.bf16.mxu1 %v10004_v10  ;;  %v5087_v1 = vld [vmem:[#allocation11 + $0xad8] sm:$0xff]  ;;  %v10084_v54 = vcombine.high %v4983_v26, %v4987_v27  ;;  %v10083_v15 = vcombine.low %v4983_v26, %v4987_v27  ;;  %v10521_v27 = vld [vmem:[#allocation14 + $0x68] sm:$0xff]  }
 0x503   :  { %8440 = vmatprep.subr.bf16.mxu0 %v10108_v8  ;;  %v5091_v32 = vld [vmem:[#allocation11 + $0xaf8] sm:$0xff] }
 0x504   :  { %v10188_v9 = vcombine.high %v5087_v1, %v5091_v32  ;;  %v4975_v46 = vld [vmem:[#allocation11 + $0x758] sm:$0xff]  ;;  %v10187_v16 = vcombine.low %v5087_v1, %v5091_v32 }
 0x505   :  { %8394 = vmatpush1.bf16.msra.mxu1 %v10003_v14  ;;  %v4979_v10 = vld [vmem:[#allocation11 + $0x778] sm:$0xff] }
 0x506   :  { %8441 = vmatpush1.bf16.msra.mxu0 %v10107_v22  ;;  %8395 = vmatprep.subr.bf16.mxu1 %v9996_v44  ;;  %v5079_v8 = vld [vmem:[#allocation11 + $0xa98] sm:$0xff]  ;;  %v10076_v18 = vcombine.high %v4975_v46, %v4979_v10  ;;  %v10075_v31 = vcombine.low %v4975_v46, %v4979_v10  ;;  %v10523_v46 = vld [vmem:[#allocation14 + $0x60] sm:$0xff]  }
 0x507   :  { %8442 = vmatprep.subr.bf16.mxu0 %v10100_v55  ;;  %v10180_v14 = vcombine.high %v5079_v8, %v5083_v11  ;;  %v4967_v22 = vld [vmem:[#allocation11 + $0x718] sm:$0xff]  ;;  %v10179_v37 = vcombine.low %v5079_v8, %v5083_v11 }
 0x508   :  { %v4971_v44 = vld [vmem:[#allocation11 + $0x738] sm:$0xff] }
 0x509   :  { %8396 = vmatpush1.bf16.msra.mxu1 %v9995_v36  ;;  %v5071_v55 = vld [vmem:[#allocation11 + $0xa58] sm:$0xff]  ;;  %v10068_v34 = vcombine.high %v4967_v22, %v4971_v44  ;;  %v10067_v42 = vcombine.low %v4967_v22, %v4971_v44 }
 0x50a   :  { %8443 = vmatpush1.bf16.msra.mxu0 %v10099_v3  ;;  %8397 = vmatprep.subr.bf16.mxu1 %v9988_v38  ;;  %v10172_v36 = vcombine.high %v5071_v55, %v5075_v41  ;;  %v4959_v3 = vld [vmem:[#allocation11 + $0x6d8] sm:$0xff]  ;;  %v10171_v57 = vcombine.low %v5071_v55, %v5075_v41 }
 0x50b   :  { %8444 = vmatprep.subr.bf16.mxu0 %v10220_v51  ;;  %v4963_v38 = vld [vmem:[#allocation11 + $0x6f8] sm:$0xff] }
 0x50c   :  { %v5063_v51 = vld [vmem:[#allocation11 + $0xa18] sm:$0xff]  ;;  %v10060_v45 = vcombine.high %v4959_v3, %v4963_v38 }
 0x50d   :  { %8398 = vmatpush1.bf16.msra.mxu1 %v9987_v47  ;;  %v5067_v40 = vld [vmem:[#allocation11 + $0xa38] sm:$0xff] }
 0x50e   :  { %8445 = vmatpush2.bf16.msra.mxu0 %v10219_v48  ;;  %8399 = vmatprep.subr.bf16.mxu1 %v9980_v39  ;;  %v10164_v47 = vcombine.high %v5063_v51, %v5067_v40  ;;  %v4951_v48 = vld [vmem:[#allocation11 + $0x698] sm:$0xff]  ;;  %v10163_v53 = vcombine.low %v5063_v51, %v5067_v40 }
 0x50f   :  { %8446 = vmatprep.subr.bf16.mxu0 %v10212_v63  ;;  %v4955_v39 = vld [vmem:[#allocation11 + $0x6b8] sm:$0xff]  ;;  %v10059_v63 = vcombine.low %v4959_v3, %v4963_v38 }
 0x510   :  { %v10052_v62 = vcombine.high %v4951_v48, %v4955_v39  ;;  %v10519_v56 = vld [vmem:[#allocation14 + $0x70] sm:$0xff]  }
 0x511   :  { %8400 = vmatpush1.bf16.msra.mxu1 %v9979_v43  ;;  %v4943_v43 = vld [vmem:[#allocation11 + $0x658] sm:$0xff] }
 0x512   :  { %8447 = vmatpush2.bf16.msra.mxu0 %v10211_v24  ;;  %8401 = vmatprep.subr.bf16.mxu1 %v9972_v21  ;;  %v4947_v24 = vld [vmem:[#allocation11 + $0x678] sm:$0xff]  ;;  %v10051_v21 = vcombine.low %v4951_v48, %v4955_v39  ;;  %v10530_v48 = vld [vmem:[#allocation14 + $0x8] sm:$0xff]  }
 0x513   :  { %8448 = vmatprep.subr.bf16.mxu0 %v10204_v33  ;;  %v10518_v33 = vld [vmem:[#allocation14 + $0x38] sm:$0xff]   ;;  %v10044_v7 = vcombine.high %v4943_v43, %v4947_v24  ;;  %v4935_v25 = vld [vmem:[#allocation11 + $0x618] sm:$0xff] }
 0x514   :  { %v4939_v59 = vld [vmem:[#allocation11 + $0x638] sm:$0xff] }
 0x515   :  { %8402 = vmatpush1.bf16.msra.mxu1 %v9971_v0  ;;  %v8519_v0 = vpack.c.bf16 %v8511_v23, %v8511_v23  ;;  %v10520_v20 = vld [vmem:[#allocation14 + $0x30] sm:$0xff]   ;;  %v10532_v23 = vld [vmem:[#allocation14] sm:$0xff]  }
 0x516   :  { %8449 = vmatpush2.bf16.msra.mxu0 %v10203_v19  ;;  %8403 = vmatprep.subr.bf16.mxu1 %v10092_v35  ;;  %v10043_v35 = vcombine.low %v4943_v43, %v4947_v24  ;;  %v5183_v1 = vld [vmem:[#allocation11 + $0xdd8] sm:$0xff]  ;;  %v8510_v24 = vmax.f32 %v11165_v28, 0.0 }
 0x517   :  { %8450 = vmatprep.subr.bf16.mxu0 %v10196_v13  ;;  %v10036_v13 = vcombine.high %v4935_v25, %v4939_v59  ;;  %v5187_v32 = vld [vmem:[#allocation11 + $0xdf8] sm:$0xff] }
 0x518   :  { %v5175_v10 = vld [vmem:[#allocation11 + $0xd98] sm:$0xff]  ;;  %v10283_v11 = vcombine.low %v5183_v1, %v5187_v32 }
 0x519   :  { %8404 = vmatpush2.bf16.msra.mxu1 %v10091_v60  ;;  %v5179_v8 = vld [vmem:[#allocation11 + $0xdb8] sm:$0xff] }
 0x51a   :  { %8451 = vmatpush2.bf16.msra.mxu0 %v10195_v4  ;;  %8405 = vmatprep.subr.bf16.mxu1 %v10084_v54  ;;  %v10035_v4 = vcombine.low %v4935_v25, %v4939_v59  ;;  %v10522_v54 = vld [vmem:[#allocation14 + $0x28] sm:$0xff]   ;;  %v5171_v22 = vld [vmem:[#allocation11 + $0xd78] sm:$0xff]  ;;  %v10275_v41 = vcombine.low %v5175_v10, %v5179_v8  ;;  %v10550_v59 = vld [vmem:[#allocation14 + $0x138] sm:$0xff]  }
 0x51b   :  { %8452 = vmatprep.subr.bf16.mxu0 %v10188_v9  ;;  %v10284_v9 = vcombine.high %v5183_v1, %v5187_v32  ;;  %v5159_v3 = vld [vmem:[#allocation11 + $0xd18] sm:$0xff] }
 0x51c   :  { %v5163_v38 = vld [vmem:[#allocation11 + $0xd38] sm:$0xff] }
 0x51d   :  { %8406 = vmatpush2.bf16.msra.mxu1 %v10083_v15  ;;  %v10524_v15 = vld [vmem:[#allocation14 + $0x20] sm:$0xff]   ;;  %v10552_v1 = vld [vmem:[#allocation14 + $0x130] sm:$0xff]  }
 0x51e   :  { %8453 = vmatpush2.bf16.msra.mxu0 %v10187_v16  ;;  %8407 = vmatprep.subr.bf16.mxu1 %v10076_v18  ;;  %v10276_v16 = vcombine.high %v5175_v10, %v5179_v8  ;;  %v10525_v18 = vld [vmem:[#allocation14 + $0x58] sm:$0xff]   ;;  %v5247_v32 = vld [vmem:[#allocation11 + $0xfd8] sm:$0xff]  ;;  %v10555_v8 = vld [vmem:[#allocation14 + $0x160] sm:$0xff]  }
 0x51f   :  { %8454 = vmatprep.subr.bf16.mxu0 %v10180_v14  ;;  %v5167_v14 = vld [vmem:[#allocation11 + $0xd58] sm:$0xff] }
 0x520   :  { %v5243_v10 = vld [vmem:[#allocation11 + $0xfb8] sm:$0xff] }
 0x521   :  { %8408 = vmatpush2.bf16.msra.mxu1 %v10075_v31 }
 0x522   :  { %8455 = vmatpush2.bf16.msra.mxu0 %v10179_v37  ;;  %8409 = vmatprep.subr.bf16.mxu1 %v10068_v34  ;;  %v10526_v37 = vld [vmem:[#allocation14 + $0x18] sm:$0xff]   ;;  %v10268_v34 = vcombine.high %v5167_v14, %v5171_v22 }
 0x523   :  { %8456 = vmatprep.subr.bf16.mxu0 %v10172_v36  ;;  %v10527_v36 = vld [vmem:[#allocation14 + $0x50] sm:$0xff]  }
 0x525   :  { %8410 = vmatpush2.bf16.msra.mxu1 %v10067_v42  ;;  %v10260_v42 = vcombine.high %v5159_v3, %v5163_v38 }
 0x526   :  { %8457 = vmatpush2.bf16.msra.mxu0 %v10171_v57  ;;  %8411 = vmatprep.subr.bf16.mxu1 %v10060_v45  ;;  %v5151_v57 = vld [vmem:[#allocation11 + $0xcd8] sm:$0xff] }
 0x527   :  { %8458 = vmatprep.subr.bf16.mxu0 %v10164_v47  ;;  %v5155_v45 = vld [vmem:[#allocation11 + $0xcf8] sm:$0xff]  ;;  %v10259_v47 = vcombine.low %v5159_v3, %v5163_v38 }
 0x528   :  { %v10252_v39 = vcombine.high %v5151_v57, %v5155_v45  ;;  %v10559_v3 = vld [vmem:[#allocation14 + $0x150] sm:$0xff]  }
 0x529   :  { %8412 = vmatpush2.bf16.msra.mxu1 %v10059_v63  ;;  %v10531_v63 = vld [vmem:[#allocation14 + $0x40] sm:$0xff]  }
 0x52a   :  { %8459 = vmatpush2.bf16.msra.mxu0 %v10163_v53  ;;  %8413 = vmatprep.subr.bf16.mxu1 %v10052_v62  ;;  %v5143_v53 = vld [vmem:[#allocation11 + $0xc98] sm:$0xff] }
 0x52b   :  { %10414 = vmatprep.subr.bf16.mxu0 %v10517_v49  ;;  %v5147_v62 = vld [vmem:[#allocation11 + $0xcb8] sm:$0xff]  ;;  %v10251_v49 = vcombine.low %v5151_v57, %v5155_v45  ;;  %v10562_v45 = vld [vmem:[#allocation14 + $0x108] sm:$0xff]  }
 0x52c   :  { %v10244_v43 = vcombine.high %v5143_v53, %v5147_v62 }
 0x52d   :  { %v11191_v19 = vpop.f32.mrf.mxu0  ;;  %8414 = vmatpush2.bf16.msra.mxu1 %v10051_v21  ;;  %8461 = vmatmul.mubr.bf16.vlgmr.msra.gmra.mxu0 %v11107_v5  ;;  %v5135_v21 = vld [vmem:[#allocation11 + $0xc58] sm:$0xff] }
 0x52e   :  { %10415 = vmatpush3.bf16.msra.mxu0 %v10518_v33  ;;  %9077 = vmatprep.mubr.bf16.mxu0 %v8519_v0  ;;  %v5139_v33 = vld [vmem:[#allocation11 + $0xc78] sm:$0xff]  ;;  %v8518_v0 = vpack.c.bf16 %v8510_v24, %v8510_v24 }
 0x52f   :  { %v11194_v26 = vpop.f32.mrf.mxu0  ;;  %8415 = vmatprep.subr.bf16.mxu1 %v10044_v7  ;;  %10416 = vmatprep.subr.bf16.mxu0 %v10519_v56  ;;  %v10549_v7 = vld [vmem:[#allocation14 + $0x178] sm:$0xff]   ;;  %v10243_v56 = vcombine.low %v5143_v53, %v5147_v62  ;;  %v10236_v25 = vcombine.high %v5135_v21, %v5139_v33  ;;  %v10564_v62 = vld [vmem:[#allocation14 + $0x100] sm:$0xff]  }
 0x531   :  { %v8220_v60 = vpop.f32.mrf.mxu0  ;;  %8416 = vmatpush2.bf16.msra.mxu1 %v10043_v35  ;;  %v5127_v35 = vld [vmem:[#allocation11 + $0xc18] sm:$0xff] }
 0x532   :  { %10417 = vmatpush3.bf16.msra.mxu0 %v10520_v20  ;;  %8417 = vmatprep.subr.bf16.mxu1 %v10036_v13  ;;  %v5131_v20 = vld [vmem:[#allocation11 + $0xc38] sm:$0xff] }
 0x533   :  { %v8221_v5 = vpop.f32.mrf.mxu0  ;;  %10418 = vmatprep.subr.bf16.mxu0 %v10521_v27  ;;  %v10551_v13 = vld [vmem:[#allocation14 + $0x170] sm:$0xff]   ;;  %v10235_v27 = vcombine.low %v5135_v21, %v5139_v33  ;;  %v10228_v28 = vcombine.high %v5127_v35, %v5131_v20 }
 0x534   :  { %v5251_v60 = vld [vmem:[#allocation11 + $0xff8] sm:$0xff]  ;;  %v10554_v5 = vld [vmem:[#allocation14 + $0x128] sm:$0xff]  }
 0x535   :  { %8418 = vmatpush2.bf16.msra.mxu1 %v10035_v4  ;;  %v10553_v4 = vld [vmem:[#allocation14 + $0x168] sm:$0xff]   ;;  %v5191_v21 = vld [vmem:[#allocation11 + $0xe18] sm:$0xff] }
 0x536   :  { %10419 = vmatpush3.bf16.msra.mxu0 %v10522_v54  ;;  %8469 = vmatprep.subr.bf16.mxu1 %v10284_v9  ;;  %v10227_v54 = vcombine.low %v5127_v35, %v5131_v20  ;;  %v10348_v9 = vcombine.high %v5247_v32, %v5251_v60  ;;  %v5195_v33 = vld [vmem:[#allocation11 + $0xe38] sm:$0xff] }
 0x537   :  { %10420 = vmatprep.subr.bf16.mxu0 %v10523_v46  ;;  %v5239_v46 = vld [vmem:[#allocation11 + $0xf98] sm:$0xff]  ;;  %v10291_v20 = vcombine.low %v5191_v21, %v5195_v33 }
 0x538   :  { %v8175_v44 = vpop.f32.mrf.mxu1  ;;  %8420 = vmatmul.mubr.bf16.vlgmr.msra.gmra.mxu1 %v11084_v6  ;;  %v10267_v6 = vcombine.low %v5167_v14, %v5171_v22  ;;  %v5235_v14 = vld [vmem:[#allocation11 + $0xf78] sm:$0xff]  ;;  %v10557_v22 = vld [vmem:[#allocation14 + $0x158] sm:$0xff]  }
 0x539   :  { %v11198_v55 = vadd.f32 %v8175_v44, %v11186_v2  ;;  %8470 = vmatpush1.bf16.msra.mxu1 %v10283_v11  ;;  %8501 = vmatprep.mubr.bf16.mxu1 %v11127_v29  ;;  %v10528_v2 = vld [vmem:[#allocation14 + $0x10] sm:$0xff]   ;;  %v10529_v29 = vld [vmem:[#allocation14 + $0x48] sm:$0xff]   ;;  %v10347_v11 = vcombine.low %v5247_v32, %v5251_v60  ;;  %v10339_v44 = vcombine.low %v5239_v46, %v5243_v10  ;;  %v10534_v60 = vld [vmem:[#allocation14 + $0xb8] sm:$0xff]  }
 0x53a   :  { %v11201_v31 = vpop.f32.mrf.mxu1  ;;  %10421 = vmatpush3.bf16.msra.mxu0 %v10524_v15  ;;  %8471 = vmatprep.subr.bf16.mxu1 %v10276_v16  ;;  %v10340_v15 = vcombine.high %v5239_v46, %v5243_v10  ;;  %v10556_v16 = vld [vmem:[#allocation14 + $0x120] sm:$0xff]   ;;  %v5277_v32 = vrot.slane %v11175_v50, %v10968_v12  ;;  %v10537_v10 = vld [vmem:[#allocation14 + $0xe8] sm:$0xff]  }
 0x53b   :  { %10422 = vmatprep.subr.bf16.mxu0 %v10525_v18  ;;  %v5231_v18 = vld [vmem:[#allocation11 + $0xf58] sm:$0xff] }
 0x53c   :  { %v8179_v51 = vpop.f32.mrf.mxu1  ;;  %v10331_v38 = vcombine.low %v5231_v18, %v5235_v14 }
 0x53d   :  { %8472 = vmatpush1.bf16.msra.mxu1 %v10275_v41  ;;  %v10332_v41 = vcombine.high %v5231_v18, %v5235_v14  ;;  %v10539_v18 = vld [vmem:[#allocation14 + $0xe0] sm:$0xff]   ;;  %v10542_v14 = vld [vmem:[#allocation14 + $0x98] sm:$0xff]  }
 0x53e   :  { %v8180_v40 = vpop.f32.mrf.mxu1  ;;  %10423 = vmatpush3.bf16.msra.mxu0 %v10526_v37  ;;  %8473 = vmatprep.subr.bf16.mxu1 %v10268_v34  ;;  %v10558_v37 = vld [vmem:[#allocation14 + $0x118] sm:$0xff]   ;;  %v5223_v34 = vld [vmem:[#allocation11 + $0xf18] sm:$0xff] }
 0x53f   :  { %10424 = vmatprep.subr.bf16.mxu0 %v10527_v36  ;;  %v5227_v36 = vld [vmem:[#allocation11 + $0xf38] sm:$0xff] }
 0x540   :  { %v10324_v51 = vcombine.high %v5223_v34, %v5227_v36  ;;  %v5215_v40 = vld [vmem:[#allocation11 + $0xed8] sm:$0xff] }
 0x541   :  { %8474 = vmatpush1.bf16.msra.mxu1 %v10267_v6  ;;  %v10560_v6 = vld [vmem:[#allocation14 + $0x110] sm:$0xff]  }
 0x542   :  { %10425 = vmatpush3.bf16.msra.mxu0 %v10528_v2  ;;  %8475 = vmatprep.subr.bf16.mxu1 %v10260_v42  ;;  %v5219_v2 = vld [vmem:[#allocation11 + $0xef8] sm:$0xff]  ;;  %v10561_v42 = vld [vmem:[#allocation14 + $0x148] sm:$0xff]  }
 0x543   :  { %10426 = vmatprep.subr.bf16.mxu0 %v10529_v29  ;;  %v10323_v29 = vcombine.low %v5223_v34, %v5227_v36  ;;  %v10316_v57 = vcombine.high %v5215_v40, %v5219_v2  ;;  %v10547_v34 = vld [vmem:[#allocation14 + $0xc0] sm:$0xff]  }
 0x544   :  { %v10548_v36 = vld [vmem:[#allocation14 + $0x80] sm:$0xff]  }
 0x545   :  { %8476 = vmatpush1.bf16.msra.mxu1 %v10259_v47  ;;  %v5207_v47 = vld [vmem:[#allocation11 + $0xe98] sm:$0xff] }
 0x546   :  { %10427 = vmatpush3.bf16.msra.mxu0 %v10530_v48  ;;  %8477 = vmatprep.subr.bf16.mxu1 %v10252_v39  ;;  %v5211_v48 = vld [vmem:[#allocation11 + $0xeb8] sm:$0xff]  ;;  %v10563_v39 = vld [vmem:[#allocation14 + $0x140] sm:$0xff]  }
 0x547   :  { %10428 = vmatprep.subr.bf16.mxu0 %v10531_v63  ;;  %v10315_v63 = vcombine.low %v5215_v40, %v5219_v2  ;;  %v10308_v53 = vcombine.high %v5207_v47, %v5211_v48  ;;  %v10567_v40 = vld [vmem:[#allocation14 + $0x1f0] sm:$0xff]  }
 0x548   :  { %v10568_v2 = vld [vmem:[#allocation14 + $0x1b0] sm:$0xff]  }
 0x549   :  { %8478 = vmatpush1.bf16.msra.mxu1 %v10251_v49  ;;  %v5199_v49 = vld [vmem:[#allocation11 + $0xe58] sm:$0xff] }
 0x54a   :  { %10429 = vmatpush3.bf16.msra.mxu0 %v10532_v23  ;;  %8479 = vmatprep.subr.bf16.mxu1 %v10244_v43  ;;  %v5203_v23 = vld [vmem:[#allocation11 + $0xe78] sm:$0xff]  ;;  %v10307_v43 = vcombine.low %v5207_v47, %v5211_v48  ;;  %v10574_v47 = vld [vmem:[#allocation14 + $0x198] sm:$0xff]  }
 0x54b   :  { %10458 = vmatprep.subr.bf16.mxu0 %v10549_v7  ;;  %v10300_v24 = vcombine.high %v5199_v49, %v5203_v23  ;;  %v10575_v48 = vld [vmem:[#allocation14 + $0x1d0] sm:$0xff]  }
 0x54d   :  { %8480 = vmatpush1.bf16.msra.mxu1 %v10243_v56  ;;  %9078 = vmatmul.mubr.bf16.vlgmr.msra.gmra.mxu0 %v8518_v0  ;;  %v10299_v56 = vcombine.low %v5199_v49, %v5203_v23 }
 0x54e   :  { %8481 = vmatprep.subr.bf16.mxu1 %v10236_v25  ;;  %10459 = vmatpush3.bf16.msra.mxu0 %v10550_v59  ;;  %v10292_v25 = vcombine.high %v5191_v21, %v5195_v33  ;;  %v8178_v59 = vadd.f32 %v11201_v31, %v11188_v17  ;;  %v10578_v33 = vld [vmem:[#allocation14 + $0x188] sm:$0xff]  }
 0x54f   :  { %10460 = vmatprep.subr.bf16.mxu0 %v10551_v13  ;;  %v10533_v13 = vld [vmem:[#allocation14 + $0xf8] sm:$0xff]  }
 0x551   :  { %8482 = vmatpush1.bf16.msra.mxu1 %v10235_v27  ;;  %v5273_v27 = vrot.slane %v11175_v50, %v10985_v61  ;;  %v10536_v61 = vld [vmem:[#allocation14 + $0xb0] sm:$0xff]  }
 0x552   :  { %8483 = vmatprep.subr.bf16.mxu1 %v10228_v28  ;;  %10461 = vmatpush3.bf16.msra.mxu0 %v10552_v1  ;;  %v8513_v28 = vmax.f32 %v8178_v59, 0.0 }
 0x553   :  { %10462 = vmatprep.subr.bf16.mxu0 %v10553_v4  ;;  %v10535_v4 = vld [vmem:[#allocation14 + $0xf0] sm:$0xff]   ;;  %v8217_v17 = vadd.f32 %v11191_v19, %v5273_v27 }
 0x554   :  { %v8521_v31 = vpack.c.bf16 %v8513_v28, %v8513_v28 }
 0x555   :  { %8484 = vmatpush1.bf16.msra.mxu1 %v10227_v54 }
 0x556   :  { %8485 = vmatprep.subr.bf16.mxu1 %v10348_v9  ;;  %10463 = vmatpush3.bf16.msra.mxu0 %v10554_v5  ;;  %v8219_v9 = vadd.f32 %v11194_v26, %v5277_v32  ;;  %v10541_v26 = vld [vmem:[#allocation14 + $0xd8] sm:$0xff]  }
 0x557   :  { %10464 = vmatprep.subr.bf16.mxu0 %v10555_v8 }
 0x559   :  { %8486 = vmatpush2.bf16.msra.mxu1 %v10347_v11 }
 0x55a   :  { %8487 = vmatprep.subr.bf16.mxu1 %v10340_v15  ;;  %10465 = vmatpush3.bf16.msra.mxu0 %v10556_v16  ;;  %v10538_v15 = vld [vmem:[#allocation14 + $0xa8] sm:$0xff]  }
 0x55b   :  { %10466 = vmatprep.subr.bf16.mxu0 %v10557_v22  ;;  %v10543_v22 = vld [vmem:[#allocation14 + $0xd0] sm:$0xff]  }
 0x55d   :  { %8488 = vmatpush2.bf16.msra.mxu1 %v10339_v44  ;;  %v10544_v44 = vld [vmem:[#allocation14 + $0x90] sm:$0xff]  }
 0x55e   :  { %8489 = vmatprep.subr.bf16.mxu1 %v10332_v41  ;;  %10467 = vmatpush3.bf16.msra.mxu0 %v10558_v37  ;;  %v10545_v41 = vld [vmem:[#allocation14 + $0xc8] sm:$0xff]  }
 0x55f   :  { %10468 = vmatprep.subr.bf16.mxu0 %v10559_v3  ;;  %v10546_v37 = vld [vmem:[#allocation14 + $0x88] sm:$0xff]   ;;  %v8512_v3 = vmax.f32 %v11198_v55, 0.0  ;;  %v10573_v55 = vld [vmem:[#allocation14 + $0x1d8] sm:$0xff]  }
 0x561   :  { %8490 = vmatpush2.bf16.msra.mxu1 %v10331_v38  ;;  %v10565_v38 = vld [vmem:[#allocation14 + $0x1f8] sm:$0xff]  }
 0x562   :  { %8491 = vmatprep.subr.bf16.mxu1 %v10324_v51  ;;  %10469 = vmatpush3.bf16.msra.mxu0 %v10560_v6  ;;  %v10566_v51 = vld [vmem:[#allocation14 + $0x1b8] sm:$0xff]   ;;  %v8520_v6 = vpack.c.bf16 %v8512_v3, %v8512_v3 }
 0x563   :  { %10470 = vmatprep.subr.bf16.mxu0 %v10561_v42  ;;  %v10569_v42 = vld [vmem:[#allocation14 + $0x1e8] sm:$0xff]  }
 0x565   :  { %8492 = vmatpush2.bf16.msra.mxu1 %v10323_v29  ;;  %v10570_v29 = vld [vmem:[#allocation14 + $0x1a8] sm:$0xff]  }
 0x566   :  { %8493 = vmatprep.subr.bf16.mxu1 %v10316_v57  ;;  %10471 = vmatpush3.bf16.msra.mxu0 %v10562_v45  ;;  %v10571_v57 = vld [vmem:[#allocation14 + $0x1e0] sm:$0xff]  }
 0x567   :  { %10472 = vmatprep.subr.bf16.mxu0 %v10563_v39  ;;  %v10572_v45 = vld [vmem:[#allocation14 + $0x1a0] sm:$0xff]   ;;  %v10576_v39 = vld [vmem:[#allocation14 + $0x190] sm:$0xff]  }
 0x569   :  { %8494 = vmatpush2.bf16.msra.mxu1 %v10315_v63 }
 0x56a   :  { %8495 = vmatprep.subr.bf16.mxu1 %v10308_v53  ;;  %10473 = vmatpush3.bf16.msra.mxu0 %v10564_v62 }
 0x56d   :  { %v8298_v7 = vpop.f32.mrf.mxu0  ;;  %8496 = vmatpush2.bf16.msra.mxu1 %v10307_v43 }
 0x56e   :  { %8497 = vmatprep.subr.bf16.mxu1 %v10300_v24  ;;  %v10577_v24 = vld [vmem:[#allocation14 + $0x1c8] sm:$0xff]  }
 0x56f   :  { %v8300_v0 = vpop.f32.mrf.mxu0 }
 0x571   :  { %v8302_v35 = vpop.f32.mrf.mxu0  ;;  %8498 = vmatpush2.bf16.msra.mxu1 %v10299_v56 }
 0x572   :  { %8499 = vmatprep.subr.bf16.mxu1 %v10292_v25 }
 0x573   :  { %v8303_v1 = vpop.f32.mrf.mxu0 }
 0x575   :  { %8500 = vmatpush2.bf16.msra.mxu1 %v10291_v20  ;;  %v10580_v20 = vld [vmem:[#allocation14 + $0x180] sm:$0xff]  }
 0x576   :  { %10436 = vmatprep.subr.bf16.mxu1 %v10533_v13 }
 0x578   :  { %v8257_v54 = vpop.f32.mrf.mxu1  ;;  %8502 = vmatmul.mubr.bf16.vlgmr.msra.gmra.mxu1 %v11129_v30  ;;  %v10540_v30 = vld [vmem:[#allocation14 + $0xa0] sm:$0xff]  }
 0x579   :  { %v8258_v5 = vadd.f32 %v8257_v54, %v8217_v17  ;;  %10437 = vmatpush3.bf16.msra.mxu1 %v10534_v60  ;;  %9117 = vmatprep.mubr.bf16.mxu1 %v8521_v31  ;;  %v5281_v60 = vrot.slane %v11175_v50, %v10982_v58  ;;  %v5285_v17 = vrot.slane %v11175_v50, %v10971_v52 }
 0x57a   :  { %v8259_v46 = vpop.f32.mrf.mxu1  ;;  %10438 = vmatprep.subr.bf16.mxu1 %v10535_v4 }
 0x57b   :  { %v8260_v12 = vadd.f32 %v8259_v46, %v8219_v9  ;;  %v8299_v8 = vadd.f32 %v8298_v7, %v8258_v5 }
 0x57c   :  { %v8261_v11 = vpop.f32.mrf.mxu1 }
 0x57d   :  { %10439 = vmatpush3.bf16.msra.mxu1 %v10536_v61  ;;  %v8301_v16 = vadd.f32 %v8300_v0, %v8260_v12  ;;  %v10579_v0 = vld [vmem:[#allocation14 + $0x1c0] sm:$0xff]  }
 0x57e   :  { %v8262_v19 = vpop.f32.mrf.mxu1  ;;  %10440 = vmatprep.subr.bf16.mxu1 %v10537_v10 }
 0x581   :  { %10441 = vmatpush3.bf16.msra.mxu1 %v10538_v15 }
 0x582   :  { %10442 = vmatprep.subr.bf16.mxu1 %v10539_v18 }
 0x585   :  { %10443 = vmatpush3.bf16.msra.mxu1 %v10540_v30 }
 0x586   :  { %10444 = vmatprep.subr.bf16.mxu1 %v10541_v26 }
 0x589   :  { %10445 = vmatpush3.bf16.msra.mxu1 %v10542_v14 }
 0x58a   :  { %10446 = vmatprep.subr.bf16.mxu1 %v10543_v22 }
 0x58d   :  { %10447 = vmatpush3.bf16.msra.mxu1 %v10544_v44 }
 0x58e   :  { %10448 = vmatprep.subr.bf16.mxu1 %v10545_v41 }
 0x591   :  { %10449 = vmatpush3.bf16.msra.mxu1 %v10546_v37 }
 0x592   :  { %10450 = vmatprep.subr.bf16.mxu1 %v10547_v34 }
 0x595   :  { %10451 = vmatpush3.bf16.msra.mxu1 %v10548_v36  ;;  %v10349_v36 = vld [vmem:[#allocation16] ss:$0 sm:$0xff] }
 0x596   :  { %10480 = vmatprep.subr.bf16.mxu1 %v10565_v38 }
 0x598   :  { %9118 = vmatmul.mubr.bf16.vlgmr.msra.gmra.mxu1 %v8520_v6 }
 0x599   :  { %10481 = vmatpush3.bf16.msra.mxu1 %v10566_v51 }
 0x59a   :  { %10482 = vmatprep.subr.bf16.mxu1 %v10567_v40 }
 0x59d   :  { %10483 = vmatpush3.bf16.msra.mxu1 %v10568_v2 }
 0x59e   :  { %10484 = vmatprep.subr.bf16.mxu1 %v10569_v42 }
 0x5a1   :  { %10485 = vmatpush3.bf16.msra.mxu1 %v10570_v29 }
 0x5a2   :  { %10486 = vmatprep.subr.bf16.mxu1 %v10571_v57 }
 0x5a5   :  { %10487 = vmatpush3.bf16.msra.mxu1 %v10572_v45 }
 0x5a6   :  { %10488 = vmatprep.subr.bf16.mxu1 %v10573_v55 }
 0x5a9   :  { %10489 = vmatpush3.bf16.msra.mxu1 %v10574_v47 }
 0x5aa   :  { %10490 = vmatprep.subr.bf16.mxu1 %v10575_v48 }
 0x5ad   :  { %v8380_v63 = vpop.f32.mrf.mxu0  ;;  %10491 = vmatpush3.bf16.msra.mxu1 %v10576_v39 }
 0x5ae   :  { %10492 = vmatprep.subr.bf16.mxu1 %v10577_v24  ;;  %v8381_v31 = vadd.f32 %v8380_v63, %v5281_v60 }
 0x5af   :  { %v8382_v53 = vpop.f32.mrf.mxu0 }
 0x5b0   :  { %v8383_v9 = vadd.f32 %v8382_v53, %v5285_v17 }
 0x5b1   :  { %v8384_v62 = vpop.f32.mrf.mxu0  ;;  %10493 = vmatpush3.bf16.msra.mxu1 %v10578_v33 }
 0x5b2   :  { %10494 = vmatprep.subr.bf16.mxu1 %v10579_v0 }
 0x5b3   :  { %v8385_v49 = vpop.f32.mrf.mxu0 }
 0x5b5   :  { %10495 = vmatpush3.bf16.msra.mxu1 %v10580_v20 }
 0x5b8   :  { %v8339_v23 = vpop.f32.mrf.mxu1 }
 0x5b9   :  { %v8340_v43 = vadd.f32 %v8339_v23, %v8299_v8 }
 0x5ba   :  { %v8341_v21 = vpop.f32.mrf.mxu1 }
 0x5bb   :  { %v8342_v7 = vadd.f32 %v8341_v21, %v8301_v16  ;;  %v8514_v56 = vmax.f32 %v8340_v43, 0.0 }
 0x5bc   :  { %v8343_v25 = vpop.f32.mrf.mxu1 }
 0x5bd   :  { %v8515_v59 = vmax.f32 %v8342_v7, 0.0  ;;  %v8522_v27 = vpack.c.bf16 %v8514_v56, %v8514_v56 }
 0x5be   :  { %v8344_v35 = vpop.f32.mrf.mxu1 }
 0x5bf   :  { %v8523_v13 = vpack.c.bf16 %v8515_v59, %v8515_v59 }
 0x5c1   :  { %9157 = vmatprep.mubr.bf16.mxu0 %v8523_v13 }
 0x5c2   :  { %9158 = vmatmul.mubr.bf16.vlgmr.msra.gmra.mxu0 %v8522_v27 }
 0x5ed   :  { %v8462_v28 = vpop.f32.mrf.mxu0 }
 0x5ef   :  { %v8464_v1 = vpop.f32.mrf.mxu0 }
 0x5f1   :  { %v8466_v32 = vpop.f32.mrf.mxu0 }
 0x5f3   :  { %v8467_v4 = vpop.f32.mrf.mxu0 }
 0x5f8   :  { %v8421_v54 = vpop.f32.mrf.mxu1 }
 0x5f9   :  { %v8422_v5 = vadd.f32 %v8421_v54, %v8381_v31 }
 0x5fa   :  { %v8423_v61 = vpop.f32.mrf.mxu1 }
 0x5fb   :  { %v8424_v46 = vadd.f32 %v8423_v61, %v8383_v9  ;;  %v8463_v10 = vadd.f32 %v8462_v28, %v8422_v5 }
 0x5fc   :  { %v8425_v12 = vpop.f32.mrf.mxu1 }
 0x5fd   :  { %v8465_v8 = vadd.f32 %v8464_v1, %v8424_v46 }
 0x5fe   :  { %v8426_v11 = vpop.f32.mrf.mxu1 }
 0x60d   :  { %v10430_v15 = vpop.f32.mrf.mxu0 }
 0x60f   :  { %v10431_v16 = vpop.f32.mrf.mxu0 }
 0x610   :  { %v10432_v19 = vadd.f32 %v10431_v16, %v10430_v15 }
 0x611   :  { %v10433_v18 = vpop.f32.mrf.mxu0 }
 0x612   :  { %v9080_v51 = vadd.f32 %v10432_v19, %v10349_v36 }
 0x613   :  { %v10434_v30 = vpop.f32.mrf.mxu0 }
 0x638   :  { %v8503_v58 = vpop.f32.mrf.mxu1 }
 0x639   :  { %v8504_v26 = vadd.f32 %v8503_v58, %v8463_v10 }
 0x63a   :  { %v8505_v14 = vpop.f32.mrf.mxu1 }
 0x63b   :  { %v8506_v22 = vadd.f32 %v8505_v14, %v8465_v8  ;;  %v8516_v52 = vmax.f32 %v8504_v26, 0.0 }
 0x63c   :  { %v8507_v50 = vpop.f32.mrf.mxu1 }
 0x63d   :  { %v8517_v44 = vmax.f32 %v8506_v22, 0.0  ;;  %v8524_v34 = vpack.c.bf16 %v8516_v52, %v8516_v52 }
 0x63e   :  { %v8508_v41 = vpop.f32.mrf.mxu1 }
 0x63f   :  { %v8525_v37 = vpack.c.bf16 %v8517_v44, %v8517_v44 }
 0x641   :  { %9197 = vmatprep.mubr.bf16.mxu1 %v8525_v37 }
 0x642   :  { %9198 = vmatmul.mubr.bf16.vlgmr.msra.gmra.mxu1 %v8524_v34 }
 0x658   :  { %v10452_v3 = vpop.f32.mrf.mxu1 }
 0x65a   :  { %v10453_v38 = vpop.f32.mrf.mxu1 }
 0x65b   :  { %v10454_v6 = vadd.f32 %v10453_v38, %v10452_v3 }
 0x65c   :  { %v10455_v40 = vpop.f32.mrf.mxu1 }
 0x65d   :  { %v9120_v2 = vadd.f32 %v10454_v6, %v9080_v51 }
 0x65e   :  { %v10456_v42 = vpop.f32.mrf.mxu1 }
 0x682   :  { %v10474_v29 = vpop.f32.mrf.mxu0 }
 0x684   :  { %v10475_v57 = vpop.f32.mrf.mxu0 }
 0x685   :  { %v10476_v45 = vadd.f32 %v10475_v57, %v10474_v29 }
 0x686   :  { %v10477_v55 = vpop.f32.mrf.mxu0 }
 0x687   :  { %v9160_v47 = vadd.f32 %v10476_v45, %v9120_v2 }
 0x688   :  { %v10478_v48 = vpop.f32.mrf.mxu0 }
 0x702   :  { %v10496_v39 = vpop.f32.mrf.mxu1 }
 0x704   :  { %v10497_v63 = vpop.f32.mrf.mxu1 }
 0x705   :  { %v10498_v53 = vadd.f32 %v10497_v63, %v10496_v39 }
 0x706   :  { %v10499_v62 = vpop.f32.mrf.mxu1 }
 0x707   :  { %v9200_v49 = vadd.f32 %v10498_v53, %v9160_v47 }
 0x708   :  { %v10500_v23 = vpop.f32.mrf.mxu1 }
 0x709   :  { %9205 = vst [vmem:[#allocation17] sm:$0xf] %v9200_v49 }
 0x70a   :  { %10775 = shalt.err (!%p10772_p7)
}
 0x70b   :  { %9215 = dma.vmem_to_hbm [thread:$0]  %s9213_s8, 64, %s11230_s9, [#allocation4]  }
 0x70c   :  { %10794 = dma.done.wait [#allocation4], 64  }
 0x70d   :  { %10795 = vsyncadd [#allocation4], 4294967232 }
 0x70e   :  { %9219 = vsyncpa [#allocation3], 1 }
 0x70f   :  { %9220 = vsyncpa [#allocation6], 1 }
 0x710   :  { %9221 = vsyncpa [#allocation9], 1 }
 0x711   :  { %9222 = vsyncpa [#allocation12], 1 }
 0x712   :  { %9223 = vsyncpa [#allocation15], 1 }
 0x713   :  { %9224 = vsyncpa [#allocation4], 1 }

</bundles_post_ra>
